<compile_context>
chip_gen: v7x
topology: tpu7x:2x2x1
jax: 0.10.0
libtpu: 0.0.40
codegen_flags: <defaults>
</compile_context>

<pallas_src>
import functools

import jax
import jax.numpy as jnp
from jax.experimental import pallas as pl
from jax.experimental.pallas import tpu as pltpu


# ----------------------------------------------------------------------------
# helpers
# ----------------------------------------------------------------------------
def _round_up(n, m):
    return ((n + m - 1) // m) * m


def _pick_tile(s_pad):
    """Largest of 512/256/128 that divides the (128-aligned) padded spatial dim."""
    for t in (512, 256, 128):
        if s_pad % t == 0:
            return t
    return s_pad


def _sigmoid(x):
    # exp on the EUP, divide replaced by approximate reciprocal (EUP slot).
    return pl.reciprocal(1.0 + jnp.exp(-x), approx=True)


# ----------------------------------------------------------------------------
# Fused conv (+bias) + 2x2 max-pool (+sigmoid) GEMM kernel
# ----------------------------------------------------------------------------
def _conv_pool_kernel(p_ref, w_ref, b_ref, o_ref, *, apply_sigmoid):
    # p_ref: [4, K, TS] bf16   (4 = 2x2 pool-window corners)
    # w_ref: [Cout, K]  bf16
    # b_ref: [Cout, 1]  f32
    # o_ref: [Cout, TS]
    w = w_ref[...]
    r = jnp.dot(w, p_ref[0], preferred_element_type=jnp.float32)
    r = jnp.maximum(r, jnp.dot(w, p_ref[1], preferred_element_type=jnp.float32))
    r = jnp.maximum(r, jnp.dot(w, p_ref[2], preferred_element_type=jnp.float32))
    r = jnp.maximum(r, jnp.dot(w, p_ref[3], preferred_element_type=jnp.float32))
    y = r + b_ref[...]            # max(conv) + bias == max(conv + bias)
    if apply_sigmoid:
        y = _sigmoid(y)
    o_ref[...] = y.astype(o_ref.dtype)


def conv_pool_gemm(patches, wmat, bias, *, apply_sigmoid, out_dtype):
    """patches: [4, K, S_pad] bf16, wmat: [Cout, K] bf16 -> [Cout, S_pad]."""
    _, K, S_pad = patches.shape
    Cout = wmat.shape[0]
    TS = _pick_tile(S_pad)
    kernel = functools.partial(_conv_pool_kernel, apply_sigmoid=apply_sigmoid)
    return pl.pallas_call(
        kernel,
        out_shape=jax.ShapeDtypeStruct((Cout, S_pad), out_dtype),
        grid=(S_pad // TS,),
        in_specs=[
            pl.BlockSpec((4, K, TS), lambda m: (0, 0, m)),
            pl.BlockSpec((Cout, K), lambda m: (0, 0)),
            pl.BlockSpec((Cout, 1), lambda m: (0, 0)),
        ],
        out_specs=pl.BlockSpec((Cout, TS), lambda m: (0, m)),
        compiler_params=pltpu.CompilerParams(
            dimension_semantics=("parallel",)),
    )(patches, wmat, bias.reshape(Cout, 1).astype(jnp.float32))


def _conv_patches(x_cnhw, pad, batch_fastest):
    """5x5 'same' im2col with the 2x2 pool corners split out as a leading dim.

    x_cnhw: [C, B, H, W]  ->  patches [4, C*25, S]
    Column order is (b, oi, oj) if not batch_fastest else (oi, oj, b).
    """
    C, B, H, W = x_cnhw.shape
    Ho, Wo = H // 2, W // 2
    xp = jnp.pad(x_cnhw, ((0, 0), (0, 0), (pad, pad), (pad, pad)))
    taps = []
    for di in range(5):
        for dj in range(5):
            taps.append(xp[:, :, di:di + H, dj:dj + W])
    t = jnp.stack(taps, axis=1)                       # [C, 25, B, H, W]
    t = t.reshape(C * 25, B, Ho, 2, Wo, 2)            # [K, B, Ho, ci, Wo, cj]
    if batch_fastest:
        t = jnp.transpose(t, (3, 5, 0, 2, 4, 1))      # [ci, cj, K, Ho, Wo, B]
        S = Ho * Wo * B
    else:
        t = jnp.transpose(t, (3, 5, 0, 1, 2, 4))      # [ci, cj, K, B, Ho, Wo]
        S = B * Ho * Wo
    return t.reshape(4, C * 25, S)


def conv_block(x_cnhw, w, b, *, apply_sigmoid, batch_fastest, out_dtype):
    """Fused conv2d(5x5, pad=2) + bias + maxpool2x2 (+sigmoid).

    x_cnhw: [C, B, H, W] -> [Cout, S] with S = B*Ho*Wo (or Ho*Wo*B).
    """
    C, B, H, W = x_cnhw.shape
    Cout = w.shape[0]
    K = C * 25
    Kp = _round_up(K, 32)                             # pad contraction dim
    patches = _conv_patches(x_cnhw, 2, batch_fastest)
    S = patches.shape[2]
    S_pad = _round_up(S, 128)                         # lane-dense output tiles
    patches = jnp.pad(patches, ((0, 0), (0, Kp - K), (0, S_pad - S)))
    patches = patches.astype(jnp.bfloat16)
    wmat = jnp.pad(w.reshape(Cout, K), ((0, 0), (0, Kp - K))).astype(jnp.bfloat16)
    out = conv_pool_gemm(patches, wmat, b,
                         apply_sigmoid=apply_sigmoid, out_dtype=out_dtype)
    return out[:, :S]


# ----------------------------------------------------------------------------
# BatchNorm2d (batch stats) + sigmoid, channel-major layout [C, B*H*W]
# ----------------------------------------------------------------------------
def _bn_sigmoid_kernel(x_ref, g_ref, b_ref, o_ref):
    x = x_ref[...]
    mean = jnp.mean(x, axis=1, keepdims=True)
    d = x - mean
    var = jnp.mean(d * d, axis=1, keepdims=True)      # biased (PyTorch training)
    y = d * jax.lax.rsqrt(var + 1e-5) * g_ref[...] + b_ref[...]
    o_ref[...] = _sigmoid(y)


def batchnorm_sigmoid(z, gamma, beta):
    C, M = z.shape
    return pl.pallas_call(
        _bn_sigmoid_kernel,
        out_shape=jax.ShapeDtypeStruct((C, M), jnp.float32),
        grid=(1,),
        in_specs=[
            pl.BlockSpec((C, M), lambda i: (0, 0)),
            pl.BlockSpec((C, 1), lambda i: (0, 0)),
            pl.BlockSpec((C, 1), lambda i: (0, 0)),
        ],
        out_specs=pl.BlockSpec((C, M), lambda i: (0, 0)),
    )(z.astype(jnp.float32),
      gamma.reshape(C, 1).astype(jnp.float32),
      beta.reshape(C, 1).astype(jnp.float32))


# ----------------------------------------------------------------------------
# Fused FC head: fc1 + sigmoid + fc2 (weights in native PyTorch layout)
# ----------------------------------------------------------------------------
def _fc_head_kernel(a_ref, w1_ref, b1_ref, w2_ref, b2_ref, o_ref):
    # a: [F, B] bf16, w1: [K, F] bf16, b1: [K, 1], w2: [O, K], b2: [O, 1]
    h = jnp.dot(w1_ref[...], a_ref[...], preferred_element_type=jnp.float32)
    h = _sigmoid(h + b1_ref[...])
    out = jnp.dot(w2_ref[...], h, preferred_element_type=jnp.float32) + b2_ref[...]
    o_ref[...] = out


def fc_head(act, w1, b1, w2, b2):
    """act: [F, B] -> logits [O, B] (transposed problem, no weight transposes)."""
    F, B = act.shape
    K = w1.shape[0]
    O = w2.shape[0]
    return pl.pallas_call(
        _fc_head_kernel,
        out_shape=jax.ShapeDtypeStruct((O, B), jnp.float32),
        grid=(1,),
        in_specs=[
            pl.BlockSpec((F, B), lambda i: (0, 0)),
            pl.BlockSpec((K, F), lambda i: (0, 0)),
            pl.BlockSpec((K, 1), lambda i: (0, 0)),
            pl.BlockSpec((O, K), lambda i: (0, 0)),
            pl.BlockSpec((O, 1), lambda i: (0, 0)),
        ],
        out_specs=pl.BlockSpec((O, B), lambda i: (0, 0)),
    )(act.astype(jnp.bfloat16), w1.astype(jnp.bfloat16),
      b1.reshape(K, 1).astype(jnp.float32),
      w2.astype(jnp.float32), b2.reshape(O, 1).astype(jnp.float32))


# ----------------------------------------------------------------------------
# Full forward (mirrors Convolutional.forward)
# ----------------------------------------------------------------------------
def convolutional_forward(x, params):
    B, _, H, W = x.shape
    C1 = params["conv1_w"].shape[0]

    # -> channel-major [Cin, B, H, W]
    x_cnhw = jnp.transpose(x, (1, 0, 2, 3))

    # conv1 + pool + sigmoid, fused; output [32, B*14*14] bf16, cols (b, oi, oj)
    a1 = conv_block(x_cnhw, params["conv1_w"], params["conv1_b"],
                    apply_sigmoid=True, batch_fastest=False,
                    out_dtype=jnp.bfloat16)
    a1 = a1.reshape(C1, B, H // 2, W // 2)

    # conv2 + pool, fused; output [32, 7*7*B] f32, cols (oi, oj, b)
    a2 = conv_block(a1, params["conv2_w"], params["conv2_b"],
                    apply_sigmoid=False, batch_fastest=True,
                    out_dtype=jnp.float32)

    # batchnorm (batch stats) + sigmoid directly on [C, spatial] — no transposes
    a3 = batchnorm_sigmoid(a2, params["bn_gamma"], params["bn_beta"])

    # torch.flatten(a, 1) in transposed form: [32, 49*B] -> [1568, B] (pure reshape)
    act = a3.reshape(-1, B)

    # fc1 + sigmoid + fc2 fused; [O, B] -> [B, O]
    logits_t = fc_head(act, params["fc1_w"], params["fc1_b"],
                       params["fc2_w"], params["fc2_b"])
    return jnp.transpose(logits_t)


def init_params(key, K, O):
    ks = jax.random.split(key, 8)
    flat_in = 7 * 7 * 32
    return {
        "conv1_w": 0.05 * jax.random.normal(ks[0], (32, 1, 5, 5), jnp.float32),
        "conv1_b": 0.05 * jax.random.normal(ks[1], (32,), jnp.float32),
        "conv2_w": 0.05 * jax.random.normal(ks[2], (32, 32, 5, 5), jnp.float32),
        "conv2_b": 0.05 * jax.random.normal(ks[3], (32,), jnp.float32),
        "bn_gamma": jnp.ones((32,), jnp.float32),
        "bn_beta": jnp.zeros((32,), jnp.float32),
        "fc1_w": 0.05 * jax.random.normal(ks[4], (K, flat_in), jnp.float32),
        "fc1_b": 0.05 * jax.random.normal(ks[5], (K,), jnp.float32),
        "fc2_w": 0.05 * jax.random.normal(ks[6], (O, K), jnp.float32),
        "fc2_b": 0.05 * jax.random.normal(ks[7], (O,), jnp.float32),
    }


if __name__ == "__main__":
    K, O = 64, 10
    B = 2
    key = jax.random.PRNGKey(0)
    pkey, xkey = jax.random.split(key)
    params = init_params(pkey, K, O)
    # Spatial size must be 28 so that two 2x2 pools give 7*7*32 for fc1.
    x = jax.random.normal(xkey, (B, 1, 28, 28), jnp.float32)

    out = jax.jit(convolutional_forward)(x, params)
    out = jax.block_until_ready(out)
    assert out.shape == (B, O) and out.dtype == jnp.float32
    print("KERNEL_OK")
</pallas_src>

<mosaic_0001>
module attributes {stable_mosaic.version = 11 : i64} {
  func.func @_conv_pool_kernel(%arg0: i32, %arg1: memref<4x32x512xbf16, #tpu.memory_space<vmem>>, %arg2: memref<32x32xbf16, #tpu.memory_space<vmem>>, %arg3: memref<32x1xf32, #tpu.memory_space<vmem>>, %arg4: memref<32x512xbf16, #tpu.memory_space<vmem>>) attributes {dimension_semantics = [#tpu.dimension_semantics<parallel>], iteration_bounds = array<i64: 1>, scalar_prefetch = 0 : i64, scratch_operands = 0 : i64, tpu.core_type = #tpu.core_type<tc>, window_params = [{transform_indices = @transform_0, window_bounds = array<i64: 4, 32, 512>}, {pipeline_mode = #tpu.pipeline_mode<synchronous>, transform_indices = @transform_1, window_bounds = array<i64: 32, 32>}, {pipeline_mode = #tpu.pipeline_mode<synchronous>, transform_indices = @transform_2, window_bounds = array<i64: 32, 1>}, {transform_indices = @transform_3, window_bounds = array<i64: 32, 512>}]} {
    %c0 = arith.constant 0 : index
    %c0_0 = arith.constant 0 : index
    %0 = vector.load %arg2[%c0, %c0_0] : memref<32x32xbf16, #tpu.memory_space<vmem>>, vector<32x32xbf16>
    %c0_1 = arith.constant 0 : index
    %c0_2 = arith.constant 0 : index
    %c0_3 = arith.constant 0 : index
    %1 = vector.load %arg1[%c0_1, %c0_2, %c0_3] : memref<4x32x512xbf16, #tpu.memory_space<vmem>>, vector<1x32x512xbf16>
    %2 = vector.shape_cast %1 : vector<1x32x512xbf16> to vector<32x512xbf16>
    %cst = arith.constant dense<0.000000e+00> : vector<32x512xf32>
    %3 = tpu.matmul %0, %2, %cst {dimension_numbers = #tpu.dot_dimension_numbers<[1], [0], [0], [1], [0, 0, 1, 1], [], []>} : vector<32x32xbf16>, vector<32x512xbf16>, vector<32x512xf32> -> vector<32x512xf32>
    %c1 = arith.constant 1 : index
    %c0_4 = arith.constant 0 : index
    %c0_5 = arith.constant 0 : index
    %4 = vector.load %arg1[%c1, %c0_4, %c0_5] : memref<4x32x512xbf16, #tpu.memory_space<vmem>>, vector<1x32x512xbf16>
    %5 = vector.shape_cast %4 : vector<1x32x512xbf16> to vector<32x512xbf16>
    %cst_6 = arith.constant dense<0.000000e+00> : vector<32x512xf32>
    %6 = tpu.matmul %0, %5, %cst_6 {dimension_numbers = #tpu.dot_dimension_numbers<[1], [0], [0], [1], [0, 0, 1, 1], [], []>} : vector<32x32xbf16>, vector<32x512xbf16>, vector<32x512xf32> -> vector<32x512xf32>
    %7 = arith.maximumf %3, %6 : vector<32x512xf32>
    %c2 = arith.constant 2 : index
    %c0_7 = arith.constant 0 : index
    %c0_8 = arith.constant 0 : index
    %8 = vector.load %arg1[%c2, %c0_7, %c0_8] : memref<4x32x512xbf16, #tpu.memory_space<vmem>>, vector<1x32x512xbf16>
    %9 = vector.shape_cast %8 : vector<1x32x512xbf16> to vector<32x512xbf16>
    %cst_9 = arith.constant dense<0.000000e+00> : vector<32x512xf32>
    %10 = tpu.matmul %0, %9, %cst_9 {dimension_numbers = #tpu.dot_dimension_numbers<[1], [0], [0], [1], [0, 0, 1, 1], [], []>} : vector<32x32xbf16>, vector<32x512xbf16>, vector<32x512xf32> -> vector<32x512xf32>
    %11 = arith.maximumf %7, %10 : vector<32x512xf32>
    %c3 = arith.constant 3 : index
    %c0_10 = arith.constant 0 : index
    %c0_11 = arith.constant 0 : index
    %12 = vector.load %arg1[%c3, %c0_10, %c0_11] : memref<4x32x512xbf16, #tpu.memory_space<vmem>>, vector<1x32x512xbf16>
    %13 = vector.shape_cast %12 : vector<1x32x512xbf16> to vector<32x512xbf16>
    %cst_12 = arith.constant dense<0.000000e+00> : vector<32x512xf32>
    %14 = tpu.matmul %0, %13, %cst_12 {dimension_numbers = #tpu.dot_dimension_numbers<[1], [0], [0], [1], [0, 0, 1, 1], [], []>} : vector<32x32xbf16>, vector<32x512xbf16>, vector<32x512xf32> -> vector<32x512xf32>
    %15 = arith.maximumf %11, %14 : vector<32x512xf32>
    %c0_13 = arith.constant 0 : index
    %c0_14 = arith.constant 0 : index
    %16 = vector.load %arg3[%c0_13, %c0_14] : memref<32x1xf32, #tpu.memory_space<vmem>>, vector<32x1xf32>
    %17 = vector.broadcast %16 : vector<32x1xf32> to vector<32x512xf32>
    %18 = arith.addf %15, %17 : vector<32x512xf32>
    %cst_15 = arith.constant 0.000000e+00 : f32
    %19 = vector.broadcast %cst_15 : f32 to vector<32x512xf32>
    %20 = arith.subf %19, %18 : vector<32x512xf32>
    %21 = math.exp %20 : vector<32x512xf32>
    %cst_16 = arith.constant 1.000000e+00 : f32
    %22 = vector.broadcast %cst_16 : f32 to vector<32x512xf32>
    %23 = arith.addf %22, %21 : vector<32x512xf32>
    %24 = tpu.reciprocal %23 {approx = true} : vector<32x512xf32> -> vector<32x512xf32>
    %25 = arith.truncf %24 : vector<32x512xf32> to vector<32x512xbf16>
    %c0_17 = arith.constant 0 : index
    %c0_18 = arith.constant 0 : index
    %26 = vector.load %arg4[%c0_17, %c0_18] : memref<32x512xbf16, #tpu.memory_space<vmem>>, vector<32x512xbf16>
    tpu.vector_store %arg4[%c0_17, %c0_18], %25 {strides = array<i32>} : memref<32x512xbf16, #tpu.memory_space<vmem>>, vector<32x512xbf16>,
    return
  }
  func.func @transform_0(%arg0: i32) -> (i32, i32, i32) {
    %c0_i32 = arith.constant 0 : i32
    %c0_i32_0 = arith.constant 0 : i32
    %c0_i32_1 = arith.constant 0 : i32
    return %c0_i32, %c0_i32_0, %arg0 : i32, i32, i32
  }
  func.func @transform_1(%arg0: i32) -> (i32, i32) {
    %c0_i32 = arith.constant 0 : i32
    %c0_i32_0 = arith.constant 0 : i32
    %c0_i32_1 = arith.constant 0 : i32
    return %c0_i32, %c0_i32_0 : i32, i32
  }
  func.func @transform_2(%arg0: i32) -> (i32, i32) {
    %c0_i32 = arith.constant 0 : i32
    %c0_i32_0 = arith.constant 0 : i32
    %c0_i32_1 = arith.constant 0 : i32
    return %c0_i32, %c0_i32_0 : i32, i32
  }
  func.func @transform_3(%arg0: i32) -> (i32, i32) {
    %c0_i32 = arith.constant 0 : i32
    %c0_i32_0 = arith.constant 0 : i32
    return %c0_i32, %arg0 : i32, i32
  }
}

module attributes {stable_mosaic.version = 11 : i64} {
  func.func @_conv_pool_kernel(%arg0: i32, %arg1: memref<4x800x128xbf16, #tpu.memory_space<vmem>>, %arg2: memref<32x800xbf16, #tpu.memory_space<vmem>>, %arg3: memref<32x1xf32, #tpu.memory_space<vmem>>, %arg4: memref<32x128xf32, #tpu.memory_space<vmem>>) attributes {dimension_semantics = [#tpu.dimension_semantics<parallel>], iteration_bounds = array<i64: 1>, scalar_prefetch = 0 : i64, scratch_operands = 0 : i64, tpu.core_type = #tpu.core_type<tc>, window_params = [{transform_indices = @transform_0, window_bounds = array<i64: 4, 800, 128>}, {pipeline_mode = #tpu.pipeline_mode<synchronous>, transform_indices = @transform_1, window_bounds = array<i64: 32, 800>}, {pipeline_mode = #tpu.pipeline_mode<synchronous>, transform_indices = @transform_2, window_bounds = array<i64: 32, 1>}, {transform_indices = @transform_3, window_bounds = array<i64: 32, 128>}]} {
    %c0 = arith.constant 0 : index
    %c0_0 = arith.constant 0 : index
    %0 = vector.load %arg2[%c0, %c0_0] : memref<32x800xbf16, #tpu.memory_space<vmem>>, vector<32x800xbf16>
    %c0_1 = arith.constant 0 : index
    %c0_2 = arith.constant 0 : index
    %c0_3 = arith.constant 0 : index
    %1 = vector.load %arg1[%c0_1, %c0_2, %c0_3] : memref<4x800x128xbf16, #tpu.memory_space<vmem>>, vector<1x800x128xbf16>
    %2 = vector.shape_cast %1 : vector<1x800x128xbf16> to vector<800x128xbf16>
    %cst = arith.constant dense<0.000000e+00> : vector<32x128xf32>
    %3 = tpu.matmul %0, %2, %cst {dimension_numbers = #tpu.dot_dimension_numbers<[1], [0], [0], [1], [0, 0, 1, 1], [], []>} : vector<32x800xbf16>, vector<800x128xbf16>, vector<32x128xf32> -> vector<32x128xf32>
    %c1 = arith.constant 1 : index
    %c0_4 = arith.constant 0 : index
    %c0_5 = arith.constant 0 : index
    %4 = vector.load %arg1[%c1, %c0_4, %c0_5] : memref<4x800x128xbf16, #tpu.memory_space<vmem>>, vector<1x800x128xbf16>
    %5 = vector.shape_cast %4 : vector<1x800x128xbf16> to vector<800x128xbf16>
    %cst_6 = arith.constant dense<0.000000e+00> : vector<32x128xf32>
    %6 = tpu.matmul %0, %5, %cst_6 {dimension_numbers = #tpu.dot_dimension_numbers<[1], [0], [0], [1], [0, 0, 1, 1], [], []>} : vector<32x800xbf16>, vector<800x128xbf16>, vector<32x128xf32> -> vector<32x128xf32>
    %7 = arith.maximumf %3, %6 : vector<32x128xf32>
    %c2 = arith.constant 2 : index
    %c0_7 = arith.constant 0 : index
    %c0_8 = arith.constant 0 : index
    %8 = vector.load %arg1[%c2, %c0_7, %c0_8] : memref<4x800x128xbf16, #tpu.memory_space<vmem>>, vector<1x800x128xbf16>
    %9 = vector.shape_cast %8 : vector<1x800x128xbf16> to vector<800x128xbf16>
    %cst_9 = arith.constant dense<0.000000e+00> : vector<32x128xf32>
    %10 = tpu.matmul %0, %9, %cst_9 {dimension_numbers = #tpu.dot_dimension_numbers<[1], [0], [0], [1], [0, 0, 1, 1], [], []>} : vector<32x800xbf16>, vector<800x128xbf16>, vector<32x128xf32> -> vector<32x128xf32>
    %11 = arith.maximumf %7, %10 : vector<32x128xf32>
    %c3 = arith.constant 3 : index
    %c0_10 = arith.constant 0 : index
    %c0_11 = arith.constant 0 : index
    %12 = vector.load %arg1[%c3, %c0_10, %c0_11] : memref<4x800x128xbf16, #tpu.memory_space<vmem>>, vector<1x800x128xbf16>
    %13 = vector.shape_cast %12 : vector<1x800x128xbf16> to vector<800x128xbf16>
    %cst_12 = arith.constant dense<0.000000e+00> : vector<32x128xf32>
    %14 = tpu.matmul %0, %13, %cst_12 {dimension_numbers = #tpu.dot_dimension_numbers<[1], [0], [0], [1], [0, 0, 1, 1], [], []>} : vector<32x800xbf16>, vector<800x128xbf16>, vector<32x128xf32> -> vector<32x128xf32>
    %15 = arith.maximumf %11, %14 : vector<32x128xf32>
    %c0_13 = arith.constant 0 : index
    %c0_14 = arith.constant 0 : index
    %16 = vector.load %arg3[%c0_13, %c0_14] : memref<32x1xf32, #tpu.memory_space<vmem>>, vector<32x1xf32>
    %17 = vector.broadcast %16 : vector<32x1xf32> to vector<32x128xf32>
    %18 = arith.addf %15, %17 : vector<32x128xf32>
    %c0_15 = arith.constant 0 : index
    %c0_16 = arith.constant 0 : index
    %19 = vector.load %arg4[%c0_15, %c0_16] : memref<32x128xf32, #tpu.memory_space<vmem>>, vector<32x128xf32>
    tpu.vector_store %arg4[%c0_15, %c0_16], %18 {strides = array<i32>} : memref<32x128xf32, #tpu.memory_space<vmem>>, vector<32x128xf32>,
    return
  }
  func.func @transform_0(%arg0: i32) -> (i32, i32, i32) {
    %c0_i32 = arith.constant 0 : i32
    %c0_i32_0 = arith.constant 0 : i32
    %c0_i32_1 = arith.constant 0 : i32
    return %c0_i32, %c0_i32_0, %arg0 : i32, i32, i32
  }
  func.func @transform_1(%arg0: i32) -> (i32, i32) {
    %c0_i32 = arith.constant 0 : i32
    %c0_i32_0 = arith.constant 0 : i32
    %c0_i32_1 = arith.constant 0 : i32
    return %c0_i32, %c0_i32_0 : i32, i32
  }
  func.func @transform_2(%arg0: i32) -> (i32, i32) {
    %c0_i32 = arith.constant 0 : i32
    %c0_i32_0 = arith.constant 0 : i32
    %c0_i32_1 = arith.constant 0 : i32
    return %c0_i32, %c0_i32_0 : i32, i32
  }
  func.func @transform_3(%arg0: i32) -> (i32, i32) {
    %c0_i32 = arith.constant 0 : i32
    %c0_i32_0 = arith.constant 0 : i32
    return %c0_i32, %arg0 : i32, i32
  }
}

module attributes {stable_mosaic.version = 11 : i64} {
  func.func @_bn_sigmoid_kernel(%arg0: i32, %arg1: memref<32x98xf32, #tpu.memory_space<vmem>>, %arg2: memref<32x1xf32, #tpu.memory_space<vmem>>, %arg3: memref<32x1xf32, #tpu.memory_space<vmem>>, %arg4: memref<32x98xf32, #tpu.memory_space<vmem>>) attributes {dimension_semantics = [#tpu.dimension_semantics<arbitrary>], iteration_bounds = array<i64: 1>, scalar_prefetch = 0 : i64, scratch_operands = 0 : i64, tpu.core_type = #tpu.core_type<tc>, window_params = [{pipeline_mode = #tpu.pipeline_mode<synchronous>, transform_indices = @transform_0, window_bounds = array<i64: 32, 98>}, {pipeline_mode = #tpu.pipeline_mode<synchronous>, transform_indices = @transform_1, window_bounds = array<i64: 32, 1>}, {pipeline_mode = #tpu.pipeline_mode<synchronous>, transform_indices = @transform_2, window_bounds = array<i64: 32, 1>}, {pipeline_mode = #tpu.pipeline_mode<synchronous>, transform_indices = @transform_3, window_bounds = array<i64: 32, 98>}]} {
    %c0 = arith.constant 0 : index
    %c0_0 = arith.constant 0 : index
    %0 = vector.load %arg1[%c0, %c0_0] : memref<32x98xf32, #tpu.memory_space<vmem>>, vector<32x98xf32>
    %cst = arith.constant dense<0.000000e+00> : vector<32xf32>
    %1 = vector.multi_reduction <add>, %0, %cst [1] : vector<32x98xf32> to vector<32xf32>
    %2 = vector.shape_cast %1 : vector<32xf32> to vector<32x1xf32>
    %cst_1 = arith.constant 9.800000e+01 : f32
    %3 = vector.broadcast %cst_1 : f32 to vector<32x1xf32>
    %4 = arith.divf %2, %3 : vector<32x1xf32>
    %5 = vector.broadcast %4 : vector<32x1xf32> to vector<32x98xf32>
    %6 = arith.subf %0, %5 : vector<32x98xf32>
    %7 = arith.mulf %6, %6 : vector<32x98xf32>
    %cst_2 = arith.constant dense<0.000000e+00> : vector<32xf32>
    %8 = vector.multi_reduction <add>, %7, %cst_2 [1] : vector<32x98xf32> to vector<32xf32>
    %9 = vector.shape_cast %8 : vector<32xf32> to vector<32x1xf32>
    %cst_3 = arith.constant 9.800000e+01 : f32
    %10 = vector.broadcast %cst_3 : f32 to vector<32x1xf32>
    %11 = arith.divf %9, %10 : vector<32x1xf32>
    %cst_4 = arith.constant 9.99999974E-6 : f32
    %12 = vector.broadcast %cst_4 : f32 to vector<32x1xf32>
    %13 = arith.addf %11, %12 : vector<32x1xf32>
    %14 = math.rsqrt %13 : vector<32x1xf32>
    %15 = vector.broadcast %14 : vector<32x1xf32> to vector<32x98xf32>
    %16 = arith.mulf %6, %15 : vector<32x98xf32>
    %c0_5 = arith.constant 0 : index
    %c0_6 = arith.constant 0 : index
    %17 = vector.load %arg2[%c0_5, %c0_6] : memref<32x1xf32, #tpu.memory_space<vmem>>, vector<32x1xf32>
    %18 = vector.broadcast %17 : vector<32x1xf32> to vector<32x98xf32>
    %19 = arith.mulf %16, %18 : vector<32x98xf32>
    %c0_7 = arith.constant 0 : index
    %c0_8 = arith.constant 0 : index
    %20 = vector.load %arg3[%c0_7, %c0_8] : memref<32x1xf32, #tpu.memory_space<vmem>>, vector<32x1xf32>
    %21 = vector.broadcast %20 : vector<32x1xf32> to vector<32x98xf32>
    %22 = arith.addf %19, %21 : vector<32x98xf32>
    %cst_9 = arith.constant 0.000000e+00 : f32
    %23 = vector.broadcast %cst_9 : f32 to vector<32x98xf32>
    %24 = arith.subf %23, %22 : vector<32x98xf32>
    %25 = math.exp %24 : vector<32x98xf32>
    %cst_10 = arith.constant 1.000000e+00 : f32
    %26 = vector.broadcast %cst_10 : f32 to vector<32x98xf32>
    %27 = arith.addf %26, %25 : vector<32x98xf32>
    %28 = tpu.reciprocal %27 {approx = true} : vector<32x98xf32> -> vector<32x98xf32>
    %c0_11 = arith.constant 0 : index
    %c0_12 = arith.constant 0 : index
    %29 = vector.load %arg4[%c0_11, %c0_12] : memref<32x98xf32, #tpu.memory_space<vmem>>, vector<32x98xf32>
    tpu.vector_store %arg4[%c0_11, %c0_12], %28 {strides = array<i32>} : memref<32x98xf32, #tpu.memory_space<vmem>>, vector<32x98xf32>,
    return
  }
  func.func @transform_0(%arg0: i32) -> (i32, i32) {
    %c0_i32 = arith.constant 0 : i32
    %c0_i32_0 = arith.constant 0 : i32
    %c0_i32_1 = arith.constant 0 : i32
    return %c0_i32, %c0_i32_0 : i32, i32
  }
  func.func @transform_1(%arg0: i32) -> (i32, i32) {
    %c0_i32 = arith.constant 0 : i32
    %c0_i32_0 = arith.constant 0 : i32
    %c0_i32_1 = arith.constant 0 : i32
    return %c0_i32, %c0_i32_0 : i32, i32
  }
  func.func @transform_2(%arg0: i32) -> (i32, i32) {
    %c0_i32 = arith.constant 0 : i32
    %c0_i32_0 = arith.constant 0 : i32
    %c0_i32_1 = arith.constant 0 : i32
    return %c0_i32, %c0_i32_0 : i32, i32
  }
  func.func @transform_3(%arg0: i32) -> (i32, i32) {
    %c0_i32 = arith.constant 0 : i32
    %c0_i32_0 = arith.constant 0 : i32
    %c0_i32_1 = arith.constant 0 : i32
    return %c0_i32, %c0_i32_0 : i32, i32
  }
}

module attributes {stable_mosaic.version = 11 : i64} {
  func.func @_fc_head_kernel(%arg0: i32, %arg1: memref<1568x2xbf16, #tpu.memory_space<vmem>>, %arg2: memref<64x1568xbf16, #tpu.memory_space<vmem>>, %arg3: memref<64x1xf32, #tpu.memory_space<vmem>>, %arg4: memref<10x64xf32, #tpu.memory_space<vmem>>, %arg5: memref<10x1xf32, #tpu.memory_space<vmem>>, %arg6: memref<10x2xf32, #tpu.memory_space<vmem>>) attributes {dimension_semantics = [#tpu.dimension_semantics<arbitrary>], iteration_bounds = array<i64: 1>, scalar_prefetch = 0 : i64, scratch_operands = 0 : i64, tpu.core_type = #tpu.core_type<tc>, window_params = [{pipeline_mode = #tpu.pipeline_mode<synchronous>, transform_indices = @transform_0, window_bounds = array<i64: 1568, 2>}, {pipeline_mode = #tpu.pipeline_mode<synchronous>, transform_indices = @transform_1, window_bounds = array<i64: 64, 1568>}, {pipeline_mode = #tpu.pipeline_mode<synchronous>, transform_indices = @transform_2, window_bounds = array<i64: 64, 1>}, {pipeline_mode = #tpu.pipeline_mode<synchronous>, transform_indices = @transform_3, window_bounds = array<i64: 10, 64>}, {pipeline_mode = #tpu.pipeline_mode<synchronous>, transform_indices = @transform_4, window_bounds = array<i64: 10, 1>}, {pipeline_mode = #tpu.pipeline_mode<synchronous>, transform_indices = @transform_5, window_bounds = array<i64: 10, 2>}]} {
    %c0 = arith.constant 0 : index
    %c0_0 = arith.constant 0 : index
    %0 = vector.load %arg2[%c0, %c0_0] : memref<64x1568xbf16, #tpu.memory_space<vmem>>, vector<64x1568xbf16>
    %c0_1 = arith.constant 0 : index
    %c0_2 = arith.constant 0 : index
    %1 = vector.load %arg1[%c0_1, %c0_2] : memref<1568x2xbf16, #tpu.memory_space<vmem>>, vector<1568x2xbf16>
    %cst = arith.constant dense<0.000000e+00> : vector<64x2xf32>
    %2 = tpu.matmul %0, %1, %cst {dimension_numbers = #tpu.dot_dimension_numbers<[1], [0], [0], [1], [0, 0, 1, 1], [], []>} : vector<64x1568xbf16>, vector<1568x2xbf16>, vector<64x2xf32> -> vector<64x2xf32>
    %c0_3 = arith.constant 0 : index
    %c0_4 = arith.constant 0 : index
    %3 = vector.load %arg3[%c0_3, %c0_4] : memref<64x1xf32, #tpu.memory_space<vmem>>, vector<64x1xf32>
    %4 = vector.broadcast %3 : vector<64x1xf32> to vector<64x2xf32>
    %5 = arith.addf %2, %4 : vector<64x2xf32>
    %cst_5 = arith.constant 0.000000e+00 : f32
    %6 = vector.broadcast %cst_5 : f32 to vector<64x2xf32>
    %7 = arith.subf %6, %5 : vector<64x2xf32>
    %8 = math.exp %7 : vector<64x2xf32>
    %cst_6 = arith.constant 1.000000e+00 : f32
    %9 = vector.broadcast %cst_6 : f32 to vector<64x2xf32>
    %10 = arith.addf %9, %8 : vector<64x2xf32>
    %11 = tpu.reciprocal %10 {approx = true} : vector<64x2xf32> -> vector<64x2xf32>
    %c0_7 = arith.constant 0 : index
    %c0_8 = arith.constant 0 : index
    %12 = vector.load %arg4[%c0_7, %c0_8] : memref<10x64xf32, #tpu.memory_space<vmem>>, vector<10x64xf32>
    %cst_9 = arith.constant dense<0.000000e+00> : vector<10x2xf32>
    %13 = tpu.matmul %12, %11, %cst_9 {dimension_numbers = #tpu.dot_dimension_numbers<[1], [0], [0], [1], [0, 0, 1, 1], [], []>} : vector<10x64xf32>, vector<64x2xf32>, vector<10x2xf32> -> vector<10x2xf32>
    %c0_10 = arith.constant 0 : index
    %c0_11 = arith.constant 0 : index
    %14 = vector.load %arg5[%c0_10, %c0_11] : memref<10x1xf32, #tpu.memory_space<vmem>>, vector<10x1xf32>
    %15 = vector.broadcast %14 : vector<10x1xf32> to vector<10x2xf32>
    %16 = arith.addf %13, %15 : vector<10x2xf32>
    %c0_12 = arith.constant 0 : index
    %c0_13 = arith.constant 0 : index
    %17 = vector.load %arg6[%c0_12, %c0_13] : memref<10x2xf32, #tpu.memory_space<vmem>>, vector<10x2xf32>
    tpu.vector_store %arg6[%c0_12, %c0_13], %16 {strides = array<i32>} : memref<10x2xf32, #tpu.memory_space<vmem>>, vector<10x2xf32>,
    return
  }
  func.func @transform_0(%arg0: i32) -> (i32, i32) {
    %c0_i32 = arith.constant 0 : i32
    %c0_i32_0 = arith.constant 0 : i32
    %c0_i32_1 = arith.constant 0 : i32
    return %c0_i32, %c0_i32_0 : i32, i32
  }
  func.func @transform_1(%arg0: i32) -> (i32, i32) {
    %c0_i32 = arith.constant 0 : i32
    %c0_i32_0 = arith.constant 0 : i32
    %c0_i32_1 = arith.constant 0 : i32
    return %c0_i32, %c0_i32_0 : i32, i32
  }
  func.func @transform_2(%arg0: i32) -> (i32, i32) {
    %c0_i32 = arith.constant 0 : i32
    %c0_i32_0 = arith.constant 0 : i32
    %c0_i32_1 = arith.constant 0 : i32
    return %c0_i32, %c0_i32_0 : i32, i32
  }
  func.func @transform_3(%arg0: i32) -> (i32, i32) {
    %c0_i32 = arith.constant 0 : i32
    %c0_i32_0 = arith.constant 0 : i32
    %c0_i32_1 = arith.constant 0 : i32
    return %c0_i32, %c0_i32_0 : i32, i32
  }
  func.func @transform_4(%arg0: i32) -> (i32, i32) {
    %c0_i32 = arith.constant 0 : i32
    %c0_i32_0 = arith.constant 0 : i32
    %c0_i32_1 = arith.constant 0 : i32
    return %c0_i32, %c0_i32_0 : i32, i32
  }
  func.func @transform_5(%arg0: i32) -> (i32, i32) {
    %c0_i32 = arith.constant 0 : i32
    %c0_i32_0 = arith.constant 0 : i32
    %c0_i32_1 = arith.constant 0 : i32
    return %c0_i32, %c0_i32_0 : i32, i32
  }
}

</mosaic_0001>

<bundles_post_ra>
// kernel: convolutional_forward.4
= control target key start
LH: loop header
LB: loop body
LE: loop exit
PB: predicated region body
PF: predicated region fallthrough
CT: control target
= control target key end

     0   :  { %v1090_v1 = vmov 0   ;;  %vm77_vm0 = vcmask 261120   ;;  %s1339_s0 = inlined_call_operand.vmem [shape: bf16[4,32,512], index: 0, kind: input, shape index: {}]   ;;  %s1340_s1 = inlined_call_operand.vmem [shape: bf16[32,32], index: 1, kind: input, shape index: {}]   ;;  %s1341_s2 = inlined_call_operand.vmem [shape: f32[32,1], index: 2, kind: input, shape index: {}]   ;;  %s1342_s3 = inlined_call_operand.vmem [shape: bf16[32,512], index: 3, kind: output, shape index: {}]  }
   0x1   :  { %v976_v0 = vld [vmem:[%s1339_s0 + $0x4] ss:$16 sps:$4 sm:$0xff]   ;;  %116 = vmatprep.mubr.bf16.mxu0 %v1090_v1  ;;  %169 = vmatprep.mubr.bf16.mxu1 %v1090_v1  ;;  %v978_v2 = vld [vmem:[%s1339_s0 + $0xc] ss:$16 sps:$4 sm:$0xff]   ;;  %v980_v3 = vld [vmem:[%s1339_s0] ss:$16 sps:$4 sm:$0xff]  }
   0x2   :  { %974 = vset.pattern.permute.xlu0 %v1090_v1  ;;  %975 = vset.pattern.permute.xlu1 %v1090_v1  ;;  %v981_v4 = vld [vmem:[%s1339_s0 + $0x8] ss:$16 sps:$4 sm:$0xff]   ;;  %v982_v5 = vld [vmem:[%s1339_s0 + $0x24] ss:$16 sps:$4 sm:$0xff]   ;;  %v984_v6 = vld [vmem:[%s1339_s0 + $0x2c] ss:$16 sps:$4 sm:$0xff]  }
   0x3   :  { %84 = vmatprep.subr.bf16.mxu0 %v976_v0  ;;  %137 = vmatprep.subr.bf16.mxu1 %v978_v2  ;;  %v986_v7 = vld [vmem:[%s1339_s0 + $0x20] ss:$16 sps:$4 sm:$0xff]   ;;  %v987_v8 = vld [vmem:[%s1339_s0 + $0x28] ss:$16 sps:$4 sm:$0xff]   ;;  %v991_v11 = vld [vmem:[%s1339_s0 + $0x44] ss:$16 sps:$4 sm:$0xff]  }
   0x4   :  { %85 = vmatpush1.bf16.msra.mxu0 %v980_v3  ;;  %138 = vmatpush1.bf16.msra.mxu1 %v981_v4  ;;  %v1142_v9 = vld [vmem:[%s1340_s1] sm:$0xff]   ;;  %v992_v12 = vld [vmem:[%s1339_s0 + $0x48] ss:$16 sps:$4 sm:$0xff]   ;;  %v994_v13 = vld [vmem:[%s1339_s0 + $0x4c] ss:$16 sps:$4 sm:$0xff]  }
   0x5   :  { %86 = vmatprep.subr.bf16.mxu0 %v982_v5  ;;  %139 = vmatprep.subr.bf16.mxu1 %v984_v6  ;;  %v989_v10 = vld [vmem:[%s1339_s0 + $0x40] ss:$16 sps:$4 sm:$0xff]   ;;  %v998_v15 = vld [vmem:[%s1339_s0 + $0x64] ss:$16 sps:$4 sm:$0xff]   ;;  %v999_v16 = vld [vmem:[%s1339_s0 + $0x68] ss:$16 sps:$4 sm:$0xff]  }
   0x6   :  { %v996_v14 = vld [vmem:[%s1339_s0 + $0x60] ss:$16 sps:$4 sm:$0xff]   ;;  %v1001_v17 = vld [vmem:[%s1339_s0 + $0x6c] ss:$16 sps:$4 sm:$0xff]   ;;  %v1004_v18 = vld [vmem:[%s1339_s0 + $0x84] ss:$16 sps:$4 sm:$0xff]  }
   0x7   :  { %v1180_v19 = vld [vmem:[%s1340_s1 + $0x8] sm:$0xff]   ;;  %v703_v21 = vld [vmem:[%s1341_s2] sm:$0xff]  ;;  %v705_v24 = vld [vmem:[%s1341_s2 + $0x10] sm:$0xff] }
   0x8   :  { %87 = vmatpush1.bf16.msra.mxu0 %v986_v7  ;;  %140 = vmatpush1.bf16.msra.mxu1 %v987_v8  ;;  %v1007_v20 = vld [vmem:[%s1339_s0 + $0x8c] ss:$16 sps:$4 sm:$0xff]   ;;  %v1002_v22 = vld [vmem:[%s1339_s0 + $0x80] ss:$16 sps:$4 sm:$0xff]   ;;  %v1005_v23 = vld [vmem:[%s1339_s0 + $0x88] ss:$16 sps:$4 sm:$0xff]  }
   0x9   :  { %239 = vmatprep.subr.bf16.mxu0 %v991_v11  ;;  %292 = vmatprep.subr.bf16.mxu1 %v994_v13  ;;  %v1010_v25 = vld [vmem:[%s1339_s0 + $0xa4] ss:$16 sps:$4 sm:$0xff]   ;;  %v1013_v26 = vld [vmem:[%s1339_s0 + $0xac] ss:$16 sps:$4 sm:$0xff]   ;;  %v1008_v27 = vld [vmem:[%s1339_s0 + $0xa0] ss:$16 sps:$4 sm:$0xff]  }
   0xa   :  { %709 = vperm.xlu0 %974, %v703_v21   ;;  %719 = vperm.xlu1 %975, %v705_v24   ;;  %v1011_v28 = vld [vmem:[%s1339_s0 + $0xa8] ss:$16 sps:$4 sm:$0xff]   ;;  %v1016_v31 = vld [vmem:[%s1339_s0 + $0xc4] ss:$16 sps:$4 sm:$0xff]   ;;  %v1019_v32 = vld [vmem:[%s1339_s0 + $0xcc] ss:$16 sps:$4 sm:$0xff]  }
   0xb   :  { %893 = vmatmul.mubr.msk.bf16.vlgmr.msra.gmra.mrb[0].mxu0 %vm77_vm0, %v1142_v9  ;;  %895 = vmatmul.mubr.msk.bf16.vlgmr.msra.gmra.mrb[0].mxu1 %vm77_vm0, %v1142_v9  ;;  %v704_v29 = vld [vmem:[%s1341_s2 + $0x8] sm:$0xff]  ;;  %v706_v30 = vld [vmem:[%s1341_s2 + $0x18] sm:$0xff]  ;;  %v1014_v33 = vld [vmem:[%s1339_s0 + $0xc0] ss:$16 sps:$4 sm:$0xff]  }
   0xc   :  { %240 = vmatpush1.bf16.msra.mxu0 %v989_v10  ;;  %293 = vmatpush1.bf16.msra.mxu1 %v992_v12  ;;  %v1017_v34 = vld [vmem:[%s1339_s0 + $0xc8] ss:$16 sps:$4 sm:$0xff]   ;;  %v1022_v35 = vld [vmem:[%s1339_s0 + $0xe4] ss:$16 sps:$4 sm:$0xff]   ;;  %v1025_v36 = vld [vmem:[%s1339_s0 + $0xec] ss:$16 sps:$4 sm:$0xff]  }
   0xd   :  { %126 = vmatprep.mubr.bf16.mxu0 %v1090_v1  ;;  %179 = vmatprep.mubr.bf16.mxu1 %v1090_v1  ;;  %v1020_v37 = vld [vmem:[%s1339_s0 + $0xe0] ss:$16 sps:$4 sm:$0xff]   ;;  %v1023_v38 = vld [vmem:[%s1339_s0 + $0xe8] ss:$16 sps:$4 sm:$0xff]  }
   0xe   :  { %241 = vmatprep.subr.bf16.mxu0 %v998_v15  ;;  %294 = vmatprep.subr.bf16.mxu1 %v1001_v17 }
   0xf   :  { %714 = vperm.xlu0 %974, %v704_v29   ;;  %724 = vperm.xlu1 %975, %v706_v30  }
  0x10   :  { %242 = vmatpush1.bf16.msra.mxu0 %v996_v14  ;;  %295 = vmatpush1.bf16.msra.mxu1 %v999_v16 }
  0x11   :  { %410 = vmatprep.subr.bf16.mxu0 %v1004_v18  ;;  %463 = vmatprep.subr.bf16.mxu1 %v1007_v20 }
  0x13   :  { %894 = vmatmul.mubr.msk.bf16.gmra.mrb[4].mxu0 %vm77_vm0, %v1180_v19  ;;  %896 = vmatmul.mubr.msk.bf16.gmra.mrb[4].mxu1 %vm77_vm0, %v1180_v19 }
  0x14   :  { %271 = vmatprep.mubr.bf16.mxu0 %v1090_v1  ;;  %324 = vmatprep.mubr.bf16.mxu1 %v1090_v1 }
  0x1b   :  { %913 = vmatmul.mubr.msk.bf16.vlgmr.msra.gmra.mrb[8].mxu0 %vm77_vm0, %v1142_v9  ;;  %915 = vmatmul.mubr.msk.bf16.vlgmr.msra.gmra.mrb[8].mxu1 %vm77_vm0, %v1142_v9 }
  0x1c   :  { %411 = vmatpush1.bf16.msra.mxu0 %v1002_v22  ;;  %464 = vmatpush1.bf16.msra.mxu1 %v1005_v23 }
  0x1d   :  { %281 = vmatprep.mubr.bf16.mxu0 %v1090_v1  ;;  %334 = vmatprep.mubr.bf16.mxu1 %v1090_v1 }
  0x1e   :  { %412 = vmatprep.subr.bf16.mxu0 %v1010_v25  ;;  %465 = vmatprep.subr.bf16.mxu1 %v1013_v26 }
  0x20   :  { %413 = vmatpush1.bf16.msra.mxu0 %v1008_v27  ;;  %466 = vmatpush1.bf16.msra.mxu1 %v1011_v28 }
  0x21   :  { %581 = vmatprep.subr.bf16.mxu0 %v1016_v31  ;;  %634 = vmatprep.subr.bf16.mxu1 %v1019_v32 }
  0x23   :  { %914 = vmatmul.mubr.msk.bf16.gmra.mrb[12].mxu0 %vm77_vm0, %v1180_v19  ;;  %916 = vmatmul.mubr.msk.bf16.gmra.mrb[12].mxu1 %vm77_vm0, %v1180_v19 }
  0x24   :  { %442 = vmatprep.mubr.bf16.mxu0 %v1090_v1  ;;  %495 = vmatprep.mubr.bf16.mxu1 %v1090_v1 }
  0x2b   :  { %933 = vmatmul.mubr.msk.bf16.vlgmr.msra.gmra.mrb[16].mxu0 %vm77_vm0, %v1142_v9  ;;  %935 = vmatmul.mubr.msk.bf16.vlgmr.msra.gmra.mrb[16].mxu1 %vm77_vm0, %v1142_v9 }
  0x2c   :  { %582 = vmatpush1.bf16.msra.mxu0 %v1014_v33  ;;  %635 = vmatpush1.bf16.msra.mxu1 %v1017_v34 }
  0x2d   :  { %452 = vmatprep.mubr.bf16.mxu0 %v1090_v1  ;;  %505 = vmatprep.mubr.bf16.mxu1 %v1090_v1 }
  0x2e   :  { %583 = vmatprep.subr.bf16.mxu0 %v1022_v35  ;;  %636 = vmatprep.subr.bf16.mxu1 %v1025_v36 }
  0x30   :  { %584 = vmatpush1.bf16.msra.mxu0 %v1020_v37  ;;  %637 = vmatpush1.bf16.msra.mxu1 %v1023_v38 }
  0x33   :  { %934 = vmatmul.mubr.msk.bf16.gmra.mrb[20].mxu0 %vm77_vm0, %v1180_v19  ;;  %936 = vmatmul.mubr.msk.bf16.gmra.mrb[20].mxu1 %vm77_vm0, %v1180_v19 }
  0x34   :  { %613 = vmatprep.mubr.bf16.mxu0 %v1090_v1  ;;  %666 = vmatprep.mubr.bf16.mxu1 %v1090_v1 }
  0x3b   :  { %953 = vmatmul.mubr.msk.bf16.vlgmr.msra.gmra.mrb[24].mxu0 %vm77_vm0, %v1142_v9  ;;  %955 = vmatmul.mubr.msk.bf16.vlgmr.msra.gmra.mrb[24].mxu1 %vm77_vm0, %v1142_v9 }
  0x3c   :  { %623 = vmatprep.mubr.bf16.mxu0 %v1090_v1  ;;  %676 = vmatprep.mubr.bf16.mxu1 %v1090_v1 }
  0x43   :  { %954 = vmatmul.mubr.msk.bf16.gmra.mrb[28].mxu0 %vm77_vm0, %v1180_v19  ;;  %956 = vmatmul.mubr.msk.bf16.gmra.mrb[28].mxu1 %vm77_vm0, %v1180_v19 }
  0xde   :  { %v118_v39 = vpop.f32.mrb[0].mxu0  ;;  %v171_v40 = vpop.f32.mrb[0].mxu1 }
  0xdf   :  { %v120_v41 = vpop.f32.mrb[1].mxu0  ;;  %v173_v42 = vpop.f32.mrb[1].mxu1 }
  0xe0   :  { %v122_v43 = vpop.f32.mrb[2].mxu0  ;;  %v175_v44 = vpop.f32.mrb[2].mxu1 }
  0xe1   :  { %v124_v45 = vpop.f32.mrb[3].mxu0  ;;  %v177_v46 = vpop.f32.mrb[3].mxu1 }
  0xe6   :  { %v128_v47 = vpop.f32.mrb[4].mxu0  ;;  %v181_v48 = vpop.f32.mrb[4].mxu1 }
  0xe7   :  { %v130_v49 = vpop.f32.mrb[5].mxu0  ;;  %v183_v50 = vpop.f32.mrb[5].mxu1 }
  0xe8   :  { %v1279_v51 = vpop.f32.mrb[6].mxu0  ;;  %v1281_v52 = vpop.f32.mrb[6].mxu1 }
  0xe9   :  { %v1283_v53 = vpop.f32.mrb[7].mxu0  ;;  %v1285_v54 = vpop.f32.mrb[7].mxu1 }
  0xee   :  { %v273_v55 = vpop.f32.mrb[8].mxu0  ;;  %v326_v56 = vpop.f32.mrb[8].mxu1 }
  0xef   :  { %v345_v57 = vmax.f32 %v118_v39, %v273_v55  ;;  %v347_v58 = vmax.f32 %v171_v40, %v326_v56  ;;  %v275_v59 = vpop.f32.mrb[9].mxu0  ;;  %v328_v60 = vpop.f32.mrb[9].mxu1 }
  0xf0   :  { %v346_v61 = vmax.f32 %v120_v41, %v275_v59  ;;  %v348_v62 = vmax.f32 %v173_v42, %v328_v60  ;;  %v277_v63 = vpop.f32.mrb[10].mxu0  ;;  %v330_v0 = vpop.f32.mrb[10].mxu1 }
  0xf1   :  { %v349_v1 = vmax.f32 %v122_v43, %v277_v63  ;;  %v351_v2 = vmax.f32 %v175_v44, %v330_v0  ;;  %v279_v3 = vpop.f32.mrb[11].mxu0  ;;  %v332_v4 = vpop.f32.mrb[11].mxu1 }
  0xf2   :  { %v350_v5 = vmax.f32 %v124_v45, %v279_v3  ;;  %v352_v6 = vmax.f32 %v177_v46, %v332_v4  ;;  %v710_v39 = vpop.permute.xlu0 %709 }
  0xf6   :  { %v283_v7 = vpop.f32.mrb[12].mxu0  ;;  %v336_v8 = vpop.f32.mrb[12].mxu1 }
  0xf7   :  { %v353_v9 = vmax.f32 %v128_v47, %v283_v7  ;;  %v355_v10 = vmax.f32 %v181_v48, %v336_v8  ;;  %v285_v11 = vpop.f32.mrb[13].mxu0  ;;  %v338_v12 = vpop.f32.mrb[13].mxu1 }
  0xf8   :  { %v354_v13 = vmax.f32 %v130_v49, %v285_v11  ;;  %v356_v14 = vmax.f32 %v183_v50, %v338_v12  ;;  %v287_v15 = vpop.f32.mrb[14].mxu0  ;;  %v340_v16 = vpop.f32.mrb[14].mxu1 }
  0xf9   :  { %v357_v17 = vmax.f32 %v1279_v51, %v287_v15  ;;  %v359_v18 = vmax.f32 %v1281_v52, %v340_v16  ;;  %v289_v19 = vpop.f32.mrb[15].mxu0  ;;  %v342_v20 = vpop.f32.mrb[15].mxu1 }
  0xfa   :  { %v358_v21 = vmax.f32 %v1283_v53, %v289_v19  ;;  %v360_v22 = vmax.f32 %v1285_v54, %v342_v20  ;;  %v715_v56 = vpop.permute.xlu0 %714 }
  0xfe   :  { %v444_v23 = vpop.f32.mrb[16].mxu0  ;;  %v497_v24 = vpop.f32.mrb[16].mxu1 }
  0xff   :  { %v516_v25 = vmax.f32 %v345_v57, %v444_v23  ;;  %v518_v26 = vmax.f32 %v347_v58, %v497_v24  ;;  %v446_v27 = vpop.f32.mrb[17].mxu0  ;;  %v499_v28 = vpop.f32.mrb[17].mxu1 }
 0x100   :  { %v517_v29 = vmax.f32 %v346_v61, %v446_v27  ;;  %v519_v30 = vmax.f32 %v348_v62, %v499_v28  ;;  %v448_v31 = vpop.f32.mrb[18].mxu0  ;;  %v501_v32 = vpop.f32.mrb[18].mxu1 }
 0x101   :  { %v520_v33 = vmax.f32 %v349_v1, %v448_v31  ;;  %v522_v34 = vmax.f32 %v351_v2, %v501_v32  ;;  %v450_v35 = vpop.f32.mrb[19].mxu0  ;;  %v503_v36 = vpop.f32.mrb[19].mxu1 }
 0x102   :  { %v521_v37 = vmax.f32 %v350_v5, %v450_v35  ;;  %v523_v38 = vmax.f32 %v352_v6, %v503_v36 }
 0x106   :  { %v454_v40 = vpop.f32.mrb[20].mxu0  ;;  %v507_v41 = vpop.f32.mrb[20].mxu1 }
 0x107   :  { %v1291_v42 = vmax.f32 %v353_v9, %v454_v40  ;;  %v1293_v43 = vmax.f32 %v355_v10, %v507_v41  ;;  %v456_v44 = vpop.f32.mrb[21].mxu0  ;;  %v509_v45 = vpop.f32.mrb[21].mxu1 }
 0x108   :  { %v1295_v46 = vmax.f32 %v354_v13, %v456_v44  ;;  %v1297_v47 = vmax.f32 %v356_v14, %v509_v45  ;;  %v458_v48 = vpop.f32.mrb[22].mxu0  ;;  %v511_v49 = vpop.f32.mrb[22].mxu1 }
 0x109   :  { %v1299_v50 = vmax.f32 %v357_v17, %v458_v48  ;;  %v1301_v51 = vmax.f32 %v359_v18, %v511_v49  ;;  %v460_v52 = vpop.f32.mrb[23].mxu0  ;;  %v513_v53 = vpop.f32.mrb[23].mxu1 }
 0x10a   :  { %v1303_v54 = vmax.f32 %v358_v21, %v460_v52  ;;  %v1305_v55 = vmax.f32 %v360_v22, %v513_v53 }
 0x10e   :  { %v615_v57 = vpop.f32.mrb[24].mxu0  ;;  %v668_v58 = vpop.f32.mrb[24].mxu1 }
 0x10f   :  { %v687_v59 = vmax.f32 %v516_v25, %v615_v57  ;;  %v689_v60 = vmax.f32 %v518_v26, %v668_v58  ;;  %v617_v61 = vpop.f32.mrb[25].mxu0  ;;  %v670_v62 = vpop.f32.mrb[25].mxu1 }
 0x110   :  { %v688_v63 = vmax.f32 %v517_v29, %v617_v61  ;;  %v690_v0 = vmax.f32 %v519_v30, %v670_v62  ;;  %v619_v1 = vpop.f32.mrb[26].mxu0  ;;  %v672_v2 = vpop.f32.mrb[26].mxu1 }
 0x111   :  { %v727_v3 = vadd.f32 %v710_v39, %v687_v59  ;;  %v729_v4 = vadd.f32 %v710_v39, %v689_v60  ;;  %v691_v5 = vmax.f32 %v520_v33, %v619_v1  ;;  %v693_v6 = vmax.f32 %v522_v34, %v672_v2  ;;  %v621_v7 = vpop.f32.mrb[27].mxu0  ;;  %v674_v8 = vpop.f32.mrb[27].mxu1 }
 0x112   :  { %v728_v9 = vadd.f32 %v710_v39, %v688_v63  ;;  %v730_v10 = vadd.f32 %v710_v39, %v690_v0  ;;  %v692_v11 = vmax.f32 %v521_v37, %v621_v7  ;;  %v694_v12 = vmax.f32 %v523_v38, %v674_v8  ;;  %v720_v29 = vpop.permute.xlu1 %719 }
 0x113   :  { %v743_v13 = vsub.f32 0.0, %v727_v3  ;;  %v745_v14 = vsub.f32 0.0, %v729_v4  ;;  %v731_v15 = vadd.f32 %v715_v56, %v691_v5  ;;  %v733_v16 = vadd.f32 %v715_v56, %v693_v6 }
 0x114   :  { %v744_v17 = vsub.f32 0.0, %v728_v9  ;;  %v746_v18 = vsub.f32 0.0, %v730_v10  ;;  %v732_v19 = vadd.f32 %v715_v56, %v692_v11  ;;  %v734_v20 = vadd.f32 %v715_v56, %v694_v12 }
 0x115   :  { %v759_v21 = vmul.f32 1.442695, %v743_v13  ;;  %v763_v22 = vmul.f32 1.442695, %v745_v14  ;;  %v747_v23 = vsub.f32 0.0, %v731_v15  ;;  %v749_v24 = vsub.f32 0.0, %v733_v16 }
 0x116   :  { %v761_v25 = vmul.f32 1.442695, %v744_v17  ;;  %v765_v26 = vmul.f32 1.442695, %v746_v18  ;;  %v748_v27 = vsub.f32 0.0, %v732_v19  ;;  %v750_v28 = vsub.f32 0.0, %v734_v20 }
 0x117   :  { %1026 = vpow2.f32 %v759_v21  ;;  %v767_v30 = vmul.f32 1.442695, %v747_v23  ;;  %v771_v31 = vmul.f32 1.442695, %v749_v24  ;;  %v625_v32 = vpop.f32.mrb[28].mxu0  ;;  %v678_v33 = vpop.f32.mrb[28].mxu1 }
 0x118   :  { %1028 = vpow2.f32 %v763_v22  ;;  %v769_v34 = vmul.f32 1.442695, %v748_v27  ;;  %v773_v35 = vmul.f32 1.442695, %v750_v28  ;;  %v695_v36 = vmax.f32 %v1291_v42, %v625_v32  ;;  %v627_v37 = vpop.f32.mrb[29].mxu0  ;;  %v680_v38 = vpop.f32.mrb[29].mxu1 }
 0x119   :  { %1030 = vpow2.f32 %v761_v25  ;;  %v697_v39 = vmax.f32 %v1293_v43, %v678_v33  ;;  %v696_v40 = vmax.f32 %v1295_v46, %v627_v37  ;;  %v698_v41 = vmax.f32 %v1297_v47, %v680_v38  ;;  %v629_v44 = vpop.f32.mrb[30].mxu0  ;;  %v682_v45 = vpop.f32.mrb[30].mxu1 }
 0x11a   :  { %1032 = vpow2.f32 %v765_v26  ;;  %v735_v48 = vadd.f32 %v720_v29, %v695_v36  ;;  %v699_v49 = vmax.f32 %v1299_v50, %v629_v44  ;;  %v701_v52 = vmax.f32 %v1301_v51, %v682_v45  ;;  %v631_v53 = vpop.f32.mrb[31].mxu0  ;;  %v684_v56 = vpop.f32.mrb[31].mxu1 }
 0x11b   :  { %1034 = vpow2.f32 %v767_v30  ;;  %v737_v42 = vadd.f32 %v720_v29, %v697_v39  ;;  %v736_v57 = vadd.f32 %v720_v29, %v696_v40  ;;  %v738_v58 = vadd.f32 %v720_v29, %v698_v41  ;;  %v725_v50 = vpop.permute.xlu1 %724 }
 0x11c   :  { %1036 = vpow2.f32 %v769_v34  ;;  %v751_v43 = vsub.f32 0.0, %v735_v48  ;;  %v700_v51 = vmax.f32 %v1303_v54, %v631_v53  ;;  %v739_v0 = vadd.f32 %v725_v50, %v699_v49 }
 0x11d   :  { %1038 = vpow2.f32 %v771_v31  ;;  %v753_v46 = vsub.f32 0.0, %v737_v42  ;;  %v752_v59 = vsub.f32 0.0, %v736_v57  ;;  %v754_v47 = vsub.f32 0.0, %v738_v58 }
 0x11e   :  { %1040 = vpow2.f32 %v773_v35  ;;  %v775_v60 = vmul.f32 1.442695, %v751_v43  ;;  %v702_v1 = vmax.f32 %v1305_v55, %v684_v56  ;;  %v755_v9 = vsub.f32 0.0, %v739_v0 }
 0x11f   :  { %v779_v61 = vmul.f32 1.442695, %v753_v46  ;;  %v777_v62 = vmul.f32 1.442695, %v752_v59  ;;  %v781_v63 = vmul.f32 1.442695, %v754_v47  ;;  %v741_v54 = vadd.f32 %v725_v50, %v701_v52 }
 0x120   :  { %1042 = vpow2.f32 %v775_v60  ;;  %v740_v55 = vadd.f32 %v725_v50, %v700_v51  ;;  %v742_v16 = vadd.f32 %v725_v50, %v702_v1  ;;  %v783_v19 = vmul.f32 1.442695, %v755_v9 }
 0x121   :  { %v1027_v2 = vpop.eup %1026  ;;  %1044 = vpow2.f32 %v779_v61  ;;  %v757_v21 = vsub.f32 0.0, %v741_v54 }
 0x122   :  { %v1029_v3 = vpop.eup %1028  ;;  %v791_v4 = vadd.f32 1.0, %v1027_v2  ;;  %1046 = vpow2.f32 %v777_v62  ;;  %v756_v23 = vsub.f32 0.0, %v740_v55  ;;  %v758_v26 = vsub.f32 0.0, %v742_v16 }
 0x123   :  { %v1031_v5 = vpop.eup %1030  ;;  %v793_v6 = vadd.f32 1.0, %v1029_v3  ;;  %1048 = vpow2.f32 %v781_v63  ;;  %v787_v31 = vmul.f32 1.442695, %v757_v21 }
 0x124   :  { %v1033_v7 = vpop.eup %1032  ;;  %1050 = vrcp.f32 %v791_v4  ;;  %v792_v8 = vadd.f32 1.0, %v1031_v5  ;;  %v785_v34 = vmul.f32 1.442695, %v756_v23  ;;  %v789_v36 = vmul.f32 1.442695, %v758_v26 }
 0x125   :  { %v1035_v10 = vpop.eup %1034  ;;  %1052 = vrcp.f32 %v793_v6  ;;  %v794_v11 = vadd.f32 1.0, %v1033_v7 }
 0x126   :  { %v1037_v12 = vpop.eup %1036  ;;  %1054 = vrcp.f32 %v792_v8  ;;  %v795_v13 = vadd.f32 1.0, %v1035_v10 }
 0x127   :  { %v1039_v14 = vpop.eup %1038  ;;  %1056 = vrcp.f32 %v794_v11  ;;  %v796_v15 = vadd.f32 1.0, %v1037_v12 }
 0x128   :  { %v1041_v17 = vpop.eup %1040  ;;  %v797_v18 = vadd.f32 1.0, %v1039_v14  ;;  %1058 = vrcp.f32 %v795_v13 }
 0x129   :  { %v798_v20 = vadd.f32 1.0, %v1041_v17  ;;  %1060 = vrcp.f32 %v796_v15 }
 0x12a   :  { %v1043_v22 = vpop.eup %1042  ;;  %1062 = vrcp.f32 %v797_v18 }
 0x12b   :  { %v1045_v24 = vpop.eup %1044  ;;  %1064 = vrcp.f32 %v798_v20  ;;  %v799_v25 = vadd.f32 1.0, %v1043_v22 }
 0x12c   :  { %v1047_v27 = vpop.eup %1046  ;;  %v801_v28 = vadd.f32 1.0, %v1045_v24  ;;  %1066 = vpow2.f32 %v783_v19 }
 0x12d   :  { %v1049_v29 = vpop.eup %1048  ;;  %1068 = vrcp.f32 %v799_v25  ;;  %v800_v30 = vadd.f32 1.0, %v1047_v27 }
 0x12e   :  { %v1051_v32 = vpop.eup %1050  ;;  %1070 = vrcp.f32 %v801_v28  ;;  %v802_v33 = vadd.f32 1.0, %v1049_v29 }
 0x12f   :  { %v1053_v35 = vpop.eup %1052  ;;  %1072 = vrcp.f32 %v800_v30 }
 0x130   :  { %v1055_v37 = vpop.eup %1054  ;;  %1074 = vrcp.f32 %v802_v33 }
 0x131   :  { %v1057_v38 = vpop.eup %1056  ;;  %v965_v39 = vpack.c.bf16 %v1055_v37, %v1051_v32  ;;  %1076 = vpow2.f32 %v787_v31 }
 0x132   :  { %v1059_v40 = vpop.eup %1058  ;;  %v966_v41 = vpack.c.bf16 %v1057_v38, %v1053_v35  ;;  %1078 = vpow2.f32 %v785_v34 }
 0x133   :  { %v1061_v44 = vpop.eup %1060  ;;  %871 = vst [vmem:[%s1342_s3] sm:$0xff] %v965_v39  ;;  %1080 = vpow2.f32 %v789_v36 }
 0x134   :  { %v1063_v45 = vpop.eup %1062  ;;  %872 = vst [vmem:[%s1342_s3 + $0x8] sm:$0xff] %v966_v41  ;;  %v967_v48 = vpack.c.bf16 %v1061_v44, %v1059_v40 }
 0x135   :  { %v1065_v49 = vpop.eup %1064 }
 0x136   :  { %v1067_v52 = vpop.eup %1066  ;;  %v968_v53 = vpack.c.bf16 %v1065_v49, %v1063_v45  ;;  %873 = vst [vmem:[%s1342_s3 + $0x10] sm:$0xff] %v967_v48 }
 0x137   :  { %v1069_v56 = vpop.eup %1068  ;;  %v803_v58 = vadd.f32 1.0, %v1067_v52 }
 0x138   :  { %v1071_v42 = vpop.eup %1070  ;;  %874 = vst [vmem:[%s1342_s3 + $0x18] sm:$0xff] %v968_v53 }
 0x139   :  { %v1073_v57 = vpop.eup %1072  ;;  %1082 = vrcp.f32 %v803_v58 }
 0x13a   :  { %v1075_v43 = vpop.eup %1074  ;;  %v969_v46 = vpack.c.bf16 %v1073_v57, %v1069_v56 }
 0x13b   :  { %v1077_v59 = vpop.eup %1076  ;;  %v970_v47 = vpack.c.bf16 %v1075_v43, %v1071_v42 }
 0x13c   :  { %v1079_v60 = vpop.eup %1078  ;;  %875 = vst [vmem:[%s1342_s3 + $0x20] sm:$0xff] %v969_v46  ;;  %v805_v61 = vadd.f32 1.0, %v1077_v59 }
 0x13d   :  { %v1081_v62 = vpop.eup %1080  ;;  %876 = vst [vmem:[%s1342_s3 + $0x28] sm:$0xff] %v970_v47  ;;  %v804_v63 = vadd.f32 1.0, %v1079_v60 }
 0x13e   :  { %1084 = vrcp.f32 %v805_v61  ;;  %v806_v50 = vadd.f32 1.0, %v1081_v62 }
 0x13f   :  { %1086 = vrcp.f32 %v804_v63 }
 0x140   :  { %1088 = vrcp.f32 %v806_v50 }
 0x143   :  { %v1083_v51 = vpop.eup %1082 }
 0x148   :  { %v1085_v0 = vpop.eup %1084 }
 0x149   :  { %v1087_v1 = vpop.eup %1086 }
 0x14a   :  { %v1089_v2 = vpop.eup %1088  ;;  %v971_v3 = vpack.c.bf16 %v1087_v1, %v1083_v51 }
 0x14b   :  { %v972_v4 = vpack.c.bf16 %v1089_v2, %v1085_v0 }
 0x14c   :  { %877 = vst [vmem:[%s1342_s3 + $0x30] sm:$0xff] %v971_v3 }
 0x14d   :  { %878 = vst [vmem:[%s1342_s3 + $0x38] sm:$0xff] %v972_v4 }

// kernel: convolutional_forward.5
= control target key start
LH: loop header
LB: loop body
LE: loop exit
PB: predicated region body
PF: predicated region fallthrough
CT: control target
= control target key end

     0   :  { %vm501_vm0 = vcmask 261120   ;;  %s4517_s0 = inlined_call_operand.vmem [shape: bf16[4,800,128], index: 0, kind: input, shape index: {}]   ;;  %s4518_s1 = inlined_call_operand.vmem [shape: bf16[32,800], index: 1, kind: input, shape index: {}]   ;;  %s4519_s2 = inlined_call_operand.vmem [shape: f32[32,1], index: 2, kind: input, shape index: {}]   ;;  %s4520_s3 = inlined_call_operand.vmem [shape: f32[32,128], index: 3, kind: output, shape index: {}]  }
   0x1   :  { %v3452_v0 = vld [vmem:[%s4517_s0 + $0x40] sm:$0xff]   ;;  %v3456_v4 = vld [vmem:[%s4517_s0 + $0x48] sm:$0xff]   ;;  %v3460_v8 = vld [vmem:[%s4517_s0 + $0x50] sm:$0xff]  }
   0x2   :  { %v3453_v1 = vld [vmem:[%s4517_s0 + $0xc0] sm:$0xff]   ;;  %3065 = vmatprep.subr.bf16.mxu0 %v3452_v0  ;;  %v3457_v5 = vld [vmem:[%s4517_s0 + $0xc8] sm:$0xff]   ;;  %v3461_v9 = vld [vmem:[%s4517_s0 + $0xd0] sm:$0xff]  }
   0x3   :  { %v3454_v2 = vld [vmem:[%s4517_s0] sm:$0xff]   ;;  %3093 = vmatprep.subr.bf16.mxu1 %v3453_v1  ;;  %v3458_v6 = vld [vmem:[%s4517_s0 + $0x8] sm:$0xff]   ;;  %v3462_v10 = vld [vmem:[%s4517_s0 + $0x10] sm:$0xff]  }
   0x4   :  { %v3455_v3 = vld [vmem:[%s4517_s0 + $0x80] sm:$0xff]   ;;  %3066 = vmatpush3.bf16.msra.mxu0 %v3454_v2  ;;  %v3459_v7 = vld [vmem:[%s4517_s0 + $0x88] sm:$0xff]   ;;  %v3463_v11 = vld [vmem:[%s4517_s0 + $0x90] sm:$0xff]  }
   0x5   :  { %3094 = vmatpush3.bf16.msra.mxu1 %v3455_v3  ;;  %3067 = vmatprep.subr.bf16.mxu0 %v3456_v4  ;;  %v3464_v12 = vld [vmem:[%s4517_s0 + $0x58] sm:$0xff]   ;;  %v3468_v16 = vld [vmem:[%s4517_s0 + $0x60] sm:$0xff]   ;;  %v3472_v20 = vld [vmem:[%s4517_s0 + $0x68] sm:$0xff]  }
   0x6   :  { %3095 = vmatprep.subr.bf16.mxu1 %v3457_v5  ;;  %v3465_v13 = vld [vmem:[%s4517_s0 + $0xd8] sm:$0xff]   ;;  %v3469_v17 = vld [vmem:[%s4517_s0 + $0xe0] sm:$0xff]   ;;  %v3473_v21 = vld [vmem:[%s4517_s0 + $0xe8] sm:$0xff]  }
   0x7   :  { %v3466_v14 = vld [vmem:[%s4517_s0 + $0x18] sm:$0xff]   ;;  %v3470_v18 = vld [vmem:[%s4517_s0 + $0x20] sm:$0xff]   ;;  %v3474_v22 = vld [vmem:[%s4517_s0 + $0x28] sm:$0xff]  }
   0x8   :  { %3068 = vmatpush3.bf16.msra.mxu0 %v3458_v6  ;;  %v3467_v15 = vld [vmem:[%s4517_s0 + $0x98] sm:$0xff]   ;;  %v3471_v19 = vld [vmem:[%s4517_s0 + $0xa0] sm:$0xff]   ;;  %v3475_v23 = vld [vmem:[%s4517_s0 + $0xa8] sm:$0xff]  }
   0x9   :  { %3096 = vmatpush3.bf16.msra.mxu1 %v3459_v7  ;;  %3069 = vmatprep.subr.bf16.mxu0 %v3460_v8  ;;  %v3476_v24 = vld [vmem:[%s4517_s0 + $0x70] sm:$0xff]   ;;  %v3480_v28 = vld [vmem:[%s4517_s0 + $0x78] sm:$0xff]   ;;  %v3806_v32 = vld [vmem:[%s4518_s1 + $0x4] ss:$28 sps:$4 sm:$0xff]  }
   0xa   :  { %3097 = vmatprep.subr.bf16.mxu1 %v3461_v9  ;;  %v3477_v25 = vld [vmem:[%s4517_s0 + $0xf0] sm:$0xff]   ;;  %v3481_v29 = vld [vmem:[%s4517_s0 + $0xf8] sm:$0xff]   ;;  %v3811_v33 = vld [vmem:[%s4518_s1 + $0xc] ss:$28 sps:$4 sm:$0xff]   ;;  %540 = vmatprep.mubr.bf16.mxu0 %v3806_v32 }
   0xb   :  { %v3478_v26 = vld [vmem:[%s4517_s0 + $0x30] sm:$0xff]   ;;  %v3482_v30 = vld [vmem:[%s4517_s0 + $0x38] sm:$0xff]   ;;  %v3822_v35 = vld [vmem:[%s4518_s1 + $0x8] ss:$28 sps:$4 sm:$0xff]   ;;  %589 = vmatprep.mubr.bf16.mxu1 %v3811_v33 }
   0xc   :  { %3070 = vmatpush3.bf16.msra.mxu0 %v3462_v10  ;;  %v3479_v27 = vld [vmem:[%s4517_s0 + $0xb0] sm:$0xff]   ;;  %v3483_v31 = vld [vmem:[%s4517_s0 + $0xb8] sm:$0xff]   ;;  %v3490_v36 = vld [vmem:[%s4517_s0 + $0x140] sm:$0xff]  }
   0xd   :  { %3098 = vmatpush3.bf16.msra.mxu1 %v3463_v11  ;;  %3071 = vmatprep.subr.bf16.mxu0 %v3464_v12  ;;  %v3817_v34 = vld [vmem:[%s4518_s1] ss:$28 sps:$4 sm:$0xff]   ;;  %v3493_v39 = vld [vmem:[%s4517_s0 + $0x148] sm:$0xff]   ;;  %v3855_v43 = vld [vmem:[%s4518_s1 + $0x38] ss:$28 sps:$4 sm:$0xff]  }
   0xe   :  { %3099 = vmatprep.subr.bf16.mxu1 %v3465_v13  ;;  %v3491_v37 = vld [vmem:[%s4517_s0 + $0x180] sm:$0xff]   ;;  %v3494_v40 = vld [vmem:[%s4517_s0 + $0x108] sm:$0xff]   ;;  %v3845_v41 = vld [vmem:[%s4518_s1 + $0x3c] ss:$28 sps:$4 sm:$0xff]  }
   0xf   :  { %v3492_v38 = vld [vmem:[%s4517_s0 + $0x100] sm:$0xff]   ;;  %v3501_v45 = vld [vmem:[%s4517_s0 + $0x150] sm:$0xff]   ;;  %v3502_v46 = vld [vmem:[%s4517_s0 + $0x188] sm:$0xff]  }
  0x10   :  { %3072 = vmatpush3.bf16.msra.mxu0 %v3466_v14  ;;  %v3850_v42 = vld [vmem:[%s4518_s1 + $0x44] ss:$28 sps:$4 sm:$0xff]   ;;  %v3503_v47 = vld [vmem:[%s4517_s0 + $0x110] sm:$0xff]   ;;  %v3504_v48 = vld [vmem:[%s4517_s0 + $0x158] sm:$0xff]  }
  0x11   :  { %3100 = vmatpush3.bf16.msra.mxu1 %v3467_v15  ;;  %3073 = vmatprep.subr.bf16.mxu0 %v3468_v16  ;;  %v3861_v44 = vld [vmem:[%s4518_s1 + $0x40] ss:$28 sps:$4 sm:$0xff]   ;;  %v3884_v50 = vld [vmem:[%s4518_s1 + $0x18] ss:$28 sps:$4 sm:$0xff]   ;;  %v3897_v53 = vld [vmem:[%s4518_s1 + $0x50] ss:$28 sps:$4 sm:$0xff]  }
  0x12   :  { %3101 = vmatprep.subr.bf16.mxu1 %v3469_v17  ;;  %v3505_v49 = vld [vmem:[%s4517_s0 + $0x118] sm:$0xff]   ;;  %v3507_v51 = vld [vmem:[%s4517_s0 + $0x1d0] sm:$0xff]   ;;  %v3508_v52 = vld [vmem:[%s4517_s0 + $0x160] sm:$0xff]  }
  0x13   :  { %v3510_v54 = vld [vmem:[%s4517_s0 + $0x190] sm:$0xff]   ;;  %v3511_v55 = vld [vmem:[%s4517_s0 + $0x120] sm:$0xff]   ;;  %v3512_v56 = vld [vmem:[%s4517_s0 + $0x1d8] sm:$0xff]  }
  0x14   :  { %3074 = vmatpush3.bf16.msra.mxu0 %v3470_v18  ;;  %v3513_v57 = vld [vmem:[%s4517_s0 + $0x168] sm:$0xff]   ;;  %v3514_v58 = vld [vmem:[%s4517_s0 + $0x198] sm:$0xff]   ;;  %v3516_v60 = vld [vmem:[%s4517_s0 + $0x1e0] sm:$0xff]  }
  0x15   :  { %3102 = vmatpush3.bf16.msra.mxu1 %v3471_v19  ;;  %3075 = vmatprep.subr.bf16.mxu0 %v3472_v20  ;;  %v3515_v59 = vld [vmem:[%s4517_s0 + $0x128] sm:$0xff]   ;;  %v3517_v61 = vld [vmem:[%s4517_s0 + $0x170] sm:$0xff]   ;;  %v3518_v62 = vld [vmem:[%s4517_s0 + $0x1a0] sm:$0xff]  }
  0x16   :  { %3103 = vmatprep.subr.bf16.mxu1 %v3473_v21  ;;  %v3519_v63 = vld [vmem:[%s4517_s0 + $0x130] sm:$0xff]   ;;  %v3520_v0 = vld [vmem:[%s4517_s0 + $0x1e8] sm:$0xff]   ;;  %v3521_v1 = vld [vmem:[%s4517_s0 + $0x178] sm:$0xff]  }
  0x17   :  { %v3522_v2 = vld [vmem:[%s4517_s0 + $0x1a8] sm:$0xff]   ;;  %v3523_v3 = vld [vmem:[%s4517_s0 + $0x138] sm:$0xff]   ;;  %v3952_v5 = vld [vmem:[%s4518_s1 + $0x14] ss:$28 sps:$4 sm:$0xff]  }
  0x18   :  { %3076 = vmatpush3.bf16.msra.mxu0 %v3474_v22  ;;  %v3947_v4 = vld [vmem:[%s4518_s1 + $0x10] ss:$28 sps:$4 sm:$0xff]   ;;  %v3531_v10 = vld [vmem:[%s4517_s0 + $0x1f8] sm:$0xff]   ;;  %v3537_v15 = vld [vmem:[%s4517_s0 + $0x200] sm:$0xff]  }
  0x19   :  { %3104 = vmatpush3.bf16.msra.mxu1 %v3475_v23  ;;  %3077 = vmatprep.subr.bf16.mxu0 %v3476_v24  ;;  %v3527_v6 = vld [vmem:[%s4517_s0 + $0x1f0] sm:$0xff]   ;;  %v3532_v11 = vld [vmem:[%s4517_s0 + $0x1b8] sm:$0xff]   ;;  %v3983_v14 = vld [vmem:[%s4518_s1 + $0x4c] ss:$28 sps:$4 sm:$0xff]  }
  0x1a   :  { %3105 = vmatprep.subr.bf16.mxu1 %v3477_v25  ;;  %v3528_v7 = vld [vmem:[%s4517_s0 + $0x1b0] sm:$0xff]   ;;  %v3533_v12 = vld [vmem:[%s4517_s0 + $0x258] sm:$0xff]   ;;  %v3991_v16 = vld [vmem:[%s4518_s1 + $0x48] ss:$28 sps:$4 sm:$0xff]  }
  0x1b   :  { %v3529_v8 = vld [vmem:[%s4517_s0 + $0x250] sm:$0xff]   ;;  %v3534_v13 = vld [vmem:[%s4517_s0 + $0x218] sm:$0xff]   ;;  %v3539_v17 = vld [vmem:[%s4517_s0 + $0x1c0] sm:$0xff]  }
  0x1c   :  { %3078 = vmatpush3.bf16.msra.mxu0 %v3478_v26  ;;  %v3530_v9 = vld [vmem:[%s4517_s0 + $0x210] sm:$0xff]   ;;  %v3540_v18 = vld [vmem:[%s4517_s0 + $0x260] sm:$0xff]   ;;  %v3542_v20 = vld [vmem:[%s4517_s0 + $0x208] sm:$0xff]  }
  0x1d   :  { %3106 = vmatpush3.bf16.msra.mxu1 %v3479_v27  ;;  %3079 = vmatprep.subr.bf16.mxu0 %v3480_v28  ;;  %v3541_v19 = vld [vmem:[%s4517_s0 + $0x220] sm:$0xff]   ;;  %v3543_v21 = vld [vmem:[%s4517_s0 + $0x1c8] sm:$0xff]   ;;  %v3546_v24 = vld [vmem:[%s4517_s0 + $0x2d0] sm:$0xff]  }
  0x1e   :  { %3107 = vmatprep.subr.bf16.mxu1 %v3481_v29  ;;  %v3544_v22 = vld [vmem:[%s4517_s0 + $0x268] sm:$0xff]   ;;  %v3547_v25 = vld [vmem:[%s4517_s0 + $0x270] sm:$0xff]   ;;  %v3550_v28 = vld [vmem:[%s4517_s0 + $0x2d8] sm:$0xff]  }
  0x1f   :  { %v3545_v23 = vld [vmem:[%s4517_s0 + $0x228] sm:$0xff]   ;;  %v3548_v26 = vld [vmem:[%s4517_s0 + $0x290] sm:$0xff]   ;;  %v3551_v29 = vld [vmem:[%s4517_s0 + $0x278] sm:$0xff]  }
  0x20   :  { %3080 = vmatpush3.bf16.msra.mxu0 %v3482_v30  ;;  %v3549_v27 = vld [vmem:[%s4517_s0 + $0x230] sm:$0xff]   ;;  %v3552_v30 = vld [vmem:[%s4517_s0 + $0x298] sm:$0xff]  }
  0x21   :  { %3108 = vmatpush3.bf16.msra.mxu1 %v3483_v31  ;;  %3121 = vmatprep.subr.bf16.mxu0 %v3490_v36  ;;  %v3553_v31 = vld [vmem:[%s4517_s0 + $0x238] sm:$0xff]   ;;  %v3554_v36 = vld [vmem:[%s4517_s0 + $0x2e0] sm:$0xff]  }
  0x22   :  { %3417 = vmatprep.subr.bf16.mxu1 %v3491_v37 }
  0x23   :  { %541 = vmatmul.mubr.bf16.vlgmr.msra.gmra.mrb[0].mxu0 %v3817_v34 }
  0x24   :  { %590 = vmatmul.mubr.bf16.vlgmr.msra.gmra.mrb[0].mxu1 %v3822_v35  ;;  %3122 = vmatpush3.bf16.msra.mxu0 %v3492_v38  ;;  %v3556_v38 = vld [vmem:[%s4517_s0 + $0x2a0] sm:$0xff]  }
  0x25   :  { %3418 = vmatpush3.bf16.msra.mxu1 %v3491_v37  ;;  %3123 = vmatprep.subr.bf16.mxu0 %v3493_v39  ;;  %v3555_v37 = vld [vmem:[%s4517_s0 + $0x280] sm:$0xff]  }
  0x26   :  { %548 = vmatprep.mubr.bf16.mxu0 %v3845_v41  ;;  %597 = vmatprep.mubr.bf16.mxu1 %v3850_v42  ;;  %v3557_v39 = vld [vmem:[%s4517_s0 + $0x240] sm:$0xff]  }
  0x27   :  { %3419 = vmatprep.subr.bf16.mxu1 %v3502_v46 }
  0x28   :  { %3124 = vmatpush3.bf16.msra.mxu0 %v3494_v40  ;;  %v3558_v40 = vld [vmem:[%s4517_s0 + $0x2e8] sm:$0xff]  }
  0x29   :  { %3125 = vmatprep.subr.bf16.mxu0 %v3501_v45  ;;  %3420 = vmatpush3.bf16.msra.mxu1 %v3502_v46  ;;  %v3559_v45 = vld [vmem:[%s4517_s0 + $0x288] sm:$0xff]  }
  0x2a   :  { %3153 = vmatprep.subr.bf16.mxu1 %v3507_v51  ;;  %v3560_v46 = vld [vmem:[%s4517_s0 + $0x2a8] sm:$0xff]   ;;  %v3564_v51 = vld [vmem:[%s4517_s0 + $0x2f8] sm:$0xff]  }
  0x2b   :  { %549 = vmatmul.mubr.bf16.gmra.mrb[4].mxu0 %v3855_v43 }
  0x2c   :  { %598 = vmatmul.mubr.bf16.gmra.mrb[4].mxu1 %v3861_v44  ;;  %3126 = vmatpush3.bf16.msra.mxu0 %v3503_v47  ;;  %v3561_v47 = vld [vmem:[%s4517_s0 + $0x248] sm:$0xff]  }
  0x2d   :  { %3127 = vmatprep.subr.bf16.mxu0 %v3504_v48  ;;  %3421 = vmatprep.mubr.msk.bf16.mxu1 %vm501_vm0, %v3884_v50  ;;  %v3562_v48 = vld [vmem:[%s4517_s0 + $0x2f0] sm:$0xff]  }
  0x2e   :  { %638 = vmatprep.mubr.bf16.mxu0 %v3952_v5 }
  0x30   :  { %3128 = vmatpush3.bf16.msra.mxu0 %v3505_v49  ;;  %v3563_v49 = vld [vmem:[%s4517_s0 + $0x2b0] sm:$0xff]  }
  0x31   :  { %3129 = vmatprep.subr.bf16.mxu0 %v3508_v52  ;;  %v3565_v52 = vld [vmem:[%s4517_s0 + $0x2b8] sm:$0xff]  }
  0x34   :  { %3422 = vmatmul.mubr.msk.bf16.vlgmr.msra.gmra.mrb[8].mxu1 %vm501_vm0, %v3897_v53  ;;  %3130 = vmatpush3.bf16.msra.mxu0 %v3511_v55  ;;  %v3567_v55 = vld [vmem:[%s4517_s0 + $0x310] sm:$0xff]  }
  0x35   :  { %3154 = vmatpush3.bf16.msra.mxu1 %v3510_v54  ;;  %1137 = vmatprep.mubr.bf16.mxu1 %v3806_v32  ;;  %v3566_v54 = vld [vmem:[%s4517_s0 + $0x300] sm:$0xff]  }
  0x36   :  { %3155 = vmatprep.subr.bf16.mxu1 %v3512_v56  ;;  %3131 = vmatprep.subr.bf16.mxu0 %v3513_v57  ;;  %v3568_v56 = vld [vmem:[%s4517_s0 + $0x2c0] sm:$0xff]   ;;  %v3570_v57 = vld [vmem:[%s4517_s0 + $0x318] sm:$0xff]  }
  0x38   :  { %3132 = vmatpush3.bf16.msra.mxu0 %v3515_v59  ;;  %v3572_v59 = vld [vmem:[%s4517_s0 + $0x360] sm:$0xff]  }
  0x39   :  { %3156 = vmatpush3.bf16.msra.mxu1 %v3514_v58  ;;  %3133 = vmatprep.subr.bf16.mxu0 %v3517_v61  ;;  %v3569_v58 = vld [vmem:[%s4517_s0 + $0x308] sm:$0xff]   ;;  %v3573_v61 = vld [vmem:[%s4517_s0 + $0x3e0] sm:$0xff]  }
  0x3a   :  { %3157 = vmatprep.subr.bf16.mxu1 %v3516_v60  ;;  %v3571_v60 = vld [vmem:[%s4517_s0 + $0x2c8] sm:$0xff]  }
  0x3c   :  { %3134 = vmatpush3.bf16.msra.mxu0 %v3519_v63  ;;  %v3575_v63 = vld [vmem:[%s4517_s0 + $0x3a0] sm:$0xff]  }
  0x3d   :  { %3158 = vmatpush3.bf16.msra.mxu1 %v3518_v62  ;;  %3135 = vmatprep.subr.bf16.mxu0 %v3521_v1  ;;  %v3574_v62 = vld [vmem:[%s4517_s0 + $0x320] sm:$0xff]   ;;  %v3576_v1 = vld [vmem:[%s4517_s0 + $0x368] sm:$0xff]  }
  0x3e   :  { %3159 = vmatprep.subr.bf16.mxu1 %v3520_v0  ;;  %v3577_v0 = vld [vmem:[%s4517_s0 + $0x3e8] sm:$0xff]  }
  0x40   :  { %3136 = vmatpush3.bf16.msra.mxu0 %v3523_v3  ;;  %v3579_v3 = vld [vmem:[%s4517_s0 + $0x3a8] sm:$0xff]  }
  0x41   :  { %3160 = vmatpush3.bf16.msra.mxu1 %v3522_v2  ;;  %3181 = vmatprep.subr.bf16.mxu0 %v3529_v8  ;;  %v3578_v2 = vld [vmem:[%s4517_s0 + $0x328] sm:$0xff]   ;;  %v3582_v8 = vld [vmem:[%s4517_s0 + $0x330] sm:$0xff]  }
  0x42   :  { %3161 = vmatprep.subr.bf16.mxu1 %v3527_v6  ;;  %v3581_v6 = vld [vmem:[%s4517_s0 + $0x3f0] sm:$0xff]  }
  0x43   :  { %639 = vmatmul.mubr.bf16.vlgmr.msra.gmra.mrb[8].mxu0 %v3947_v4 }
  0x44   :  { %3182 = vmatpush3.bf16.msra.mxu0 %v3530_v9  ;;  %646 = vmatprep.mubr.bf16.mxu0 %v3983_v14  ;;  %v3583_v9 = vld [vmem:[%s4517_s0 + $0x3b0] sm:$0xff]  }
  0x45   :  { %3162 = vmatpush3.bf16.msra.mxu1 %v3528_v7  ;;  %3183 = vmatprep.subr.bf16.mxu0 %v3533_v12  ;;  %v3580_v7 = vld [vmem:[%s4517_s0 + $0x370] sm:$0xff]   ;;  %v3587_v12 = vld [vmem:[%s4517_s0 + $0x3b8] sm:$0xff]  }
  0x46   :  { %3163 = vmatprep.subr.bf16.mxu1 %v3531_v10  ;;  %v3585_v10 = vld [vmem:[%s4517_s0 + $0x3f8] sm:$0xff]  }
  0x48   :  { %3184 = vmatpush3.bf16.msra.mxu0 %v3534_v13  ;;  %v3589_v13 = vld [vmem:[%s4517_s0 + $0x400] sm:$0xff]  }
  0x49   :  { %3164 = vmatpush3.bf16.msra.mxu1 %v3532_v11  ;;  %3185 = vmatprep.subr.bf16.mxu0 %v3540_v18  ;;  %v3584_v11 = vld [vmem:[%s4517_s0 + $0x378] sm:$0xff]   ;;  %v3593_v18 = vld [vmem:[%s4517_s0 + $0x408] sm:$0xff]  }
  0x4a   :  { %3165 = vmatprep.subr.bf16.mxu1 %v3537_v15  ;;  %v3588_v15 = vld [vmem:[%s4517_s0 + $0x380] sm:$0xff]  }
  0x4b   :  { %647 = vmatmul.mubr.bf16.gmra.mrb[12].mxu0 %v3991_v16 }
  0x4c   :  { %1186 = vmatprep.mubr.bf16.mxu0 %v3811_v33  ;;  %3186 = vmatpush3.bf16.msra.mxu0 %v3541_v19  ;;  %v3592_v19 = vld [vmem:[%s4517_s0 + $0x388] sm:$0xff]  }
  0x4d   :  { %3166 = vmatpush3.bf16.msra.mxu1 %v3539_v17  ;;  %3187 = vmatprep.subr.bf16.mxu0 %v3544_v22  ;;  %v3590_v17 = vld [vmem:[%s4517_s0 + $0x340] sm:$0xff]   ;;  %v3597_v22 = vld [vmem:[%s4517_s0 + $0x410] sm:$0xff]  }
  0x4e   :  { %3167 = vmatprep.subr.bf16.mxu1 %v3542_v20  ;;  %v3594_v20 = vld [vmem:[%s4517_s0 + $0x348] sm:$0xff]  }
  0x50   :  { %3188 = vmatpush3.bf16.msra.mxu0 %v3545_v23  ;;  %v3596_v23 = vld [vmem:[%s4517_s0 + $0x390] sm:$0xff]  }
  0x51   :  { %3168 = vmatpush3.bf16.msra.mxu1 %v3543_v21  ;;  %3189 = vmatprep.subr.bf16.mxu0 %v3547_v25  ;;  %v3595_v21 = vld [vmem:[%s4517_s0 + $0x3c8] sm:$0xff]   ;;  %v3599_v25 = vld [vmem:[%s4517_s0 + $0x3d0] sm:$0xff]  }
  0x52   :  { %3209 = vmatprep.subr.bf16.mxu1 %v3546_v24  ;;  %v3598_v24 = vld [vmem:[%s4517_s0 + $0x350] sm:$0xff]  }
  0x54   :  { %1138 = vmatmul.mubr.bf16.vlgmr.msra.gmra.mrb[12].mxu1 %v3817_v34  ;;  %3190 = vmatpush3.bf16.msra.mxu0 %v3549_v27  ;;  %v3600_v27 = vld [vmem:[%s4517_s0 + $0x398] sm:$0xff]  }
  0x55   :  { %1145 = vmatprep.mubr.bf16.mxu1 %v3845_v41  ;;  %3210 = vmatpush3.bf16.msra.mxu1 %v3548_v26  ;;  %v3601_v26 = vld [vmem:[%s4517_s0 + $0x418] sm:$0xff]  }
  0x56   :  { %3211 = vmatprep.subr.bf16.mxu1 %v3550_v28  ;;  %3191 = vmatprep.subr.bf16.mxu0 %v3551_v29  ;;  %v3602_v28 = vld [vmem:[%s4517_s0 + $0x358] sm:$0xff]  }
  0x57   :  { %v3603_v29 = vld [vmem:[%s4517_s0 + $0x3d8] sm:$0xff]  }
  0x58   :  { %3192 = vmatpush3.bf16.msra.mxu0 %v3553_v31  ;;  %v3604_v31 = vld [vmem:[%s4517_s0 + $0x460] sm:$0xff]  }
  0x59   :  { %3212 = vmatpush3.bf16.msra.mxu1 %v3552_v30  ;;  %3193 = vmatprep.subr.bf16.mxu0 %v3555_v37  ;;  %v3605_v30 = vld [vmem:[%s4517_s0 + $0x4a0] sm:$0xff]   ;;  %v3607_v37 = vld [vmem:[%s4517_s0 + $0x468] sm:$0xff]  }
  0x5a   :  { %3213 = vmatprep.subr.bf16.mxu1 %v3554_v36  ;;  %v3606_v36 = vld [vmem:[%s4517_s0 + $0x420] sm:$0xff]  }
  0x5c   :  { %1146 = vmatmul.mubr.bf16.gmra.mrb[16].mxu1 %v3855_v43  ;;  %3194 = vmatpush3.bf16.msra.mxu0 %v3557_v39  ;;  %v3608_v39 = vld [vmem:[%s4517_s0 + $0x428] sm:$0xff]  }
  0x5d   :  { %1235 = vmatprep.mubr.bf16.mxu1 %v3952_v5  ;;  %3214 = vmatpush3.bf16.msra.mxu1 %v3556_v38  ;;  %v3610_v38 = vld [vmem:[%s4517_s0 + $0x4a8] sm:$0xff]  }
  0x5e   :  { %3215 = vmatprep.subr.bf16.mxu1 %v3558_v40  ;;  %3195 = vmatprep.subr.bf16.mxu0 %v3559_v45  ;;  %v3614_v40 = vld [vmem:[%s4517_s0 + $0x4f0] sm:$0xff]   ;;  %v3615_v45 = vld [vmem:[%s4517_s0 + $0x480] sm:$0xff]  }
  0x60   :  { %3196 = vmatpush3.bf16.msra.mxu0 %v3561_v47  ;;  %v3621_v47 = vld [vmem:[%s4517_s0 + $0x448] sm:$0xff]  }
  0x61   :  { %3216 = vmatpush3.bf16.msra.mxu1 %v3560_v46  ;;  %3425 = vmatprep.subr.bf16.mxu0 %v3567_v55  ;;  %v3620_v46 = vld [vmem:[%s4517_s0 + $0x4b8] sm:$0xff]  }
  0x62   :  { %3217 = vmatprep.subr.bf16.mxu1 %v3562_v48  ;;  %v3672_v48 = vld [vmem:[%s4518_s1 + $0x4] ss:$28 sps:$4 sm:$0xff]  }
  0x63   :  { %1187 = vmatmul.mubr.bf16.vlgmr.msra.gmra.mrb[16].mxu0 %v3822_v35 }
  0x64   :  { %1194 = vmatprep.mubr.bf16.mxu0 %v3850_v42  ;;  %3426 = vmatpush3.bf16.msra.mxu0 %v3567_v55  ;;  %v3627_v55 = vld [vmem:[%s4517_s0 + $0x498] sm:$0xff]  }
  0x65   :  { %3218 = vmatpush3.bf16.msra.mxu1 %v3563_v49  ;;  %3427 = vmatprep.subr.bf16.mxu0 %v3570_v57  ;;  %v3623_v49 = vld [vmem:[%s4517_s0 + $0x490] sm:$0xff]  }
  0x66   :  { %3219 = vmatprep.subr.bf16.mxu1 %v3564_v51  ;;  %v3624_v51 = vld [vmem:[%s4517_s0 + $0x4c0] sm:$0xff]  }
  0x68   :  { %3428 = vmatpush3.bf16.msra.mxu0 %v3570_v57  ;;  %v3629_v57 = vld [vmem:[%s4517_s0 + $0x458] sm:$0xff]  }
  0x69   :  { %3220 = vmatpush3.bf16.msra.mxu1 %v3565_v52  ;;  %3241 = vmatprep.subr.bf16.mxu0 %v3572_v59  ;;  %v3625_v52 = vld [vmem:[%s4517_s0 + $0x450] sm:$0xff]  }
  0x6a   :  { %3221 = vmatprep.subr.bf16.mxu1 %v3566_v54  ;;  %v3626_v54 = vld [vmem:[%s4517_s0 + $0x508] sm:$0xff]   ;;  %v3632_v59 = vld [vmem:[%s4517_s0 + $0x570] sm:$0xff]  }
  0x6b   :  { %1195 = vmatmul.mubr.bf16.gmra.mrb[20].mxu0 %v3861_v44 }
  0x6c   :  { %3429 = vmatprep.mubr.msk.bf16.mxu0 %vm501_vm0, %v3884_v50 }
  0x6d   :  { %3222 = vmatpush3.bf16.msra.mxu1 %v3568_v56  ;;  %v3628_v56 = vld [vmem:[%s4517_s0 + $0x4c8] sm:$0xff]  }
  0x6e   :  { %3223 = vmatprep.subr.bf16.mxu1 %v3569_v58  ;;  %v3630_v58 = vld [vmem:[%s4517_s0 + $0x510] sm:$0xff]  }
  0x71   :  { %3224 = vmatpush3.bf16.msra.mxu1 %v3571_v60  ;;  %v3631_v60 = vld [vmem:[%s4517_s0 + $0x4d0] sm:$0xff]  }
  0x72   :  { %3269 = vmatprep.subr.bf16.mxu1 %v3573_v61  ;;  %v3633_v61 = vld [vmem:[%s4517_s0 + $0x530] sm:$0xff]  }
  0x73   :  { %3430 = vmatmul.mubr.msk.bf16.vlgmr.msra.gmra.mrb[24].mxu0 %vm501_vm0, %v3897_v53 }
  0x74   :  { %1236 = vmatmul.mubr.bf16.vlgmr.msra.gmra.mrb[20].mxu1 %v3947_v4  ;;  %3242 = vmatpush3.bf16.msra.mxu0 %v3574_v62  ;;  %v3634_v62 = vld [vmem:[%s4517_s0 + $0x518] sm:$0xff]  }
  0x75   :  { %3270 = vmatpush3.bf16.msra.mxu1 %v3575_v63  ;;  %3243 = vmatprep.subr.bf16.mxu0 %v3576_v1  ;;  %v3636_v63 = vld [vmem:[%s4517_s0 + $0x578] sm:$0xff]  }
  0x76   :  { %3271 = vmatprep.subr.bf16.mxu1 %v3577_v0  ;;  %1243 = vmatprep.mubr.bf16.mxu1 %v3983_v14  ;;  %v3635_v0 = vld [vmem:[%s4517_s0 + $0x4d8] sm:$0xff]  }
  0x77   :  { %1738 = vmatprep.mubr.bf16.mxu0 %v3806_v32  ;;  %v3586_v32 = vld [vmem:[%s4517_s0 + $0x338] sm:$0xff]  }
  0x78   :  { %3244 = vmatpush3.bf16.msra.mxu0 %v3578_v2  ;;  %v3637_v1 = vld [vmem:[%s4517_s0 + $0x538] sm:$0xff]   ;;  %v3638_v2 = vld [vmem:[%s4517_s0 + $0x520] sm:$0xff]  }
  0x79   :  { %3272 = vmatpush3.bf16.msra.mxu1 %v3579_v3  ;;  %3245 = vmatprep.subr.bf16.mxu0 %v3580_v7  ;;  %v3640_v3 = vld [vmem:[%s4517_s0 + $0x580] sm:$0xff]   ;;  %v3642_v7 = vld [vmem:[%s4517_s0 + $0x528] sm:$0xff]  }
  0x7a   :  { %3273 = vmatprep.subr.bf16.mxu1 %v3581_v6  ;;  %v3641_v6 = vld [vmem:[%s4517_s0 + $0x540] sm:$0xff]  }
  0x7c   :  { %1244 = vmatmul.mubr.bf16.gmra.mrb[24].mxu1 %v3991_v16  ;;  %3246 = vmatpush3.bf16.msra.mxu0 %v3582_v8  ;;  %v3643_v8 = vld [vmem:[%s4517_s0 + $0x4e8] sm:$0xff]  }
  0x7d   :  { %3274 = vmatpush3.bf16.msra.mxu1 %v3583_v9  ;;  %1787 = vmatprep.mubr.bf16.mxu1 %v3811_v33  ;;  %v3591_v33 = vld [vmem:[%s4517_s0 + $0x3c0] sm:$0xff]   ;;  %v3645_v9 = vld [vmem:[%s4517_s0 + $0x548] sm:$0xff]  }
  0x7e   :  { %3275 = vmatprep.subr.bf16.mxu1 %v3585_v10  ;;  %3247 = vmatprep.subr.bf16.mxu0 %v3584_v11  ;;  %v3646_v10 = vld [vmem:[%s4517_s0 + $0x5f0] sm:$0xff]  }
  0x7f   :  { %v3647_v11 = vld [vmem:[%s4517_s0 + $0x590] sm:$0xff]  }
  0x80   :  { %3248 = vmatpush3.bf16.msra.mxu0 %v3586_v32  ;;  %v3648_v32 = vld [vmem:[%s4517_s0 + $0x5b0] sm:$0xff]  }
  0x81   :  { %3276 = vmatpush3.bf16.msra.mxu1 %v3587_v12  ;;  %3249 = vmatprep.subr.bf16.mxu0 %v3588_v15  ;;  %v3686_v12 = vmov 0   ;;  %v3650_v15 = vld [vmem:[%s4517_s0 + $0x5f8] sm:$0xff]  }
  0x82   :  { %3277 = vmatprep.subr.bf16.mxu1 %v3589_v13  ;;  %3450 = vset.pattern.permute.xlu0 %v3686_v12  ;;  %v3649_v13 = vld [vmem:[%s4517_s0 + $0x550] sm:$0xff]  }
  0x83   :  { %3451 = vset.pattern.permute.xlu1 %v3686_v12 }
  0x84   :  { %3250 = vmatpush3.bf16.msra.mxu0 %v3590_v17  ;;  %v3651_v17 = vld [vmem:[%s4517_s0 + $0x598] sm:$0xff]  }
  0x85   :  { %3278 = vmatpush3.bf16.msra.mxu1 %v3591_v33  ;;  %3251 = vmatprep.subr.bf16.mxu0 %v3592_v19  ;;  %v3674_v33 = vld [vmem:[%s4518_s1] ss:$28 sps:$4 sm:$0xff]  }
  0x86   :  { %3279 = vmatprep.subr.bf16.mxu1 %v3593_v18  ;;  %v3652_v18 = vld [vmem:[%s4517_s0 + $0x5b8] sm:$0xff]  }
  0x87   :  { %v3653_v19 = vld [vmem:[%s4517_s0 + $0x558] sm:$0xff]  }
  0x88   :  { %3252 = vmatpush3.bf16.msra.mxu0 %v3594_v20  ;;  %v3675_v20 = vld [vmem:[%s4518_s1 + $0x3c] ss:$28 sps:$4 sm:$0xff]  }
  0x89   :  { %3280 = vmatpush3.bf16.msra.mxu1 %v3595_v21  ;;  %3253 = vmatprep.subr.bf16.mxu0 %v3596_v23  ;;  %v3654_v21 = vld [vmem:[%s4517_s0 + $0x600] sm:$0xff]  }
  0x8a   :  { %3281 = vmatprep.subr.bf16.mxu1 %v3597_v22  ;;  %v3655_v22 = vld [vmem:[%s4517_s0 + $0x5a0] sm:$0xff]  }
  0x8b   :  { %v3656_v23 = vld [vmem:[%s4517_s0 + $0x5c0] sm:$0xff]  }
  0x8c   :  { %3254 = vmatpush3.bf16.msra.mxu0 %v3598_v24  ;;  %v3657_v24 = vld [vmem:[%s4517_s0 + $0x560] sm:$0xff]  }
  0x8d   :  { %3282 = vmatpush3.bf16.msra.mxu1 %v3599_v25  ;;  %3255 = vmatprep.subr.bf16.mxu0 %v3600_v27  ;;  %v3658_v25 = vld [vmem:[%s4517_s0 + $0x608] sm:$0xff]  }
  0x8e   :  { %3283 = vmatprep.subr.bf16.mxu1 %v3601_v26  ;;  %v3659_v26 = vld [vmem:[%s4517_s0 + $0x5a8] sm:$0xff]  }
  0x8f   :  { %v3660_v27 = vld [vmem:[%s4517_s0 + $0x5c8] sm:$0xff]  }
  0x90   :  { %3256 = vmatpush3.bf16.msra.mxu0 %v3602_v28  ;;  %v3676_v28 = vld [vmem:[%s4518_s1 + $0x38] ss:$28 sps:$4 sm:$0xff]  }
  0x91   :  { %3284 = vmatpush3.bf16.msra.mxu1 %v3603_v29  ;;  %3297 = vmatprep.subr.bf16.mxu0 %v3604_v31  ;;  %v3661_v29 = vld [vmem:[%s4517_s0 + $0x568] sm:$0xff]   ;;  %v3662_v31 = vld [vmem:[%s4517_s0 + $0x610] sm:$0xff]  }
  0x92   :  { %3433 = vmatprep.subr.bf16.mxu1 %v3605_v30 }
  0x93   :  { %1739 = vmatmul.mubr.bf16.vlgmr.msra.gmra.mrb[28].mxu0 %v3817_v34  ;;  %v3611_v34 = vld [vmem:[%s4517_s0 + $0x430] sm:$0xff]  }
  0x94   :  { %1788 = vmatmul.mubr.bf16.vlgmr.msra.gmra.mrb[28].mxu1 %v3822_v35  ;;  %3298 = vmatpush3.bf16.msra.mxu0 %v3606_v36  ;;  %v3609_v35 = vld [vmem:[%s4517_s0 + $0x470] sm:$0xff]  }
  0x95   :  { %3434 = vmatpush3.bf16.msra.mxu1 %v3605_v30  ;;  %1746 = vmatprep.mubr.bf16.mxu0 %v3845_v41  ;;  %v3612_v41 = vld [vmem:[%s4517_s0 + $0x478] sm:$0xff]   ;;  %v3677_v30 = vld [vmem:[%s4518_s1 + $0x14] ss:$28 sps:$4 sm:$0xff]  }
  0x96   :  { %3299 = vmatprep.subr.bf16.mxu0 %v3607_v37  ;;  %1795 = vmatprep.mubr.bf16.mxu1 %v3850_v42  ;;  %v3613_v42 = vld [vmem:[%s4517_s0 + $0x438] sm:$0xff]   ;;  %v3669_v36 = vld [vmem:[%s4517_s0 + $0x630] sm:$0xff]   ;;  %v2507_v37 = vld [vmem:[%s4519_s2] sm:$0xff] }
  0x97   :  { %3435 = vmatprep.subr.bf16.mxu1 %v3610_v38  ;;  %2513 = vperm.xlu0 %3450, %v2507_v37  }
  0x98   :  { %3300 = vmatpush3.bf16.msra.mxu0 %v3608_v39  ;;  %v3663_v39 = vld [vmem:[%s4517_s0 + $0x5d0] sm:$0xff]  }
  0x99   :  { %3436 = vmatpush3.bf16.msra.mxu1 %v3610_v38  ;;  %3301 = vmatprep.subr.bf16.mxu0 %v3609_v35  ;;  %v2509_v38 = vld [vmem:[%s4519_s2 + $0x10] sm:$0xff]  ;;  %v2510_v35 = vld [vmem:[%s4519_s2 + $0x18] sm:$0xff] }
  0x9a   :  { %3329 = vmatprep.subr.bf16.mxu1 %v3614_v40  ;;  %2523 = vperm.xlu1 %3451, %v2509_v38   ;;  %v2508_v40 = vld [vmem:[%s4519_s2 + $0x8] sm:$0xff] }
  0x9b   :  { %1747 = vmatmul.mubr.bf16.gmra.mrb[32].mxu0 %v3855_v43  ;;  %v3617_v43 = vld [vmem:[%s4517_s0 + $0x440] sm:$0xff]   ;;  %2518 = vperm.xlu0 %3450, %v2508_v40  }
  0x9c   :  { %1796 = vmatmul.mubr.bf16.gmra.mrb[32].mxu1 %v3861_v44  ;;  %3302 = vmatpush3.bf16.msra.mxu0 %v3611_v34  ;;  %v3616_v44 = vld [vmem:[%s4517_s0 + $0x4b0] sm:$0xff]   ;;  %v3664_v34 = vld [vmem:[%s4517_s0 + $0x618] sm:$0xff]  }
  0x9d   :  { %3437 = vmatprep.mubr.msk.bf16.mxu1 %vm501_vm0, %v3884_v50  ;;  %1836 = vmatprep.mubr.bf16.mxu0 %v3952_v5  ;;  %v3618_v50 = vld [vmem:[%s4517_s0 + $0x4f8] sm:$0xff]   ;;  %v3619_v5 = vld [vmem:[%s4517_s0 + $0x488] sm:$0xff]  }
  0x9e   :  { %3303 = vmatprep.subr.bf16.mxu0 %v3612_v41  ;;  %v3671_v41 = vld [vmem:[%s4517_s0 + $0x638] sm:$0xff]   ;;  %2528 = vperm.xlu1 %3451, %v2510_v35  }
  0xa0   :  { %3304 = vmatpush3.bf16.msra.mxu0 %v3613_v42  ;;  %v3678_v42 = vld [vmem:[%s4518_s1 + $0x8] ss:$28 sps:$4 sm:$0xff]  }
  0xa1   :  { %3305 = vmatprep.subr.bf16.mxu0 %v3615_v45  ;;  %v3665_v45 = vld [vmem:[%s4517_s0 + $0x5d8] sm:$0xff]  }
  0xa4   :  { %3438 = vmatmul.mubr.msk.bf16.vlgmr.msra.gmra.mrb[36].mxu1 %vm501_vm0, %v3897_v53  ;;  %3306 = vmatpush3.bf16.msra.mxu0 %v3617_v43  ;;  %v3622_v53 = vld [vmem:[%s4517_s0 + $0x500] sm:$0xff]  }
  0xa5   :  { %3330 = vmatpush3.bf16.msra.mxu1 %v3616_v44  ;;  %2339 = vmatprep.mubr.bf16.mxu1 %v3672_v48  ;;  %v3679_v44 = vld [vmem:[%s4518_s1 + $0x44] ss:$28 sps:$4 sm:$0xff]   ;;  %v3681_v48 = vld [vmem:[%s4518_s1 + $0x18] ss:$28 sps:$4 sm:$0xff]  }
  0xa6   :  { %3331 = vmatprep.subr.bf16.mxu1 %v3618_v50  ;;  %3307 = vmatprep.subr.bf16.mxu0 %v3619_v5  ;;  %v3666_v43 = vld [vmem:[%s4517_s0 + $0x620] sm:$0xff]   ;;  %v3668_v5 = vld [vmem:[%s4517_s0 + $0x628] sm:$0xff]  }
  0xa7   :  { %v3667_v50 = vld [vmem:[%s4517_s0 + $0x5e0] sm:$0xff]  }
  0xa8   :  { %3308 = vmatpush3.bf16.msra.mxu0 %v3621_v47  ;;  %v3670_v47 = vld [vmem:[%s4517_s0 + $0x5e8] sm:$0xff]  }
  0xa9   :  { %3332 = vmatpush3.bf16.msra.mxu1 %v3620_v46  ;;  %3309 = vmatprep.subr.bf16.mxu0 %v3623_v49  ;;  %v3680_v46 = vld [vmem:[%s4518_s1 + $0x40] ss:$28 sps:$4 sm:$0xff]   ;;  %v3683_v49 = vld [vmem:[%s4518_s1 + $0x50] ss:$28 sps:$4 sm:$0xff]  }
  0xaa   :  { %3333 = vmatprep.subr.bf16.mxu1 %v3622_v53  ;;  %v3682_v53 = vld [vmem:[%s4518_s1 + $0x10] ss:$28 sps:$4 sm:$0xff]  }
  0xac   :  { %3310 = vmatpush3.bf16.msra.mxu0 %v3625_v52  ;;  %v3685_v52 = vld [vmem:[%s4518_s1 + $0x48] ss:$28 sps:$4 sm:$0xff]  }
  0xad   :  { %3334 = vmatpush3.bf16.msra.mxu1 %v3624_v51  ;;  %3311 = vmatprep.subr.bf16.mxu0 %v3627_v55  ;;  %v3684_v51 = vld [vmem:[%s4518_s1 + $0x4c] ss:$28 sps:$4 sm:$0xff]  }
  0xae   :  { %3335 = vmatprep.subr.bf16.mxu1 %v3626_v54 }
  0xb0   :  { %3312 = vmatpush3.bf16.msra.mxu0 %v3629_v57 }
  0xb1   :  { %3336 = vmatpush3.bf16.msra.mxu1 %v3628_v56  ;;  %3357 = vmatprep.subr.bf16.mxu0 %v3632_v59 }
  0xb2   :  { %3337 = vmatprep.subr.bf16.mxu1 %v3630_v58 }
  0xb3   :  { %1837 = vmatmul.mubr.bf16.vlgmr.msra.gmra.mrb[36].mxu0 %v3947_v4  ;;  %v3639_v4 = vld [vmem:[%s4517_s0 + $0x4e0] sm:$0xff]  }
  0xb4   :  { %3358 = vmatpush3.bf16.msra.mxu0 %v3633_v61  ;;  %1844 = vmatprep.mubr.bf16.mxu0 %v3983_v14  ;;  %v3644_v14 = vld [vmem:[%s4517_s0 + $0x588] sm:$0xff]  }
  0xb5   :  { %3338 = vmatpush3.bf16.msra.mxu1 %v3631_v60  ;;  %3359 = vmatprep.subr.bf16.mxu0 %v3636_v63 }
  0xb6   :  { %3339 = vmatprep.subr.bf16.mxu1 %v3634_v62 }
  0xb8   :  { %3360 = vmatpush3.bf16.msra.mxu0 %v3637_v1 }
  0xb9   :  { %3340 = vmatpush3.bf16.msra.mxu1 %v3635_v0  ;;  %3361 = vmatprep.subr.bf16.mxu0 %v3640_v3 }
  0xba   :  { %3341 = vmatprep.subr.bf16.mxu1 %v3638_v2 }
  0xbb   :  { %1845 = vmatmul.mubr.bf16.gmra.mrb[40].mxu0 %v3991_v16  ;;  %v3673_v16 = vld [vmem:[%s4518_s1 + $0xc] ss:$28 sps:$4 sm:$0xff]  }
  0xbc   :  { %3362 = vmatpush3.bf16.msra.mxu0 %v3641_v6  ;;  %2388 = vmatprep.mubr.bf16.mxu0 %v3673_v16 }
  0xbd   :  { %3342 = vmatpush3.bf16.msra.mxu1 %v3639_v4  ;;  %3363 = vmatprep.subr.bf16.mxu0 %v3644_v14 }
  0xbe   :  { %3343 = vmatprep.subr.bf16.mxu1 %v3642_v7 }
  0xc0   :  { %3364 = vmatpush3.bf16.msra.mxu0 %v3645_v9 }
  0xc1   :  { %3344 = vmatpush3.bf16.msra.mxu1 %v3643_v8  ;;  %3365 = vmatprep.subr.bf16.mxu0 %v3647_v11 }
  0xc2   :  { %3385 = vmatprep.subr.bf16.mxu1 %v3646_v10 }
  0xc4   :  { %2340 = vmatmul.mubr.bf16.vlgmr.msra.gmra.mrb[40].mxu1 %v3674_v33  ;;  %3366 = vmatpush3.bf16.msra.mxu0 %v3649_v13 }
  0xc5   :  { %3386 = vmatpush3.bf16.msra.mxu1 %v3648_v32  ;;  %2347 = vmatprep.mubr.bf16.mxu1 %v3675_v20 }
  0xc6   :  { %3387 = vmatprep.subr.bf16.mxu1 %v3650_v15  ;;  %3367 = vmatprep.subr.bf16.mxu0 %v3651_v17 }
  0xc8   :  { %3368 = vmatpush3.bf16.msra.mxu0 %v3653_v19 }
  0xc9   :  { %3388 = vmatpush3.bf16.msra.mxu1 %v3652_v18  ;;  %3369 = vmatprep.subr.bf16.mxu0 %v3655_v22 }
  0xca   :  { %3389 = vmatprep.subr.bf16.mxu1 %v3654_v21 }
  0xcc   :  { %2348 = vmatmul.mubr.bf16.gmra.mrb[44].mxu1 %v3676_v28  ;;  %3370 = vmatpush3.bf16.msra.mxu0 %v3657_v24 }
  0xcd   :  { %3390 = vmatpush3.bf16.msra.mxu1 %v3656_v23  ;;  %2437 = vmatprep.mubr.bf16.mxu1 %v3677_v30 }
  0xce   :  { %3391 = vmatprep.subr.bf16.mxu1 %v3658_v25  ;;  %3371 = vmatprep.subr.bf16.mxu0 %v3659_v26 }
  0xd0   :  { %3372 = vmatpush3.bf16.msra.mxu0 %v3661_v29 }
  0xd1   :  { %3392 = vmatpush3.bf16.msra.mxu1 %v3660_v27  ;;  %3441 = vmatprep.subr.bf16.mxu0 %v3669_v36 }
  0xd2   :  { %3393 = vmatprep.subr.bf16.mxu1 %v3662_v31 }
  0xd3   :  { %2389 = vmatmul.mubr.bf16.vlgmr.msra.gmra.mrb[44].mxu0 %v3678_v42 }
  0xd4   :  { %2396 = vmatprep.mubr.bf16.mxu0 %v3679_v44  ;;  %3442 = vmatpush3.bf16.msra.mxu0 %v3669_v36 }
  0xd5   :  { %3394 = vmatpush3.bf16.msra.mxu1 %v3663_v39  ;;  %3443 = vmatprep.subr.bf16.mxu0 %v3671_v41 }
  0xd6   :  { %3395 = vmatprep.subr.bf16.mxu1 %v3664_v34 }
  0xd8   :  { %3444 = vmatpush3.bf16.msra.mxu0 %v3671_v41 }
  0xd9   :  { %3396 = vmatpush3.bf16.msra.mxu1 %v3665_v45 }
  0xda   :  { %3397 = vmatprep.subr.bf16.mxu1 %v3666_v43 }
  0xdb   :  { %2397 = vmatmul.mubr.bf16.gmra.mrb[48].mxu0 %v3680_v46 }
  0xdc   :  { %3445 = vmatprep.mubr.msk.bf16.mxu0 %vm501_vm0, %v3681_v48 }
  0xdd   :  { %3398 = vmatpush3.bf16.msra.mxu1 %v3667_v50 }
  0xde   :  { %3399 = vmatprep.subr.bf16.mxu1 %v3668_v5 }
  0xe1   :  { %3400 = vmatpush3.bf16.msra.mxu1 %v3670_v47 }
  0xe3   :  { %3446 = vmatmul.mubr.msk.bf16.vlgmr.msra.gmra.mrb[52].mxu0 %vm501_vm0, %v3683_v49 }
  0xe4   :  { %2438 = vmatmul.mubr.bf16.vlgmr.msra.gmra.mrb[48].mxu1 %v3682_v53 }
  0xe5   :  { %2445 = vmatprep.mubr.bf16.mxu1 %v3684_v51 }
  0xec   :  { %2446 = vmatmul.mubr.bf16.gmra.mrb[52].mxu1 %v3685_v52 }
  0xf6   :  { %v3081_v54 = vpop.f32.mrb[0].mxu0 }
  0xf7   :  { %v3109_v55 = vpop.f32.mrb[0].mxu1  ;;  %v3082_v56 = vpop.f32.mrb[1].mxu0 }
  0xf8   :  { %v3110_v57 = vpop.f32.mrb[1].mxu1  ;;  %v3083_v58 = vadd.f32 %v3082_v56, %v3081_v54  ;;  %v3084_v60 = vpop.f32.mrb[2].mxu0 }
  0xf9   :  { %v3111_v59 = vadd.f32 %v3110_v57, %v3109_v55  ;;  %v3112_v61 = vpop.f32.mrb[2].mxu1  ;;  %v3085_v62 = vpop.f32.mrb[3].mxu0 }
  0xfa   :  { %v3113_v63 = vpop.f32.mrb[3].mxu1  ;;  %v3086_v1 = vadd.f32 %v3085_v62, %v3084_v60 }
  0xfb   :  { %v592_v0 = vadd.f32 %v3111_v59, %v3083_v58  ;;  %v3114_v2 = vadd.f32 %v3113_v63, %v3112_v61 }
  0xfd   :  { %v595_v3 = vadd.f32 %v3114_v2, %v3086_v1 }
  0xfe   :  { %v3087_v4 = vpop.f32.mrb[4].mxu0 }
  0xff   :  { %v3115_v6 = vpop.f32.mrb[4].mxu1  ;;  %v3088_v7 = vpop.f32.mrb[5].mxu0 }
 0x100   :  { %v3116_v14 = vpop.f32.mrb[5].mxu1  ;;  %v3089_v8 = vadd.f32 %v3088_v7, %v3087_v4  ;;  %v3090_v10 = vpop.f32.mrb[6].mxu0 }
 0x101   :  { %v3117_v9 = vadd.f32 %v3116_v14, %v3115_v6  ;;  %v3118_v11 = vpop.f32.mrb[6].mxu1  ;;  %v3091_v16 = vpop.f32.mrb[7].mxu0 }
 0x102   :  { %v3119_v32 = vpop.f32.mrb[7].mxu1  ;;  %v3092_v13 = vadd.f32 %v3091_v16, %v3090_v10 }
 0x103   :  { %v600_v12 = vadd.f32 %v3117_v9, %v3089_v8  ;;  %v3120_v15 = vadd.f32 %v3119_v32, %v3118_v11 }
 0x105   :  { %v603_v17 = vadd.f32 %v3120_v15, %v3092_v13 }
 0x107   :  { %v3423_v33 = vpop.f32.mrb[8].mxu1 }
 0x108   :  { %v689_v18 = vpop.f32.mrb[9].mxu1 }
 0x109   :  { %v3424_v19 = vpop.f32.mrb[10].mxu1 }
 0x10a   :  { %v692_v20 = vpop.f32.mrb[11].mxu1 }
 0x116   :  { %v3137_v21 = vpop.f32.mrb[8].mxu0 }
 0x117   :  { %v3138_v22 = vpop.f32.mrb[9].mxu0 }
 0x118   :  { %v3139_v23 = vadd.f32 %v3138_v22, %v3137_v21  ;;  %v3140_v24 = vpop.f32.mrb[10].mxu0 }
 0x119   :  { %v3141_v25 = vpop.f32.mrb[11].mxu0 }
 0x11a   :  { %v641_v26 = vadd.f32 %v3139_v23, %v592_v0  ;;  %v3142_v27 = vadd.f32 %v3141_v25, %v3140_v24 }
 0x11c   :  { %v644_v28 = vadd.f32 %v3142_v27, %v595_v3  ;;  %v4481_v29 = vadd.f32 %v689_v18, %v641_v26 }
 0x11e   :  { %v3143_v30 = vpop.f32.mrb[12].mxu0  ;;  %v4483_v31 = vadd.f32 %v692_v20, %v644_v28 }
 0x11f   :  { %v3144_v36 = vpop.f32.mrb[13].mxu0 }
 0x120   :  { %v3145_v37 = vadd.f32 %v3144_v36, %v3143_v30  ;;  %v3146_v38 = vpop.f32.mrb[14].mxu0 }
 0x121   :  { %v3147_v39 = vpop.f32.mrb[15].mxu0 }
 0x122   :  { %v649_v40 = vadd.f32 %v3145_v37, %v600_v12  ;;  %v3148_v35 = vadd.f32 %v3147_v39, %v3146_v38 }
 0x124   :  { %v4485_v34 = vadd.f32 %v3423_v33, %v649_v40  ;;  %v652_v41 = vadd.f32 %v3148_v35, %v603_v17 }
 0x126   :  { %v4487_v42 = vadd.f32 %v3424_v19, %v652_v41 }
 0x127   :  { %v3169_v45 = vpop.f32.mrb[12].mxu1 }
 0x128   :  { %v3170_v44 = vpop.f32.mrb[13].mxu1 }
 0x129   :  { %v3171_v43 = vadd.f32 %v3170_v44, %v3169_v45  ;;  %v3172_v50 = vpop.f32.mrb[14].mxu1 }
 0x12a   :  { %v3173_v5 = vpop.f32.mrb[15].mxu1 }
 0x12b   :  { %v3174_v46 = vadd.f32 %v3173_v5, %v3172_v50 }
 0x12f   :  { %v3175_v47 = vpop.f32.mrb[16].mxu1 }
 0x130   :  { %v3176_v48 = vpop.f32.mrb[17].mxu1 }
 0x131   :  { %v3177_v53 = vadd.f32 %v3176_v48, %v3175_v47  ;;  %v3178_v49 = vpop.f32.mrb[18].mxu1 }
 0x132   :  { %v3179_v51 = vpop.f32.mrb[19].mxu1 }
 0x133   :  { %v3180_v52 = vadd.f32 %v3179_v51, %v3178_v49 }
 0x136   :  { %v3197_v54 = vpop.f32.mrb[16].mxu0 }
 0x137   :  { %v3198_v55 = vpop.f32.mrb[17].mxu0 }
 0x138   :  { %v3199_v56 = vadd.f32 %v3198_v55, %v3197_v54  ;;  %v3200_v57 = vpop.f32.mrb[18].mxu0 }
 0x139   :  { %v3201_v58 = vpop.f32.mrb[19].mxu0 }
 0x13a   :  { %v1189_v59 = vadd.f32 %v3199_v56, %v3171_v43  ;;  %v3202_v60 = vadd.f32 %v3201_v58, %v3200_v57 }
 0x13c   :  { %v1192_v61 = vadd.f32 %v3202_v60, %v3174_v46 }
 0x13e   :  { %v3203_v62 = vpop.f32.mrb[20].mxu0 }
 0x13f   :  { %v3204_v63 = vpop.f32.mrb[21].mxu0 }
 0x140   :  { %v3205_v0 = vadd.f32 %v3204_v63, %v3203_v62  ;;  %v3206_v1 = vpop.f32.mrb[22].mxu0 }
 0x141   :  { %v3207_v2 = vpop.f32.mrb[23].mxu0 }
 0x142   :  { %v1197_v3 = vadd.f32 %v3205_v0, %v3177_v53  ;;  %v3208_v4 = vadd.f32 %v3207_v2, %v3206_v1 }
 0x144   :  { %v1200_v6 = vadd.f32 %v3208_v4, %v3180_v52 }
 0x146   :  { %v3431_v8 = vpop.f32.mrb[24].mxu0 }
 0x147   :  { %v3225_v7 = vpop.f32.mrb[20].mxu1  ;;  %v1286_v11 = vpop.f32.mrb[25].mxu0 }
 0x148   :  { %v3226_v14 = vpop.f32.mrb[21].mxu1  ;;  %v3432_v32 = vpop.f32.mrb[26].mxu0 }
 0x149   :  { %v3227_v9 = vadd.f32 %v3226_v14, %v3225_v7  ;;  %v3228_v10 = vpop.f32.mrb[22].mxu1  ;;  %v1289_v15 = vpop.f32.mrb[27].mxu0 }
 0x14a   :  { %v3229_v16 = vpop.f32.mrb[23].mxu1 }
 0x14b   :  { %v3230_v12 = vadd.f32 %v3229_v16, %v3228_v10  ;;  %v1238_v13 = vadd.f32 %v3227_v9, %v1189_v59 }
 0x14d   :  { %v1287_v17 = vadd.f32 %v1286_v11, %v1238_v13  ;;  %v1241_v33 = vadd.f32 %v3230_v12, %v1192_v61 }
 0x14f   :  { %v1301_v18 = vmax.f32 %v4481_v29, %v1287_v17  ;;  %v1290_v19 = vadd.f32 %v1289_v15, %v1241_v33  ;;  %v3231_v20 = vpop.f32.mrb[24].mxu1 }
 0x150   :  { %v3232_v21 = vpop.f32.mrb[25].mxu1 }
 0x151   :  { %v1302_v22 = vmax.f32 %v4483_v31, %v1290_v19  ;;  %v3233_v23 = vadd.f32 %v3232_v21, %v3231_v20  ;;  %v3234_v24 = vpop.f32.mrb[26].mxu1 }
 0x152   :  { %v3235_v25 = vpop.f32.mrb[27].mxu1 }
 0x153   :  { %v1246_v26 = vadd.f32 %v3233_v23, %v1197_v3  ;;  %v3236_v27 = vadd.f32 %v3235_v25, %v3234_v24 }
 0x155   :  { %v1295_v28 = vadd.f32 %v3431_v8, %v1246_v26  ;;  %v1249_v30 = vadd.f32 %v3236_v27, %v1200_v6 }
 0x157   :  { %v4491_v36 = vadd.f32 %v3432_v32, %v1249_v30  ;;  %v1303_v37 = vmax.f32 %v4485_v34, %v1295_v28 }
 0x159   :  { %v1304_v38 = vmax.f32 %v4487_v42, %v4491_v36 }
 0x166   :  { %v3257_v39 = vpop.f32.mrb[28].mxu0 }
 0x167   :  { %v3285_v29 = vpop.f32.mrb[28].mxu1  ;;  %v3258_v35 = vpop.f32.mrb[29].mxu0 }
 0x168   :  { %v3286_v40 = vpop.f32.mrb[29].mxu1  ;;  %v3259_v45 = vadd.f32 %v3258_v35, %v3257_v39  ;;  %v3260_v44 = vpop.f32.mrb[30].mxu0 }
 0x169   :  { %v3287_v41 = vadd.f32 %v3286_v40, %v3285_v29  ;;  %v3288_v31 = vpop.f32.mrb[30].mxu1  ;;  %v3261_v50 = vpop.f32.mrb[31].mxu0 }
 0x16a   :  { %v3289_v43 = vpop.f32.mrb[31].mxu1  ;;  %v3262_v47 = vadd.f32 %v3261_v50, %v3260_v44 }
 0x16b   :  { %v3290_v5 = vadd.f32 %v3289_v43, %v3288_v31  ;;  %v1790_v46 = vadd.f32 %v3287_v41, %v3259_v45 }
 0x16d   :  { %v1793_v48 = vadd.f32 %v3290_v5, %v3262_v47 }
 0x16e   :  { %v3263_v49 = vpop.f32.mrb[32].mxu0 }
 0x16f   :  { %v3291_v53 = vpop.f32.mrb[32].mxu1  ;;  %v3264_v51 = vpop.f32.mrb[33].mxu0 }
 0x170   :  { %v3292_v34 = vpop.f32.mrb[33].mxu1  ;;  %v3265_v54 = vadd.f32 %v3264_v51, %v3263_v49  ;;  %v3266_v55 = vpop.f32.mrb[34].mxu0 }
 0x171   :  { %v3293_v52 = vadd.f32 %v3292_v34, %v3291_v53  ;;  %v3294_v42 = vpop.f32.mrb[34].mxu1  ;;  %v3267_v57 = vpop.f32.mrb[35].mxu0 }
 0x172   :  { %v3295_v56 = vpop.f32.mrb[35].mxu1  ;;  %v3268_v60 = vadd.f32 %v3267_v57, %v3266_v55  ;;  %v2514_v55 = vpop.permute.xlu0 %2513 }
 0x173   :  { %v3296_v58 = vadd.f32 %v3295_v56, %v3294_v42  ;;  %v1798_v59 = vadd.f32 %v3293_v52, %v3265_v54 }
 0x175   :  { %v1801_v61 = vadd.f32 %v3296_v58, %v3268_v60 }
 0x177   :  { %v3439_v62 = vpop.f32.mrb[36].mxu1 }
 0x178   :  { %v1887_v63 = vpop.f32.mrb[37].mxu1 }
 0x179   :  { %v3440_v0 = vpop.f32.mrb[38].mxu1 }
 0x17a   :  { %v1890_v1 = vpop.f32.mrb[39].mxu1 }
 0x186   :  { %v3313_v2 = vpop.f32.mrb[36].mxu0 }
 0x187   :  { %v3314_v3 = vpop.f32.mrb[37].mxu0 }
 0x188   :  { %v3315_v4 = vadd.f32 %v3314_v3, %v3313_v2  ;;  %v3316_v6 = vpop.f32.mrb[38].mxu0 }
 0x189   :  { %v3317_v7 = vpop.f32.mrb[39].mxu0 }
 0x18a   :  { %v1839_v14 = vadd.f32 %v3315_v4, %v1790_v46  ;;  %v3318_v8 = vadd.f32 %v3317_v7, %v3316_v6 }
 0x18c   :  { %v1888_v9 = vadd.f32 %v1887_v63, %v1839_v14  ;;  %v1842_v10 = vadd.f32 %v3318_v8, %v1793_v48  ;;  %v2519_v8 = vpop.permute.xlu0 %2518 }
 0x18e   :  { %v1891_v11 = vadd.f32 %v1890_v1, %v1842_v10  ;;  %v3319_v16 = vpop.f32.mrb[40].mxu0  ;;  %v1902_v32 = vmax.f32 %v1301_v18, %v1888_v9 }
 0x18f   :  { %v3320_v12 = vpop.f32.mrb[41].mxu0 }
 0x190   :  { %v3321_v13 = vadd.f32 %v3320_v12, %v3319_v16  ;;  %v3322_v15 = vpop.f32.mrb[42].mxu0  ;;  %v4496_v17 = vmax.f32 %v1302_v22, %v1891_v11 }
 0x191   :  { %v3323_v33 = vpop.f32.mrb[43].mxu0 }
 0x192   :  { %v1847_v19 = vadd.f32 %v3321_v13, %v1798_v59  ;;  %v3324_v20 = vadd.f32 %v3323_v33, %v3322_v15 }
 0x194   :  { %v1896_v21 = vadd.f32 %v3439_v62, %v1847_v19  ;;  %v1850_v23 = vadd.f32 %v3324_v20, %v1801_v61  ;;  %v2524_v19 = vpop.permute.xlu1 %2523 }
 0x196   :  { %v1899_v25 = vadd.f32 %v3440_v0, %v1850_v23  ;;  %v4498_v27 = vmax.f32 %v1303_v37, %v1896_v21 }
 0x197   :  { %v3345_v24 = vpop.f32.mrb[40].mxu1 }
 0x198   :  { %v3346_v26 = vpop.f32.mrb[41].mxu1  ;;  %v4500_v29 = vmax.f32 %v1304_v38, %v1899_v25  ;;  %v2529_v25 = vpop.permute.xlu1 %2528 }
 0x199   :  { %v3347_v28 = vadd.f32 %v3346_v26, %v3345_v24  ;;  %v3348_v30 = vpop.f32.mrb[42].mxu1 }
 0x19a   :  { %v3349_v36 = vpop.f32.mrb[43].mxu1 }
 0x19b   :  { %v3350_v18 = vadd.f32 %v3349_v36, %v3348_v30 }
 0x19f   :  { %v3351_v39 = vpop.f32.mrb[44].mxu1 }
 0x1a0   :  { %v3352_v40 = vpop.f32.mrb[45].mxu1 }
 0x1a1   :  { %v3353_v22 = vadd.f32 %v3352_v40, %v3351_v39  ;;  %v3354_v35 = vpop.f32.mrb[46].mxu1 }
 0x1a2   :  { %v3355_v41 = vpop.f32.mrb[47].mxu1 }
 0x1a3   :  { %v3356_v31 = vadd.f32 %v3355_v41, %v3354_v35 }
 0x1a6   :  { %v3373_v45 = vpop.f32.mrb[44].mxu0 }
 0x1a7   :  { %v3374_v44 = vpop.f32.mrb[45].mxu0 }
 0x1a8   :  { %v3375_v43 = vadd.f32 %v3374_v44, %v3373_v45  ;;  %v3376_v50 = vpop.f32.mrb[46].mxu0 }
 0x1a9   :  { %v3377_v5 = vpop.f32.mrb[47].mxu0 }
 0x1aa   :  { %v2391_v46 = vadd.f32 %v3375_v43, %v3347_v28  ;;  %v3378_v37 = vadd.f32 %v3377_v5, %v3376_v50 }
 0x1ac   :  { %v2394_v47 = vadd.f32 %v3378_v37, %v3350_v18 }
 0x1ae   :  { %v3379_v48 = vpop.f32.mrb[48].mxu0 }
 0x1af   :  { %v3380_v53 = vpop.f32.mrb[49].mxu0 }
 0x1b0   :  { %v3381_v49 = vadd.f32 %v3380_v53, %v3379_v48  ;;  %v3382_v38 = vpop.f32.mrb[50].mxu0 }
 0x1b1   :  { %v3383_v34 = vpop.f32.mrb[51].mxu0 }
 0x1b2   :  { %v2399_v51 = vadd.f32 %v3381_v49, %v3353_v22  ;;  %v3384_v52 = vadd.f32 %v3383_v34, %v3382_v38 }
 0x1b4   :  { %v2402_v42 = vadd.f32 %v3384_v52, %v3356_v31 }
 0x1b6   :  { %v3447_v57 = vpop.f32.mrb[52].mxu0 }
 0x1b7   :  { %v3401_v54 = vpop.f32.mrb[48].mxu1  ;;  %v2488_v60 = vpop.f32.mrb[53].mxu0 }
 0x1b8   :  { %v3402_v56 = vpop.f32.mrb[49].mxu1  ;;  %v3448_v62 = vpop.f32.mrb[54].mxu0 }
 0x1b9   :  { %v3403_v58 = vadd.f32 %v3402_v56, %v3401_v54  ;;  %v3404_v59 = vpop.f32.mrb[50].mxu1  ;;  %v2491_v1 = vpop.f32.mrb[55].mxu0 }
 0x1ba   :  { %v3405_v61 = vpop.f32.mrb[51].mxu1 }
 0x1bb   :  { %v3406_v63 = vadd.f32 %v3405_v61, %v3404_v59  ;;  %v2440_v0 = vadd.f32 %v3403_v58, %v2391_v46 }
 0x1bd   :  { %v2489_v2 = vadd.f32 %v2488_v60, %v2440_v0  ;;  %v2443_v3 = vadd.f32 %v3406_v63, %v2394_v47 }
 0x1bf   :  { %v2503_v4 = vmax.f32 %v1902_v32, %v2489_v2  ;;  %v2492_v6 = vadd.f32 %v2491_v1, %v2443_v3  ;;  %v3407_v7 = vpop.f32.mrb[52].mxu1 }
 0x1c0   :  { %v3408_v14 = vpop.f32.mrb[53].mxu1 }
 0x1c1   :  { %v2531_v9 = vadd.f32 %v2514_v55, %v2503_v4  ;;  %v3409_v10 = vadd.f32 %v3408_v14, %v3407_v7  ;;  %v3410_v11 = vpop.f32.mrb[54].mxu1  ;;  %v2504_v16 = vmax.f32 %v4496_v17, %v2492_v6 }
 0x1c2   :  { %v3411_v12 = vpop.f32.mrb[55].mxu1 }
 0x1c3   :  { %2535 = vst [vmem:[%s4520_s3] sm:$0xff] %v2531_v9  ;;  %v2448_v13 = vadd.f32 %v3409_v10, %v2399_v51  ;;  %v2532_v15 = vadd.f32 %v2519_v8, %v2504_v16  ;;  %v3412_v33 = vadd.f32 %v3411_v12, %v3410_v11 }
 0x1c5   :  { %2536 = vst [vmem:[%s4520_s3 + $0x8] sm:$0xff] %v2532_v15  ;;  %v2451_v32 = vadd.f32 %v3412_v33, %v2402_v42  ;;  %v2497_v20 = vadd.f32 %v3447_v57, %v2448_v13 }
 0x1c7   :  { %v2505_v21 = vmax.f32 %v4498_v27, %v2497_v20  ;;  %v2500_v23 = vadd.f32 %v3448_v62, %v2451_v32 }
 0x1c9   :  { %v2533_v24 = vadd.f32 %v2524_v19, %v2505_v21  ;;  %v2506_v17 = vmax.f32 %v4500_v29, %v2500_v23 }
 0x1cb   :  { %2537 = vst [vmem:[%s4520_s3 + $0x10] sm:$0xff] %v2533_v24  ;;  %v2534_v26 = vadd.f32 %v2529_v25, %v2506_v17 }
 0x1cd   :  { %2538 = vst [vmem:[%s4520_s3 + $0x18] sm:$0xff] %v2534_v26 }

// kernel: convolutional_forward.6
= control target key start
LH: loop header
LB: loop body
LE: loop exit
PB: predicated region body
PF: predicated region fallthrough
CT: control target
= control target key end

     0   :  { %vm18_vm0 = vcmask 801792   ;;  %v183_v8 = vmov 0   ;;  %s269_s0 = inlined_call_operand.vmem [shape: f32[32,98], index: 0, kind: input, shape index: {}]   ;;  %s270_s1 = inlined_call_operand.vmem [shape: f32[32,1], index: 1, kind: input, shape index: {}]   ;;  %s271_s2 = inlined_call_operand.vmem [shape: f32[32,1], index: 2, kind: input, shape index: {}]   ;;  %s272_s3 = inlined_call_operand.vmem [shape: f32[32,98], index: 3, kind: output, shape index: {}]  }
   0x1   :  { %v14_v0 = vld [vmem:[%s269_s0] sm:$0xff]  ;;  %v16_v1 = vld [vmem:[%s269_s0 + $0x10] sm:$0xff]  ;;  %v15_v2 = vld [vmem:[%s269_s0 + $0x8] sm:$0xff]  ;;  %158 = vset.pattern.permute.xlu1 %v183_v8  ;;  %157 = vset.pattern.permute.xlu0 %v183_v8 }
   0x2   :  { %v19_v3 = vsel %vm18_vm0, %v14_v0, 0.0  ;;  %v25_v4 = vsel %vm18_vm0, %v16_v1, 0.0  ;;  %v17_v5 = vld [vmem:[%s269_s0 + $0x18] sm:$0xff]  ;;  %v22_v6 = vsel %vm18_vm0, %v15_v2, 0.0  ;;  %v73_v24 = vld [vmem:[%s270_s1 + $0x8] sm:$0xff]  ;;  %v74_v25 = vld [vmem:[%s270_s1 + $0x10] sm:$0xff] }
   0x3   :  { %20 = vadd.xlane.f32.xlu0 %v19_v3  ;;  %26 = vadd.xlane.f32.xlu1 %v25_v4  ;;  %v28_v7 = vsel %vm18_vm0, %v17_v5, 0.0  ;;  %v72_v26 = vld [vmem:[%s270_s1] sm:$0xff]  ;;  %v75_v27 = vld [vmem:[%s270_s1 + $0x18] sm:$0xff]  ;;  %v101_v29 = vld [vmem:[%s271_s2 + $0x8] sm:$0xff] }
   0x4   :  { %v100_v28 = vld [vmem:[%s271_s2] sm:$0xff]  ;;  %v102_v30 = vld [vmem:[%s271_s2 + $0x10] sm:$0xff]  ;;  %v103_v36 = vld [vmem:[%s271_s2 + $0x18] sm:$0xff] }
   0x7   :  { %23 = vadd.xlane.f32.xlu0 %v22_v6  ;;  %29 = vadd.xlane.f32.xlu1 %v28_v7 }
  0x90   :  { %v21_v9 = vpop.xlane.xlu0 %20  ;;  %v27_v10 = vpop.xlane.xlu1 %26 }
  0x91   :  { %v32_v11 = vmul.f32 0.010204081, %v21_v9  ;;  %v34_v12 = vmul.f32 0.010204081, %v27_v10 }
  0x93   :  { %v36_v13 = vsub.f32 %v14_v0, %v32_v11  ;;  %v38_v14 = vsub.f32 %v16_v1, %v34_v12 }
  0x94   :  { %v24_v15 = vpop.xlane.xlu0 %23  ;;  %v30_v31 = vpop.xlane.xlu1 %29 }
  0x95   :  { %v33_v16 = vmul.f32 0.010204081, %v24_v15  ;;  %v40_v17 = vmul.f32 %v36_v13, %v36_v13  ;;  %v42_v18 = vmul.f32 %v38_v14, %v38_v14  ;;  %v35_v32 = vmul.f32 0.010204081, %v30_v31 }
  0x97   :  { %v37_v19 = vsub.f32 %v15_v2, %v33_v16  ;;  %v44_v20 = vsel %vm18_vm0, %v40_v17, 0.0  ;;  %v50_v21 = vsel %vm18_vm0, %v42_v18, 0.0  ;;  %v244_v33 = vsub.f32 %v17_v5, %v35_v32 }
  0x98   :  { %45 = vadd.xlane.f32.xlu0 %v44_v20 }
  0x99   :  { %v41_v22 = vmul.f32 %v37_v19, %v37_v19  ;;  %v43_v34 = vmul.f32 %v244_v33, %v244_v33 }
  0x9b   :  { %v47_v23 = vsel %vm18_vm0, %v41_v22, 0.0  ;;  %v53_v35 = vsel %vm18_vm0, %v43_v34, 0.0 }
  0x9c   :  { %51 = vadd.xlane.f32.xlu0 %v50_v21  ;;  %48 = vadd.xlane.f32.xlu1 %v47_v23 }
  0xad   :  { %83 = vperm.xlu1 %158, %v73_v24  }
  0xb1   :  { %88 = vperm.xlu1 %158, %v74_v25  }
  0xb2   :  { %78 = vperm.xlu0 %157, %v72_v26  }
  0xb5   :  { %93 = vperm.xlu1 %158, %v75_v27  }
  0xb9   :  { %106 = vperm.xlu1 %158, %v100_v28  }
  0xbd   :  { %111 = vperm.xlu1 %158, %v101_v29  }
  0xc1   :  { %116 = vperm.xlu1 %158, %v102_v30  }
  0xe5   :  { %54 = vadd.xlane.f32.xlu1 %v53_v35 }
  0xf6   :  { %121 = vperm.xlu1 %158, %v103_v36  }
 0x125   :  { %v46_v37 = vpop.xlane.xlu0 %45 }
 0x126   :  { %v56_v38 = vmul.f32 0.010204081, %v46_v37 }
 0x128   :  { %v60_v39 = vadd.f32 1e-05, %v56_v38 }
 0x129   :  { %v49_v40 = vpop.xlane.xlu1 %48  ;;  %v52_v41 = vpop.xlane.xlu0 %51 }
 0x12a   :  { %159 = vrsqrt.f32 %v60_v39  ;;  %v57_v42 = vmul.f32 0.010204081, %v49_v40  ;;  %v58_v43 = vmul.f32 0.010204081, %v52_v41 }
 0x12c   :  { %v61_v44 = vadd.f32 1e-05, %v57_v42  ;;  %v62_v45 = vadd.f32 1e-05, %v58_v43 }
 0x12d   :  { %v84_v46 = vpop.permute.xlu1 %83 }
 0x12e   :  { %161 = vrsqrt.f32 %v61_v44 }
 0x12f   :  { %163 = vrsqrt.f32 %v62_v45 }
 0x131   :  { %v89_v47 = vpop.permute.xlu1 %88  ;;  %v79_v49 = vpop.permute.xlu0 %78 }
 0x134   :  { %v160_v48 = vpop.eup %159 }
 0x135   :  { %v94_v50 = vpop.permute.xlu1 %93  ;;  %v68_v51 = vmul.f32 %v160_v48, %v36_v13 }
 0x137   :  { %v96_v52 = vmul.f32 %v79_v49, %v68_v51 }
 0x138   :  { %v162_v53 = vpop.eup %161 }
 0x139   :  { %v164_v54 = vpop.eup %163  ;;  %v69_v55 = vmul.f32 %v162_v53, %v37_v19  ;;  %v107_v56 = vpop.permute.xlu1 %106 }
 0x13a   :  { %v124_v57 = vadd.f32 %v107_v56, %v96_v52  ;;  %v70_v59 = vmul.f32 %v164_v54, %v38_v14 }
 0x13b   :  { %v97_v58 = vmul.f32 %v84_v46, %v69_v55 }
 0x13c   :  { %v128_v60 = vsub.f32 0.0, %v124_v57  ;;  %v98_v0 = vmul.f32 %v89_v47, %v70_v59 }
 0x13d   :  { %v112_v61 = vpop.permute.xlu1 %111 }
 0x13e   :  { %v132_v62 = vmul.f32 1.442695, %v128_v60  ;;  %v125_v63 = vadd.f32 %v112_v61, %v97_v58 }
 0x140   :  { %165 = vpow2.f32 %v132_v62  ;;  %v129_v1 = vsub.f32 0.0, %v125_v63 }
 0x141   :  { %v117_v2 = vpop.permute.xlu1 %116 }
 0x142   :  { %v134_v3 = vmul.f32 1.442695, %v129_v1  ;;  %v126_v4 = vadd.f32 %v117_v2, %v98_v0 }
 0x144   :  { %167 = vpow2.f32 %v134_v3  ;;  %v130_v5 = vsub.f32 0.0, %v126_v4 }
 0x146   :  { %v136_v6 = vmul.f32 1.442695, %v130_v5 }
 0x148   :  { %169 = vpow2.f32 %v136_v6 }
 0x14a   :  { %v166_v7 = vpop.eup %165 }
 0x14b   :  { %v140_v8 = vadd.f32 1.0, %v166_v7 }
 0x14d   :  { %171 = vrcp.f32 %v140_v8 }
 0x14e   :  { %v168_v9 = vpop.eup %167 }
 0x14f   :  { %v141_v10 = vadd.f32 1.0, %v168_v9 }
 0x151   :  { %173 = vrcp.f32 %v141_v10 }
 0x152   :  { %v170_v11 = vpop.eup %169 }
 0x153   :  { %v142_v12 = vadd.f32 1.0, %v170_v11 }
 0x155   :  { %175 = vrcp.f32 %v142_v12 }
 0x157   :  { %v172_v13 = vpop.eup %171 }
 0x158   :  { %148 = vst.msk [vmem:[%s272_s3] sm:$0xff] %vm18_vm0, %v172_v13 }
 0x15b   :  { %v174_v14 = vpop.eup %173 }
 0x15c   :  { %149 = vst.msk [vmem:[%s272_s3 + $0x8] sm:$0xff] %vm18_vm0, %v174_v14 }
 0x15f   :  { %v176_v15 = vpop.eup %175 }
 0x160   :  { %150 = vst.msk [vmem:[%s272_s3 + $0x10] sm:$0xff] %vm18_vm0, %v176_v15 }
 0x172   :  { %v55_v16 = vpop.xlane.xlu1 %54 }
 0x173   :  { %v59_v17 = vmul.f32 0.010204081, %v55_v16 }
 0x175   :  { %v63_v18 = vadd.f32 1e-05, %v59_v17 }
 0x176   :  { %v122_v22 = vpop.permute.xlu1 %121 }
 0x177   :  { %177 = vrsqrt.f32 %v63_v18 }
 0x181   :  { %v178_v19 = vpop.eup %177 }
 0x182   :  { %v71_v20 = vmul.f32 %v178_v19, %v244_v33 }
 0x184   :  { %v99_v21 = vmul.f32 %v94_v50, %v71_v20 }
 0x186   :  { %v127_v23 = vadd.f32 %v122_v22, %v99_v21 }
 0x188   :  { %v131_v24 = vsub.f32 0.0, %v127_v23 }
 0x18a   :  { %v138_v25 = vmul.f32 1.442695, %v131_v24 }
 0x18c   :  { %179 = vpow2.f32 %v138_v25 }
 0x196   :  { %v180_v26 = vpop.eup %179 }
 0x197   :  { %v143_v27 = vadd.f32 1.0, %v180_v26 }
 0x199   :  { %181 = vrcp.f32 %v143_v27 }
 0x1a3   :  { %v182_v28 = vpop.eup %181 }
 0x1a4   :  { %151 = vst.msk [vmem:[%s272_s3 + $0x18] sm:$0xff] %vm18_vm0, %v182_v28 }

// kernel: convolutional_forward.7
= control target key start
LH: loop header
LB: loop body
LE: loop exit
PB: predicated region body
PF: predicated region fallthrough
CT: control target
= control target key end

     0   :  { %v2449_v13 = vmov 0   ;;  %vm1169_vm0 = vcmask 261120   ;;  %vm1691_vm1 = vcmask 523264   ;;  %vm1775_vm2 = vcmask 9216   ;;  %s2989_s0 = inlined_call_operand.vmem [shape: bf16[1568,2], index: 0, kind: input, shape index: {}]   ;;  %s2990_s1 = inlined_call_operand.vmem [shape: bf16[64,1568], index: 1, kind: input, shape index: {}]   ;;  %s2991_s2 = inlined_call_operand.vmem [shape: f32[64,1], index: 2, kind: input, shape index: {}]   ;;  %s2992_s4 = inlined_call_operand.vmem [shape: f32[10,1], index: 4, kind: input, shape index: {}]   ;;  %s2993_s3 = inlined_call_operand.vmem [shape: f32[10,64], index: 3, kind: input, shape index: {}]   ;;  %s2994_s5 = inlined_call_operand.vmem [shape: f32[10,2], index: 5, kind: output, shape index: {}]  }
   0x1   :  { %v2243_v0 = vld [vmem:[%s2989_s0 + $0x40] sm:$0xff]   ;;  %v2247_v4 = vld [vmem:[%s2989_s0 + $0x48] sm:$0xff]   ;;  %v2251_v8 = vld [vmem:[%s2989_s0 + $0x50] sm:$0xff]   ;;  %2241 = vset.pattern.permute.xlu0 %v2449_v13  ;;  %2242 = vset.pattern.permute.xlu1 %v2449_v13  ;;  %vm1773_vm3 = vcmask 15360  }
   0x2   :  { %v2244_v1 = vld [vmem:[%s2989_s0] sm:$0xff]   ;;  %1937 = vmatprep.subr.bf16.mxu0 %v2243_v0  ;;  %v2248_v5 = vld [vmem:[%s2989_s0 + $0x8] sm:$0xff]   ;;  %v2252_v9 = vld [vmem:[%s2989_s0 + $0x10] sm:$0xff]  }
   0x3   :  { %v2245_v2 = vld [vmem:[%s2989_s0 + $0xc0] sm:$0xff]   ;;  %1938 = vmatpush3.bf16.msra.mxu0 %v2244_v1  ;;  %v2249_v6 = vld [vmem:[%s2989_s0 + $0xc8] sm:$0xff]   ;;  %v2253_v10 = vld [vmem:[%s2989_s0 + $0xd0] sm:$0xff]  }
   0x4   :  { %v2246_v3 = vld [vmem:[%s2989_s0 + $0x80] sm:$0xff]   ;;  %1977 = vmatprep.subr.bf16.mxu1 %v2245_v2  ;;  %1939 = vmatprep.subr.bf16.mxu0 %v2247_v4  ;;  %v2250_v7 = vld [vmem:[%s2989_s0 + $0x88] sm:$0xff]   ;;  %v2254_v11 = vld [vmem:[%s2989_s0 + $0x90] sm:$0xff]  }
   0x5   :  { %1978 = vmatpush3.bf16.msra.mxu1 %v2246_v3  ;;  %v2255_v12 = vld [vmem:[%s2989_s0 + $0x58] sm:$0xff]   ;;  %v2259_v17 = vld [vmem:[%s2989_s0 + $0x60] sm:$0xff]   ;;  %v2263_v21 = vld [vmem:[%s2989_s0 + $0x68] sm:$0xff]  }
   0x6   :  { %1979 = vmatprep.subr.bf16.mxu1 %v2249_v6  ;;  %v2256_v14 = vld [vmem:[%s2989_s0 + $0x18] sm:$0xff]   ;;  %v2260_v18 = vld [vmem:[%s2989_s0 + $0x20] sm:$0xff]   ;;  %v2264_v22 = vld [vmem:[%s2989_s0 + $0x28] sm:$0xff]  }
   0x7   :  { %1940 = vmatpush3.bf16.msra.mxu0 %v2248_v5  ;;  %v2257_v15 = vld [vmem:[%s2989_s0 + $0xd8] sm:$0xff]   ;;  %v2261_v19 = vld [vmem:[%s2989_s0 + $0xe0] sm:$0xff]   ;;  %v2265_v23 = vld [vmem:[%s2989_s0 + $0xe8] sm:$0xff]  }
   0x8   :  { %1941 = vmatprep.subr.bf16.mxu0 %v2251_v8  ;;  %v2258_v16 = vld [vmem:[%s2989_s0 + $0x98] sm:$0xff]   ;;  %v2262_v20 = vld [vmem:[%s2989_s0 + $0xa0] sm:$0xff]   ;;  %v2266_v24 = vld [vmem:[%s2989_s0 + $0xa8] sm:$0xff]  }
   0x9   :  { %1980 = vmatpush3.bf16.msra.mxu1 %v2250_v7  ;;  %v2267_v25 = vld [vmem:[%s2989_s0 + $0x70] sm:$0xff]   ;;  %v2271_v29 = vld [vmem:[%s2989_s0 + $0x78] sm:$0xff]   ;;  %v2278_v35 = vld [vmem:[%s2989_s0 + $0x140] sm:$0xff]  }
   0xa   :  { %1981 = vmatprep.subr.bf16.mxu1 %v2253_v10  ;;  %v2268_v26 = vld [vmem:[%s2989_s0 + $0x30] sm:$0xff]   ;;  %v2272_v30 = vld [vmem:[%s2989_s0 + $0x38] sm:$0xff]   ;;  %v2281_v37 = vld [vmem:[%s2990_s1 + $0xc] ss:$52 sps:$4 sm:$0xff]  }
   0xb   :  { %1942 = vmatpush3.bf16.msra.mxu0 %v2252_v9  ;;  %v2269_v27 = vld [vmem:[%s2989_s0 + $0xf0] sm:$0xff]   ;;  %v2273_v31 = vld [vmem:[%s2989_s0 + $0xf8] sm:$0xff]   ;;  %v2282_v38 = vld [vmem:[%s2989_s0 + $0x100] sm:$0xff]   ;;  %1279 = vmatprep.mubr.bf16.mxu1 %v2281_v37 }
   0xc   :  { %1943 = vmatprep.subr.bf16.mxu0 %v2255_v12  ;;  %v2270_v28 = vld [vmem:[%s2989_s0 + $0xb0] sm:$0xff]   ;;  %v2276_v33 = vld [vmem:[%s2990_s1 + $0x4] ss:$52 sps:$4 sm:$0xff]   ;;  %v2279_v36 = vld [vmem:[%s2990_s1 + $0x8] ss:$52 sps:$4 sm:$0xff]  }
   0xd   :  { %1982 = vmatpush3.bf16.msra.mxu1 %v2254_v11  ;;  %v2274_v32 = vld [vmem:[%s2990_s1] ss:$52 sps:$4 sm:$0xff]   ;;  %v2277_v34 = vld [vmem:[%s2989_s0 + $0xb8] sm:$0xff]   ;;  %1214 = vmatprep.mubr.bf16.mxu0 %v2276_v33  ;;  %v2285_v41 = vld [vmem:[%s2989_s0 + $0x148] sm:$0xff]  }
   0xe   :  { %1983 = vmatprep.subr.bf16.mxu1 %v2257_v15  ;;  %v2283_v39 = vld [vmem:[%s2989_s0 + $0x1c0] sm:$0xff]   ;;  %v2286_v42 = vld [vmem:[%s2989_s0 + $0x108] sm:$0xff]   ;;  %v2292_v47 = vld [vmem:[%s2989_s0 + $0x150] sm:$0xff]  }
   0xf   :  { %1944 = vmatpush3.bf16.msra.mxu0 %v2256_v14  ;;  %v2284_v40 = vld [vmem:[%s2989_s0 + $0x180] sm:$0xff]   ;;  %v2287_v43 = vld [vmem:[%s2989_s0 + $0x1c8] sm:$0xff]   ;;  %v2295_v49 = vld [vmem:[%s2989_s0 + $0x110] sm:$0xff]  }
  0x10   :  { %1945 = vmatprep.subr.bf16.mxu0 %v2259_v17  ;;  %v2288_v44 = vld [vmem:[%s2990_s1 + $0x6c] ss:$52 sps:$4 sm:$0xff]   ;;  %v2291_v46 = vld [vmem:[%s2990_s1 + $0x68] ss:$52 sps:$4 sm:$0xff]   ;;  %v2296_v50 = vld [vmem:[%s2990_s1 + $0x70] ss:$52 sps:$4 sm:$0xff]  }
  0x11   :  { %1984 = vmatpush3.bf16.msra.mxu1 %v2258_v16  ;;  %v2290_v45 = vld [vmem:[%s2989_s0 + $0x188] sm:$0xff]   ;;  %v2297_v51 = vld [vmem:[%s2989_s0 + $0x1d0] sm:$0xff]   ;;  %v2299_v53 = vld [vmem:[%s2989_s0 + $0x158] sm:$0xff]  }
  0x12   :  { %1985 = vmatprep.subr.bf16.mxu1 %v2261_v19  ;;  %v2293_v48 = vld [vmem:[%s2990_s1 + $0x74] ss:$52 sps:$4 sm:$0xff]   ;;  %v2300_v54 = vld [vmem:[%s2989_s0 + $0x118] sm:$0xff]   ;;  %v2305_v58 = vld [vmem:[%s2990_s1 + $0xd0] ss:$52 sps:$4 sm:$0xff]  }
  0x13   :  { %1946 = vmatpush3.bf16.msra.mxu0 %v2260_v18  ;;  %v2298_v52 = vld [vmem:[%s2989_s0 + $0x190] sm:$0xff]   ;;  %v2301_v55 = vld [vmem:[%s2989_s0 + $0x1d8] sm:$0xff]   ;;  %v2306_v59 = vld [vmem:[%s2989_s0 + $0x160] sm:$0xff]  }
  0x14   :  { %1947 = vmatprep.subr.bf16.mxu0 %v2263_v21  ;;  %v2302_v56 = vld [vmem:[%s2990_s1 + $0xd4] ss:$52 sps:$4 sm:$0xff]   ;;  %v2304_v57 = vld [vmem:[%s2989_s0 + $0x198] sm:$0xff]   ;;  %v2309_v61 = vld [vmem:[%s2989_s0 + $0x120] sm:$0xff]  }
  0x15   :  { %1986 = vmatpush3.bf16.msra.mxu1 %v2262_v20  ;;  %v2307_v60 = vld [vmem:[%s2990_s1 + $0xdc] ss:$52 sps:$4 sm:$0xff]   ;;  %v2310_v62 = vld [vmem:[%s2990_s1 + $0xd8] ss:$52 sps:$4 sm:$0xff]   ;;  %v2311_v63 = vld [vmem:[%s2989_s0 + $0x1e0] sm:$0xff]  }
  0x16   :  { %1987 = vmatprep.subr.bf16.mxu1 %v2265_v23  ;;  %v2312_v0 = vld [vmem:[%s2989_s0 + $0x1a0] sm:$0xff]   ;;  %v2313_v1 = vld [vmem:[%s2989_s0 + $0x168] sm:$0xff]   ;;  %v2316_v4 = vld [vmem:[%s2990_s1 + $0x13c] ss:$52 sps:$4 sm:$0xff]  }
  0x17   :  { %1948 = vmatpush3.bf16.msra.mxu0 %v2264_v22  ;;  %v2314_v2 = vld [vmem:[%s2989_s0 + $0x128] sm:$0xff]   ;;  %v2320_v7 = vld [vmem:[%s2989_s0 + $0x170] sm:$0xff]   ;;  %v2321_v8 = vld [vmem:[%s2990_s1 + $0x144] ss:$52 sps:$4 sm:$0xff]  }
  0x18   :  { %1949 = vmatprep.subr.bf16.mxu0 %v2267_v25  ;;  %v2315_v3 = vld [vmem:[%s2989_s0 + $0x1e8] sm:$0xff]   ;;  %v2323_v9 = vld [vmem:[%s2989_s0 + $0x130] sm:$0xff]   ;;  %v2327_v13 = vld [vmem:[%s2989_s0 + $0x178] sm:$0xff]  }
  0x19   :  { %1988 = vmatpush3.bf16.msra.mxu1 %v2266_v24  ;;  %v2318_v5 = vld [vmem:[%s2989_s0 + $0x1a8] sm:$0xff]   ;;  %v2324_v10 = vld [vmem:[%s2990_s1 + $0x140] ss:$52 sps:$4 sm:$0xff]   ;;  %v2328_v14 = vld [vmem:[%s2989_s0 + $0x138] sm:$0xff]  }
  0x1a   :  { %1989 = vmatprep.subr.bf16.mxu1 %v2269_v27  ;;  %v2319_v6 = vld [vmem:[%s2990_s1 + $0x138] ss:$52 sps:$4 sm:$0xff]   ;;  %v2325_v11 = vld [vmem:[%s2989_s0 + $0x1f0] sm:$0xff]   ;;  %v2334_v19 = vld [vmem:[%s2989_s0 + $0x240] sm:$0xff]  }
  0x1b   :  { %1950 = vmatpush3.bf16.msra.mxu0 %v2268_v26  ;;  %v2326_v12 = vld [vmem:[%s2989_s0 + $0x1b0] sm:$0xff]   ;;  %v2329_v15 = vld [vmem:[%s2989_s0 + $0x1f8] sm:$0xff]   ;;  %v2338_v22 = vld [vmem:[%s2989_s0 + $0x200] sm:$0xff]  }
  0x1c   :  { %1951 = vmatprep.subr.bf16.mxu0 %v2271_v29  ;;  %v2330_v16 = vld [vmem:[%s2990_s1 + $0x10] ss:$52 sps:$4 sm:$0xff]   ;;  %v2332_v17 = vld [vmem:[%s2990_s1 + $0x14] ss:$52 sps:$4 sm:$0xff]   ;;  %v2333_v18 = vld [vmem:[%s2989_s0 + $0x1b8] sm:$0xff]  }
  0x1d   :  { %1990 = vmatpush3.bf16.msra.mxu1 %v2270_v28  ;;  %v2335_v20 = vld [vmem:[%s2990_s1 + $0x18] ss:$52 sps:$4 sm:$0xff]   ;;  %v2337_v21 = vld [vmem:[%s2990_s1 + $0x1c] ss:$52 sps:$4 sm:$0xff]   ;;  %v2339_v23 = vld [vmem:[%s2989_s0 + $0x2c0] sm:$0xff]  }
  0x1e   :  { %1991 = vmatprep.subr.bf16.mxu1 %v2273_v31  ;;  %v2340_v24 = vld [vmem:[%s2989_s0 + $0x280] sm:$0xff]   ;;  %v2341_v25 = vld [vmem:[%s2989_s0 + $0x248] sm:$0xff]   ;;  %v2344_v28 = vld [vmem:[%s2990_s1 + $0x7c] ss:$52 sps:$4 sm:$0xff]  }
  0x1f   :  { %1952 = vmatpush3.bf16.msra.mxu0 %v2272_v30  ;;  %v2342_v26 = vld [vmem:[%s2989_s0 + $0x208] sm:$0xff]   ;;  %v2348_v31 = vld [vmem:[%s2989_s0 + $0x250] sm:$0xff]   ;;  %v2355_v37 = vld [vmem:[%s2989_s0 + $0x258] sm:$0xff]  }
  0x20   :  { %2017 = vmatprep.subr.bf16.mxu0 %v2278_v35  ;;  %v2343_v27 = vld [vmem:[%s2989_s0 + $0x2c8] sm:$0xff]   ;;  %v2351_v33 = vld [vmem:[%s2989_s0 + $0x210] sm:$0xff]  }
  0x21   :  { %1992 = vmatpush3.bf16.msra.mxu1 %v2277_v34  ;;  %v2346_v29 = vld [vmem:[%s2989_s0 + $0x288] sm:$0xff]   ;;  %v2352_v34 = vld [vmem:[%s2990_s1 + $0x80] ss:$52 sps:$4 sm:$0xff]  }
  0x22   :  { %1215 = vmatmul.mubr.bf16.vlgmr.msra.gmra.mrb[0].mxu0 %v2274_v32  ;;  %2057 = vmatprep.subr.bf16.mxu1 %v2283_v39  ;;  %v2347_v30 = vld [vmem:[%s2990_s1 + $0x78] ss:$52 sps:$4 sm:$0xff]   ;;  %v2353_v35 = vld [vmem:[%s2989_s0 + $0x2d0] sm:$0xff]  }
  0x23   :  { %2018 = vmatpush3.bf16.msra.mxu0 %v2282_v38  ;;  %1222 = vmatprep.mubr.bf16.mxu0 %v2288_v44  ;;  %v2349_v32 = vld [vmem:[%s2990_s1 + $0x84] ss:$52 sps:$4 sm:$0xff]   ;;  %v2363_v44 = vld [vmem:[%s2990_s1 + $0xec] ss:$52 sps:$4 sm:$0xff]  }
  0x24   :  { %1280 = vmatmul.mubr.bf16.vlgmr.msra.gmra.mrb[0].mxu1 %v2279_v36  ;;  %2019 = vmatprep.subr.bf16.mxu0 %v2285_v41  ;;  %v2354_v36 = vld [vmem:[%s2989_s0 + $0x290] sm:$0xff]   ;;  %v2356_v38 = vld [vmem:[%s2989_s0 + $0x218] sm:$0xff]  }
  0x25   :  { %2058 = vmatpush3.bf16.msra.mxu1 %v2284_v40  ;;  %1287 = vmatprep.mubr.bf16.mxu1 %v2293_v48  ;;  %v2357_v39 = vld [vmem:[%s2989_s0 + $0x2d8] sm:$0xff]   ;;  %v2368_v48 = vld [vmem:[%s2989_s0 + $0x2a0] sm:$0xff]  }
  0x26   :  { %2059 = vmatprep.subr.bf16.mxu1 %v2287_v43  ;;  %v2358_v40 = vld [vmem:[%s2990_s1 + $0xe4] ss:$52 sps:$4 sm:$0xff]  }
  0x27   :  { %2020 = vmatpush3.bf16.msra.mxu0 %v2286_v42  ;;  %v2360_v41 = vld [vmem:[%s2989_s0 + $0x298] sm:$0xff]   ;;  %v2361_v42 = vld [vmem:[%s2990_s1 + $0xe0] ss:$52 sps:$4 sm:$0xff]  }
  0x28   :  { %2021 = vmatprep.subr.bf16.mxu0 %v2292_v47  ;;  %v2362_v43 = vld [vmem:[%s2989_s0 + $0x260] sm:$0xff]  }
  0x29   :  { %2060 = vmatpush3.bf16.msra.mxu1 %v2290_v45  ;;  %v2365_v45 = vld [vmem:[%s2989_s0 + $0x220] sm:$0xff]  }
  0x2a   :  { %1223 = vmatmul.mubr.bf16.gmra.mrb[4].mxu0 %v2291_v46  ;;  %2061 = vmatprep.subr.bf16.mxu1 %v2297_v51  ;;  %v2366_v46 = vld [vmem:[%s2990_s1 + $0xe8] ss:$52 sps:$4 sm:$0xff]   ;;  %v2367_v47 = vld [vmem:[%s2989_s0 + $0x2e0] sm:$0xff]  }
  0x2b   :  { %2022 = vmatpush3.bf16.msra.mxu0 %v2295_v49  ;;  %1230 = vmatprep.mubr.bf16.mxu0 %v2302_v56  ;;  %v2369_v49 = vld [vmem:[%s2989_s0 + $0x268] sm:$0xff]  }
  0x2c   :  { %1288 = vmatmul.mubr.bf16.gmra.mrb[4].mxu1 %v2296_v50  ;;  %2023 = vmatprep.subr.bf16.mxu0 %v2299_v53  ;;  %v2370_v50 = vld [vmem:[%s2989_s0 + $0x228] sm:$0xff]  }
  0x2d   :  { %2062 = vmatpush3.bf16.msra.mxu1 %v2298_v52  ;;  %1295 = vmatprep.mubr.bf16.mxu1 %v2307_v60  ;;  %v2371_v51 = vld [vmem:[%s2989_s0 + $0x2e8] sm:$0xff]   ;;  %v2382_v60 = vld [vmem:[%s2989_s0 + $0x2b0] sm:$0xff]  }
  0x2e   :  { %2063 = vmatprep.subr.bf16.mxu1 %v2301_v55  ;;  %v2372_v52 = vld [vmem:[%s2990_s1 + $0x14c] ss:$52 sps:$4 sm:$0xff]   ;;  %v2376_v55 = vld [vmem:[%s2989_s0 + $0x270] sm:$0xff]  }
  0x2f   :  { %2024 = vmatpush3.bf16.msra.mxu0 %v2300_v54  ;;  %v2374_v53 = vld [vmem:[%s2989_s0 + $0x2a8] sm:$0xff]  }
  0x30   :  { %2025 = vmatprep.subr.bf16.mxu0 %v2306_v59  ;;  %v2375_v54 = vld [vmem:[%s2990_s1 + $0x148] ss:$52 sps:$4 sm:$0xff]   ;;  %v2381_v59 = vld [vmem:[%s2989_s0 + $0x2f0] sm:$0xff]  }
  0x31   :  { %2064 = vmatpush3.bf16.msra.mxu1 %v2304_v57  ;;  %v2377_v56 = vld [vmem:[%s2990_s1 + $0x154] ss:$52 sps:$4 sm:$0xff]  }
  0x32   :  { %1231 = vmatmul.mubr.bf16.gmra.mrb[8].mxu0 %v2305_v58  ;;  %2065 = vmatprep.subr.bf16.mxu1 %v2311_v63  ;;  %v2379_v57 = vld [vmem:[%s2989_s0 + $0x230] sm:$0xff]   ;;  %v2385_v63 = vld [vmem:[%s2989_s0 + $0x2f8] sm:$0xff]  }
  0x33   :  { %2026 = vmatpush3.bf16.msra.mxu0 %v2309_v61  ;;  %1238 = vmatprep.mubr.bf16.mxu0 %v2316_v4  ;;  %v2380_v58 = vld [vmem:[%s2990_s1 + $0x150] ss:$52 sps:$4 sm:$0xff]   ;;  %v2383_v61 = vld [vmem:[%s2989_s0 + $0x278] sm:$0xff]   ;;  %v2392_v4 = vld [vmem:[%s2990_s1 + $0x2c] ss:$52 sps:$4 sm:$0xff]  }
  0x34   :  { %1296 = vmatmul.mubr.bf16.gmra.mrb[8].mxu1 %v2310_v62  ;;  %2027 = vmatprep.subr.bf16.mxu0 %v2313_v1  ;;  %v2384_v62 = vld [vmem:[%s2989_s0 + $0x238] sm:$0xff]  }
  0x35   :  { %2066 = vmatpush3.bf16.msra.mxu1 %v2312_v0  ;;  %1303 = vmatprep.mubr.bf16.mxu1 %v2321_v8  ;;  %v2386_v0 = vld [vmem:[%s2990_s1 + $0x20] ss:$52 sps:$4 sm:$0xff]   ;;  %v2388_v1 = vld [vmem:[%s2990_s1 + $0x24] ss:$52 sps:$4 sm:$0xff]  }
  0x36   :  { %2067 = vmatprep.subr.bf16.mxu1 %v2315_v3  ;;  %v2390_v3 = vld [vmem:[%s2990_s1 + $0x28] ss:$52 sps:$4 sm:$0xff]   ;;  %v2402_v8 = vld [vmem:[%s2989_s0 + $0x300] sm:$0xff]  }
  0x37   :  { %2028 = vmatpush3.bf16.msra.mxu0 %v2314_v2  ;;  %v2389_v2 = vld [vmem:[%s2989_s0 + $0x2b8] sm:$0xff]  }
  0x38   :  { %2029 = vmatprep.subr.bf16.mxu0 %v2320_v7  ;;  %v2395_v7 = vld [vmem:[%s2990_s1 + $0x88] ss:$52 sps:$4 sm:$0xff]  }
  0x39   :  { %2068 = vmatpush3.bf16.msra.mxu1 %v2318_v5  ;;  %v2393_v5 = vld [vmem:[%s2990_s1 + $0x8c] ss:$52 sps:$4 sm:$0xff]  }
  0x3a   :  { %1239 = vmatmul.mubr.bf16.gmra.mrb[12].mxu0 %v2319_v6  ;;  %2069 = vmatprep.subr.bf16.mxu1 %v2325_v11  ;;  %v2396_v6 = vld [vmem:[%s2990_s1 + $0x94] ss:$52 sps:$4 sm:$0xff]   ;;  %v2398_v11 = vld [vmem:[%s2990_s1 + $0x90] ss:$52 sps:$4 sm:$0xff]  }
  0x3b   :  { %2030 = vmatpush3.bf16.msra.mxu0 %v2323_v9  ;;  %1344 = vmatprep.mubr.bf16.mxu0 %v2332_v17  ;;  %v2399_v9 = vld [vmem:[%s2990_s1 + $0xf4] ss:$52 sps:$4 sm:$0xff]   ;;  %v2406_v17 = vld [vmem:[%s2990_s1 + $0x15c] ss:$52 sps:$4 sm:$0xff]  }
  0x3c   :  { %1304 = vmatmul.mubr.bf16.gmra.mrb[12].mxu1 %v2324_v10  ;;  %2031 = vmatprep.subr.bf16.mxu0 %v2327_v13  ;;  %v273_v10 = vld [vmem:[%s2991_s2] sm:$0xff]  ;;  %v274_v13 = vld [vmem:[%s2991_s2 + $0x8] sm:$0xff] }
  0x3d   :  { %2070 = vmatpush3.bf16.msra.mxu1 %v2326_v12  ;;  %1409 = vmatprep.mubr.bf16.mxu1 %v2337_v21  ;;  %v2403_v12 = vld [vmem:[%s2990_s1 + $0xfc] ss:$52 sps:$4 sm:$0xff]   ;;  %v2409_v21 = vld [vmem:[%s2990_s1 + $0x164] ss:$52 sps:$4 sm:$0xff]  }
  0x3e   :  { %2071 = vmatprep.subr.bf16.mxu1 %v2329_v15  ;;  %283 = vperm.xlu0 %2241, %v273_v10   ;;  %v275_v15 = vld [vmem:[%s2991_s2 + $0x10] sm:$0xff] }
  0x3f   :  { %2032 = vmatpush3.bf16.msra.mxu0 %v2328_v14  ;;  %v2412_v14 = vld [vmem:[%s2989_s0 + $0x308] sm:$0xff]   ;;  %293 = vperm.xlu1 %2242, %v275_v15  }
  0x40   :  { %2097 = vmatprep.subr.bf16.mxu0 %v2334_v19  ;;  %v276_v19 = vld [vmem:[%s2991_s2 + $0x18] sm:$0xff] }
  0x41   :  { %2072 = vmatpush3.bf16.msra.mxu1 %v2333_v18  ;;  %v277_v18 = vld [vmem:[%s2991_s2 + $0x20] sm:$0xff] }
  0x42   :  { %1345 = vmatmul.mubr.bf16.vlgmr.msra.gmra.mrb[16].mxu0 %v2330_v16  ;;  %2137 = vmatprep.subr.bf16.mxu1 %v2339_v23  ;;  %v2401_v16 = vld [vmem:[%s2990_s1 + $0xf0] ss:$52 sps:$4 sm:$0xff]   ;;  %v278_v23 = vld [vmem:[%s2991_s2 + $0x28] sm:$0xff] }
  0x43   :  { %2098 = vmatpush3.bf16.msra.mxu0 %v2338_v22  ;;  %1352 = vmatprep.mubr.bf16.mxu0 %v2344_v28  ;;  %v279_v22 = vld [vmem:[%s2991_s2 + $0x30] sm:$0xff] }
  0x44   :  { %1410 = vmatmul.mubr.bf16.vlgmr.msra.gmra.mrb[16].mxu1 %v2335_v20  ;;  %2099 = vmatprep.subr.bf16.mxu0 %v2341_v25  ;;  %v2405_v20 = vld [vmem:[%s2990_s1 + $0xf8] ss:$52 sps:$4 sm:$0xff]   ;;  %v1679_v25 = vld [vmem:[%s2992_s4] sm:$0xff] }
  0x45   :  { %2138 = vmatpush3.bf16.msra.mxu1 %v2340_v24  ;;  %1417 = vmatprep.mubr.bf16.mxu1 %v2349_v32  ;;  %v2408_v24 = vld [vmem:[%s2990_s1 + $0x158] ss:$52 sps:$4 sm:$0xff]   ;;  %v2411_v28 = vld [vmem:[%s2990_s1 + $0x160] ss:$52 sps:$4 sm:$0xff]   ;;  %v2416_v32 = vld [vmem:[%s2990_s1 + $0x168] ss:$52 sps:$4 sm:$0xff]  }
  0x46   :  { %2139 = vmatprep.subr.bf16.mxu1 %v2343_v27  ;;  %288 = vperm.xlu0 %2241, %v274_v13   ;;  %v280_v27 = vld [vmem:[%s2991_s2 + $0x38] sm:$0xff] }
  0x47   :  { %2100 = vmatpush3.bf16.msra.mxu0 %v2342_v26  ;;  %298 = vperm.xlu1 %2242, %v276_v19   ;;  %v2413_v26 = vld [vmem:[%s2990_s1 + $0x30] ss:$52 sps:$4 sm:$0xff]  }
  0x48   :  { %2101 = vmatprep.subr.bf16.mxu0 %v2348_v31  ;;  %v2415_v31 = vld [vmem:[%s2990_s1 + $0x100] ss:$52 sps:$4 sm:$0xff]  }
  0x49   :  { %2140 = vmatpush3.bf16.msra.mxu1 %v2346_v29  ;;  %v1680_v29 = vld [vmem:[%s2992_s4 + $0x8] sm:$0x3] }
  0x4a   :  { %1353 = vmatmul.mubr.bf16.gmra.mrb[20].mxu0 %v2347_v30  ;;  %2141 = vmatprep.subr.bf16.mxu1 %v2353_v35  ;;  %v2414_v30 = vld [vmem:[%s2990_s1 + $0x98] ss:$52 sps:$4 sm:$0xff]  }
  0x4b   :  { %2102 = vmatpush3.bf16.msra.mxu0 %v2351_v33  ;;  %1360 = vmatprep.mubr.bf16.mxu0 %v2358_v40 }
  0x4c   :  { %1418 = vmatmul.mubr.bf16.gmra.mrb[20].mxu1 %v2352_v34  ;;  %2103 = vmatprep.subr.bf16.mxu0 %v2355_v37 }
  0x4d   :  { %2142 = vmatpush3.bf16.msra.mxu1 %v2354_v36  ;;  %1425 = vmatprep.mubr.bf16.mxu1 %v2363_v44 }
  0x4e   :  { %2143 = vmatprep.subr.bf16.mxu1 %v2357_v39  ;;  %303 = vperm.xlu0 %2241, %v277_v18  }
  0x4f   :  { %2104 = vmatpush3.bf16.msra.mxu0 %v2356_v38  ;;  %308 = vperm.xlu1 %2242, %v278_v23  }
  0x50   :  { %2105 = vmatprep.subr.bf16.mxu0 %v2362_v43 }
  0x51   :  { %2144 = vmatpush3.bf16.msra.mxu1 %v2360_v41 }
  0x52   :  { %1361 = vmatmul.mubr.bf16.gmra.mrb[24].mxu0 %v2361_v42  ;;  %2145 = vmatprep.subr.bf16.mxu1 %v2367_v47 }
  0x53   :  { %2106 = vmatpush3.bf16.msra.mxu0 %v2365_v45  ;;  %1368 = vmatprep.mubr.bf16.mxu0 %v2372_v52 }
  0x54   :  { %1426 = vmatmul.mubr.bf16.gmra.mrb[24].mxu1 %v2366_v46  ;;  %2107 = vmatprep.subr.bf16.mxu0 %v2369_v49 }
  0x55   :  { %2146 = vmatpush3.bf16.msra.mxu1 %v2368_v48  ;;  %1433 = vmatprep.mubr.bf16.mxu1 %v2377_v56 }
  0x56   :  { %2147 = vmatprep.subr.bf16.mxu1 %v2371_v51  ;;  %313 = vperm.xlu0 %2241, %v279_v22  }
  0x57   :  { %2108 = vmatpush3.bf16.msra.mxu0 %v2370_v50  ;;  %318 = vperm.xlu1 %2242, %v280_v27  }
  0x58   :  { %2109 = vmatprep.subr.bf16.mxu0 %v2376_v55 }
  0x59   :  { %2148 = vmatpush3.bf16.msra.mxu1 %v2374_v53 }
  0x5a   :  { %1369 = vmatmul.mubr.bf16.gmra.mrb[28].mxu0 %v2375_v54  ;;  %2149 = vmatprep.subr.bf16.mxu1 %v2381_v59 }
  0x5b   :  { %2110 = vmatpush3.bf16.msra.mxu0 %v2379_v57  ;;  %1474 = vmatprep.mubr.bf16.mxu0 %v2388_v1 }
  0x5c   :  { %1434 = vmatmul.mubr.bf16.gmra.mrb[28].mxu1 %v2380_v58  ;;  %2111 = vmatprep.subr.bf16.mxu0 %v2383_v61 }
  0x5d   :  { %2150 = vmatpush3.bf16.msra.mxu1 %v2382_v60  ;;  %1539 = vmatprep.mubr.bf16.mxu1 %v2392_v4 }
  0x5e   :  { %2151 = vmatprep.subr.bf16.mxu1 %v2385_v63  ;;  %1683 = vperm.xlu0 %2241, %v1679_v25  }
  0x5f   :  { %2112 = vmatpush3.bf16.msra.mxu0 %v2384_v62  ;;  %1688 = vperm.xlu1 %2242, %v1680_v29  }
  0x60   :  { %2193 = vmatprep.subr.bf16.mxu0 %v2402_v8 }
  0x61   :  { %2152 = vmatpush3.bf16.msra.mxu1 %v2389_v2 }
  0x62   :  { %1475 = vmatmul.mubr.bf16.vlgmr.msra.gmra.mrb[32].mxu0 %v2386_v0 }
  0x63   :  { %1482 = vmatprep.mubr.bf16.mxu0 %v2393_v5  ;;  %2194 = vmatpush3.bf16.msra.mxu0 %v2402_v8 }
  0x64   :  { %1540 = vmatmul.mubr.bf16.vlgmr.msra.gmra.mrb[32].mxu1 %v2390_v3  ;;  %2195 = vmatprep.subr.bf16.mxu0 %v2412_v14 }
  0x65   :  { %1547 = vmatprep.mubr.bf16.mxu1 %v2396_v6 }
  0x67   :  { %2196 = vmatpush3.bf16.msra.mxu0 %v2412_v14 }
  0x6a   :  { %1483 = vmatmul.mubr.bf16.gmra.mrb[36].mxu0 %v2395_v7 }
  0x6b   :  { %1490 = vmatprep.mubr.bf16.mxu0 %v2399_v9 }
  0x6c   :  { %1548 = vmatmul.mubr.bf16.gmra.mrb[36].mxu1 %v2398_v11 }
  0x6d   :  { %1555 = vmatprep.mubr.bf16.mxu1 %v2403_v12 }
  0x72   :  { %1491 = vmatmul.mubr.bf16.gmra.mrb[40].mxu0 %v2401_v16 }
  0x73   :  { %1498 = vmatprep.mubr.bf16.mxu0 %v2406_v17 }
  0x74   :  { %1556 = vmatmul.mubr.bf16.gmra.mrb[40].mxu1 %v2405_v20 }
  0x75   :  { %1563 = vmatprep.mubr.bf16.mxu1 %v2409_v21 }
  0x7a   :  { %1499 = vmatmul.mubr.bf16.gmra.mrb[44].mxu0 %v2408_v24 }
  0x7b   :  { %2197 = vmatprep.mubr.msk.bf16.mxu0 %vm1169_vm0, %v2413_v26 }
  0x7c   :  { %1564 = vmatmul.mubr.bf16.gmra.mrb[44].mxu1 %v2411_v28 }
  0x82   :  { %2198 = vmatmul.mubr.msk.bf16.vlgmr.msra.gmra.mrb[48].mxu0 %vm1169_vm0, %v2414_v30 }
  0x83   :  { %2201 = vmatprep.mubr.msk.bf16.mxu0 %vm1169_vm0, %v2415_v31 }
  0x8a   :  { %2202 = vmatmul.mubr.msk.bf16.gmra.mrb[52].mxu0 %vm1169_vm0, %v2416_v32 }
  0xbd   :  { %v284_v45 = vpop.permute.xlu0 %283 }
  0xbe   :  { %v294_v55 = vpop.permute.xlu1 %293 }
  0xc5   :  { %v289_v50 = vpop.permute.xlu0 %288 }
  0xc6   :  { %v299_v1 = vpop.permute.xlu1 %298 }
  0xcd   :  { %v304_v7 = vpop.permute.xlu0 %303 }
  0xce   :  { %v309_v10 = vpop.permute.xlu1 %308 }
  0xd5   :  { %v314_v25 = vpop.permute.xlu0 %313 }
  0xd6   :  { %v319_v28 = vpop.permute.xlu1 %318 }
  0xf5   :  { %v1953_v33 = vpop.f32.mrb[0].mxu0 }
  0xf6   :  { %v1954_v34 = vpop.f32.mrb[1].mxu0 }
  0xf7   :  { %v1955_v35 = vadd.f32 %v1954_v34, %v1953_v33  ;;  %v1956_v36 = vpop.f32.mrb[2].mxu0  ;;  %v1993_v37 = vpop.f32.mrb[0].mxu1 }
  0xf8   :  { %v1957_v38 = vpop.f32.mrb[3].mxu0  ;;  %v1994_v40 = vpop.f32.mrb[1].mxu1 }
  0xf9   :  { %v1958_v39 = vadd.f32 %v1957_v38, %v1956_v36  ;;  %v1995_v41 = vadd.f32 %v1994_v40, %v1993_v37  ;;  %v1996_v42 = vpop.f32.mrb[2].mxu1  ;;  %v1217_v46 = vadd.f32 %v1955_v35, %v284_v45  ;;  %v1677_v40 = vld [vmem:[%s2993_s3] sm:$0xff] }
  0xfa   :  { %v1997_v43 = vpop.f32.mrb[3].mxu1  ;;  %2221 = vmatprep.mubr.msk.f32.mxu1 %vm1691_vm1, %v1677_v40 }
  0xfb   :  { %v1998_v44 = vadd.f32 %v1997_v43, %v1996_v42  ;;  %v2960_v48 = vadd.f32 %v1995_v41, %v1217_v46  ;;  %v1220_v53 = vadd.f32 %v1958_v39, %v289_v50 }
  0xfd   :  { %v1959_v47 = vpop.f32.mrb[4].mxu0  ;;  %v1285_v58 = vadd.f32 %v1998_v44, %v1220_v53 }
  0xfe   :  { %v1960_v49 = vpop.f32.mrb[5].mxu0 }
  0xff   :  { %v1961_v51 = vadd.f32 %v1960_v49, %v1959_v47  ;;  %v1962_v52 = vpop.f32.mrb[6].mxu0  ;;  %v1999_v56 = vpop.f32.mrb[4].mxu1 }
 0x100   :  { %v1963_v54 = vpop.f32.mrb[7].mxu0  ;;  %v2000_v60 = vpop.f32.mrb[5].mxu1 }
 0x101   :  { %v1964_v57 = vadd.f32 %v1963_v54, %v1962_v52  ;;  %v1225_v59 = vadd.f32 %v1961_v51, %v294_v55  ;;  %v2001_v61 = vadd.f32 %v2000_v60, %v1999_v56  ;;  %v2002_v62 = vpop.f32.mrb[6].mxu1 }
 0x102   :  { %v2003_v63 = vpop.f32.mrb[7].mxu1 }
 0x103   :  { %v2962_v0 = vadd.f32 %v2001_v61, %v1225_v59  ;;  %v2004_v2 = vadd.f32 %v2003_v63, %v2002_v62  ;;  %v1228_v3 = vadd.f32 %v1964_v57, %v299_v1 }
 0x105   :  { %v2964_v4 = vadd.f32 %v2004_v2, %v1228_v3  ;;  %v1965_v5 = vpop.f32.mrb[8].mxu0 }
 0x106   :  { %v1966_v6 = vpop.f32.mrb[9].mxu0 }
 0x107   :  { %v1967_v8 = vadd.f32 %v1966_v6, %v1965_v5  ;;  %v1968_v9 = vpop.f32.mrb[10].mxu0  ;;  %v2005_v11 = vpop.f32.mrb[8].mxu1 }
 0x108   :  { %v1969_v12 = vpop.f32.mrb[11].mxu0  ;;  %v2006_v15 = vpop.f32.mrb[9].mxu1 }
 0x109   :  { %v1233_v13 = vadd.f32 %v1967_v8, %v304_v7  ;;  %v1970_v14 = vadd.f32 %v1969_v12, %v1968_v9  ;;  %v2007_v16 = vadd.f32 %v2006_v15, %v2005_v11  ;;  %v2008_v17 = vpop.f32.mrb[10].mxu1 }
 0x10a   :  { %v2009_v19 = vpop.f32.mrb[11].mxu1 }
 0x10b   :  { %v1236_v18 = vadd.f32 %v1970_v14, %v309_v10  ;;  %v2966_v20 = vadd.f32 %v2007_v16, %v1233_v13  ;;  %v2010_v21 = vadd.f32 %v2009_v19, %v2008_v17 }
 0x10d   :  { %v2968_v22 = vadd.f32 %v2010_v21, %v1236_v18  ;;  %v1971_v23 = vpop.f32.mrb[12].mxu0 }
 0x10e   :  { %v1972_v24 = vpop.f32.mrb[13].mxu0 }
 0x10f   :  { %v1973_v26 = vadd.f32 %v1972_v24, %v1971_v23  ;;  %v1974_v27 = vpop.f32.mrb[14].mxu0  ;;  %v2011_v29 = vpop.f32.mrb[12].mxu1 }
 0x110   :  { %v1975_v30 = vpop.f32.mrb[15].mxu0  ;;  %v2012_v33 = vpop.f32.mrb[13].mxu1 }
 0x111   :  { %v1241_v31 = vadd.f32 %v1973_v26, %v314_v25  ;;  %v1976_v32 = vadd.f32 %v1975_v30, %v1974_v27  ;;  %v2013_v34 = vadd.f32 %v2012_v33, %v2011_v29  ;;  %v2014_v35 = vpop.f32.mrb[14].mxu1 }
 0x112   :  { %v2015_v37 = vpop.f32.mrb[15].mxu1 }
 0x113   :  { %v1244_v36 = vadd.f32 %v1976_v32, %v319_v28  ;;  %v1306_v38 = vadd.f32 %v2013_v34, %v1241_v31  ;;  %v2016_v39 = vadd.f32 %v2015_v37, %v2014_v35 }
 0x115   :  { %v1309_v41 = vadd.f32 %v2016_v39, %v1244_v36  ;;  %v2033_v42 = vpop.f32.mrb[16].mxu0 }
 0x116   :  { %v2034_v43 = vpop.f32.mrb[17].mxu0 }
 0x117   :  { %v2035_v44 = vadd.f32 %v2034_v43, %v2033_v42  ;;  %v2036_v45 = vpop.f32.mrb[18].mxu0  ;;  %v2073_v49 = vpop.f32.mrb[16].mxu1 }
 0x118   :  { %v2037_v46 = vpop.f32.mrb[19].mxu0  ;;  %v2074_v51 = vpop.f32.mrb[17].mxu1 }
 0x119   :  { %v1347_v47 = vadd.f32 %v2035_v44, %v2960_v48  ;;  %v2038_v50 = vadd.f32 %v2037_v46, %v2036_v45  ;;  %v2075_v53 = vadd.f32 %v2074_v51, %v2073_v49  ;;  %v2076_v54 = vpop.f32.mrb[18].mxu1 }
 0x11a   :  { %v2077_v55 = vpop.f32.mrb[19].mxu1 }
 0x11b   :  { %v1350_v52 = vadd.f32 %v2038_v50, %v1285_v58  ;;  %v1412_v56 = vadd.f32 %v2075_v53, %v1347_v47  ;;  %v2078_v57 = vadd.f32 %v2077_v55, %v2076_v54 }
 0x11d   :  { %v1415_v59 = vadd.f32 %v2078_v57, %v1350_v52  ;;  %v2039_v60 = vpop.f32.mrb[20].mxu0 }
 0x11e   :  { %v2040_v61 = vpop.f32.mrb[21].mxu0 }
 0x11f   :  { %v2041_v62 = vadd.f32 %v2040_v61, %v2039_v60  ;;  %v2042_v63 = vpop.f32.mrb[22].mxu0  ;;  %v2079_v1 = vpop.f32.mrb[20].mxu1 }
 0x120   :  { %v2043_v2 = vpop.f32.mrb[23].mxu0  ;;  %v2080_v48 = vpop.f32.mrb[21].mxu1 }
 0x121   :  { %v1355_v3 = vadd.f32 %v2041_v62, %v2962_v0  ;;  %v2044_v5 = vadd.f32 %v2043_v2, %v2042_v63  ;;  %v2081_v6 = vadd.f32 %v2080_v48, %v2079_v1  ;;  %v2082_v7 = vpop.f32.mrb[22].mxu1 }
 0x122   :  { %v2083_v8 = vpop.f32.mrb[23].mxu1 }
 0x123   :  { %v1358_v58 = vadd.f32 %v2044_v5, %v2964_v4  ;;  %v1420_v9 = vadd.f32 %v2081_v6, %v1355_v3  ;;  %v2084_v10 = vadd.f32 %v2083_v8, %v2082_v7 }
 0x125   :  { %v1423_v11 = vadd.f32 %v2084_v10, %v1358_v58  ;;  %v2045_v12 = vpop.f32.mrb[24].mxu0 }
 0x126   :  { %v2046_v13 = vpop.f32.mrb[25].mxu0 }
 0x127   :  { %v2047_v14 = vadd.f32 %v2046_v13, %v2045_v12  ;;  %v2048_v15 = vpop.f32.mrb[26].mxu0  ;;  %v2085_v16 = vpop.f32.mrb[24].mxu1 }
 0x128   :  { %v2049_v17 = vpop.f32.mrb[27].mxu0  ;;  %v2086_v0 = vpop.f32.mrb[25].mxu1 }
 0x129   :  { %v1363_v18 = vadd.f32 %v2047_v14, %v2966_v20  ;;  %v2050_v19 = vadd.f32 %v2049_v17, %v2048_v15  ;;  %v2087_v21 = vadd.f32 %v2086_v0, %v2085_v16  ;;  %v2088_v23 = vpop.f32.mrb[26].mxu1 }
 0x12a   :  { %v2089_v25 = vpop.f32.mrb[27].mxu1 }
 0x12b   :  { %v1366_v24 = vadd.f32 %v2050_v19, %v2968_v22  ;;  %v1428_v4 = vadd.f32 %v2087_v21, %v1363_v18  ;;  %v2090_v26 = vadd.f32 %v2089_v25, %v2088_v23 }
 0x12d   :  { %v1431_v27 = vadd.f32 %v2090_v26, %v1366_v24  ;;  %v2051_v28 = vpop.f32.mrb[28].mxu0 }
 0x12e   :  { %v2052_v29 = vpop.f32.mrb[29].mxu0 }
 0x12f   :  { %v2053_v30 = vadd.f32 %v2052_v29, %v2051_v28  ;;  %v2054_v31 = vpop.f32.mrb[30].mxu0  ;;  %v2091_v34 = vpop.f32.mrb[28].mxu1 }
 0x130   :  { %v2055_v32 = vpop.f32.mrb[31].mxu0  ;;  %v2092_v36 = vpop.f32.mrb[29].mxu1 }
 0x131   :  { %v1371_v33 = vadd.f32 %v2053_v30, %v1306_v38  ;;  %v2056_v35 = vadd.f32 %v2055_v32, %v2054_v31  ;;  %v2093_v37 = vadd.f32 %v2092_v36, %v2091_v34  ;;  %v2094_v39 = vpop.f32.mrb[30].mxu1 }
 0x132   :  { %v2095_v40 = vpop.f32.mrb[31].mxu1 }
 0x133   :  { %v1374_v20 = vadd.f32 %v2056_v35, %v1309_v41  ;;  %v1436_v42 = vadd.f32 %v2093_v37, %v1371_v33  ;;  %v2096_v43 = vadd.f32 %v2095_v40, %v2094_v39 }
 0x135   :  { %v1439_v22 = vadd.f32 %v2096_v43, %v1374_v20  ;;  %v2113_v44 = vpop.f32.mrb[32].mxu0 }
 0x136   :  { %v2114_v45 = vpop.f32.mrb[33].mxu0 }
 0x137   :  { %v2115_v46 = vadd.f32 %v2114_v45, %v2113_v44  ;;  %v2116_v47 = vpop.f32.mrb[34].mxu0  ;;  %v2153_v49 = vpop.f32.mrb[32].mxu1 }
 0x138   :  { %v2117_v50 = vpop.f32.mrb[35].mxu0  ;;  %v2154_v53 = vpop.f32.mrb[33].mxu1 }
 0x139   :  { %v1477_v51 = vadd.f32 %v2115_v46, %v1412_v56  ;;  %v2118_v52 = vadd.f32 %v2117_v50, %v2116_v47  ;;  %v2155_v38 = vadd.f32 %v2154_v53, %v2153_v49  ;;  %v2156_v54 = vpop.f32.mrb[34].mxu1 }
 0x13a   :  { %v2157_v57 = vpop.f32.mrb[35].mxu1 }
 0x13b   :  { %v1480_v55 = vadd.f32 %v2118_v52, %v1415_v59  ;;  %v2158_v41 = vadd.f32 %v2157_v57, %v2156_v54  ;;  %v1542_v60 = vadd.f32 %v2155_v38, %v1477_v51 }
 0x13d   :  { %v2119_v61 = vpop.f32.mrb[36].mxu0  ;;  %v1545_v63 = vadd.f32 %v2158_v41, %v1480_v55 }
 0x13e   :  { %v2120_v62 = vpop.f32.mrb[37].mxu0 }
 0x13f   :  { %v2121_v1 = vadd.f32 %v2120_v62, %v2119_v61  ;;  %v2122_v2 = vpop.f32.mrb[38].mxu0  ;;  %v2159_v3 = vpop.f32.mrb[36].mxu1 }
 0x140   :  { %v2123_v5 = vpop.f32.mrb[39].mxu0  ;;  %v2160_v7 = vpop.f32.mrb[37].mxu1 }
 0x141   :  { %v1485_v48 = vadd.f32 %v2121_v1, %v1420_v9  ;;  %v2124_v6 = vadd.f32 %v2123_v5, %v2122_v2  ;;  %v2161_v58 = vadd.f32 %v2160_v7, %v2159_v3  ;;  %v2162_v56 = vpop.f32.mrb[38].mxu1 }
 0x142   :  { %v2163_v10 = vpop.f32.mrb[39].mxu1 }
 0x143   :  { %v1488_v8 = vadd.f32 %v2124_v6, %v1423_v11  ;;  %v2164_v12 = vadd.f32 %v2163_v10, %v2162_v56  ;;  %v1550_v13 = vadd.f32 %v2161_v58, %v1485_v48 }
 0x145   :  { %v2125_v59 = vpop.f32.mrb[40].mxu0  ;;  %v1553_v15 = vadd.f32 %v2164_v12, %v1488_v8 }
 0x146   :  { %v2126_v14 = vpop.f32.mrb[41].mxu0 }
 0x147   :  { %v2127_v16 = vadd.f32 %v2126_v14, %v2125_v59  ;;  %v2128_v17 = vpop.f32.mrb[42].mxu0  ;;  %v2165_v18 = vpop.f32.mrb[40].mxu1 }
 0x148   :  { %v2129_v19 = vpop.f32.mrb[43].mxu0  ;;  %v2166_v23 = vpop.f32.mrb[41].mxu1 }
 0x149   :  { %v1493_v0 = vadd.f32 %v2127_v16, %v1428_v4  ;;  %v2130_v21 = vadd.f32 %v2129_v19, %v2128_v17  ;;  %v2167_v24 = vadd.f32 %v2166_v23, %v2165_v18  ;;  %v2168_v9 = vpop.f32.mrb[42].mxu1 }
 0x14a   :  { %v2169_v26 = vpop.f32.mrb[43].mxu1 }
 0x14b   :  { %v1496_v25 = vadd.f32 %v2130_v21, %v1431_v27  ;;  %v2170_v28 = vadd.f32 %v2169_v26, %v2168_v9  ;;  %v1558_v29 = vadd.f32 %v2167_v24, %v1493_v0 }
 0x14d   :  { %v2131_v11 = vpop.f32.mrb[44].mxu0  ;;  %v1561_v31 = vadd.f32 %v2170_v28, %v1496_v25 }
 0x14e   :  { %v2132_v30 = vpop.f32.mrb[45].mxu0 }
 0x14f   :  { %v2133_v32 = vadd.f32 %v2132_v30, %v2131_v11  ;;  %v2134_v33 = vpop.f32.mrb[46].mxu0  ;;  %v2171_v34 = vpop.f32.mrb[44].mxu1 }
 0x150   :  { %v2135_v35 = vpop.f32.mrb[47].mxu0  ;;  %v2172_v37 = vpop.f32.mrb[45].mxu1 }
 0x151   :  { %v1501_v36 = vadd.f32 %v2133_v32, %v1436_v42  ;;  %v2136_v20 = vadd.f32 %v2135_v35, %v2134_v33  ;;  %v2173_v39 = vadd.f32 %v2172_v37, %v2171_v34  ;;  %v2174_v4 = vpop.f32.mrb[46].mxu1 }
 0x152   :  { %v2175_v43 = vpop.f32.mrb[47].mxu1 }
 0x153   :  { %v1504_v40 = vadd.f32 %v2136_v20, %v1439_v22  ;;  %v2176_v44 = vadd.f32 %v2175_v43, %v2174_v4  ;;  %v1566_v45 = vadd.f32 %v2173_v39, %v1501_v36  ;;  %v1678_v43 = vld [vmem:[%s2993_s3 + $0x8] sm:$0x3] }
 0x155   :  { %v2199_v27 = vpop.f32.mrb[48].mxu0  ;;  %v1569_v49 = vadd.f32 %v2176_v44, %v1504_v40  ;;  %v1689_v44 = vpop.permute.xlu1 %1688 }
 0x156   :  { %v1615_v46 = vadd.f32 %v2199_v27, %v1550_v13  ;;  %v1606_v47 = vpop.f32.mrb[49].mxu0  ;;  %v1684_v27 = vpop.permute.xlu0 %1683 }
 0x157   :  { %v1607_v50 = vadd.f32 %v1606_v47, %v1542_v60  ;;  %v2200_v51 = vpop.f32.mrb[50].mxu0 }
 0x158   :  { %v1639_v52 = vsub.f32 0.0, %v1615_v46  ;;  %v1618_v53 = vadd.f32 %v2200_v51, %v1553_v15  ;;  %v1609_v38 = vpop.f32.mrb[51].mxu0 }
 0x159   :  { %v1637_v54 = vsub.f32 0.0, %v1607_v50  ;;  %v1610_v55 = vadd.f32 %v1609_v38, %v1545_v63 }
 0x15a   :  { %v1649_v42 = vmul.f32 1.442695, %v1639_v52  ;;  %v1640_v57 = vsub.f32 0.0, %v1618_v53 }
 0x15b   :  { %v1645_v41 = vmul.f32 1.442695, %v1637_v54  ;;  %v1638_v61 = vsub.f32 0.0, %v1610_v55 }
 0x15c   :  { %2417 = vpow2.f32 %v1649_v42  ;;  %v1651_v22 = vmul.f32 1.442695, %v1640_v57 }
 0x15d   :  { %2419 = vpow2.f32 %v1645_v41  ;;  %v1647_v62 = vmul.f32 1.442695, %v1638_v61  ;;  %v2203_v1 = vpop.f32.mrb[52].mxu0 }
 0x15e   :  { %2421 = vpow2.f32 %v1651_v22  ;;  %v1631_v2 = vadd.f32 %v2203_v1, %v1566_v45  ;;  %v1622_v3 = vpop.f32.mrb[53].mxu0 }
 0x15f   :  { %2423 = vpow2.f32 %v1647_v62  ;;  %v1623_v60 = vadd.f32 %v1622_v3, %v1558_v29  ;;  %v2204_v5 = vpop.f32.mrb[54].mxu0 }
 0x160   :  { %v1643_v48 = vsub.f32 0.0, %v1631_v2  ;;  %v1634_v6 = vadd.f32 %v2204_v5, %v1569_v49  ;;  %v1625_v7 = vpop.f32.mrb[55].mxu0 }
 0x161   :  { %v1641_v58 = vsub.f32 0.0, %v1623_v60  ;;  %v1626_v63 = vadd.f32 %v1625_v7, %v1561_v31 }
 0x162   :  { %v1657_v56 = vmul.f32 1.442695, %v1643_v48  ;;  %v1644_v8 = vsub.f32 0.0, %v1634_v6 }
 0x163   :  { %v1653_v10 = vmul.f32 1.442695, %v1641_v58  ;;  %v1642_v12 = vsub.f32 0.0, %v1626_v63 }
 0x164   :  { %2425 = vpow2.f32 %v1657_v56  ;;  %v1659_v13 = vmul.f32 1.442695, %v1644_v8 }
 0x165   :  { %2427 = vpow2.f32 %v1653_v10  ;;  %v1655_v59 = vmul.f32 1.442695, %v1642_v12 }
 0x166   :  { %v2418_v14 = vpop.eup %2417  ;;  %2429 = vpow2.f32 %v1659_v13 }
 0x167   :  { %v2420_v15 = vpop.eup %2419  ;;  %v1663_v16 = vadd.f32 1.0, %v2418_v14  ;;  %2431 = vpow2.f32 %v1655_v59 }
 0x168   :  { %v2422_v17 = vpop.eup %2421  ;;  %v1661_v18 = vadd.f32 1.0, %v2420_v15 }
 0x169   :  { %v2424_v19 = vpop.eup %2423  ;;  %2433 = vrcp.f32 %v1663_v16  ;;  %v1664_v0 = vadd.f32 1.0, %v2422_v17 }
 0x16a   :  { %2435 = vrcp.f32 %v1661_v18  ;;  %v1662_v21 = vadd.f32 1.0, %v2424_v19 }
 0x16b   :  { %2437 = vrcp.f32 %v1664_v0 }
 0x16c   :  { %2439 = vrcp.f32 %v1662_v21 }
 0x16e   :  { %v2426_v23 = vpop.eup %2425 }
 0x16f   :  { %v2428_v24 = vpop.eup %2427  ;;  %v1667_v9 = vadd.f32 1.0, %v2426_v23 }
 0x170   :  { %v2430_v25 = vpop.eup %2429  ;;  %v1665_v26 = vadd.f32 1.0, %v2428_v24 }
 0x171   :  { %v2432_v28 = vpop.eup %2431  ;;  %2441 = vrcp.f32 %v1667_v9  ;;  %v1668_v29 = vadd.f32 1.0, %v2430_v25 }
 0x172   :  { %2443 = vrcp.f32 %v1665_v26  ;;  %v1666_v11 = vadd.f32 1.0, %v2432_v28 }
 0x173   :  { %v2434_v30 = vpop.eup %2433  ;;  %2445 = vrcp.f32 %v1668_v29 }
 0x174   :  { %v2436_v31 = vpop.eup %2435  ;;  %2447 = vrcp.f32 %v1666_v11 }
 0x175   :  { %v2438_v32 = vpop.eup %2437 }
 0x176   :  { %v2440_v33 = vpop.eup %2439  ;;  %v2228_v34 = vpack.c.bf16 %v2438_v32, %v2434_v30 }
 0x177   :  { %v2224_v35 = vpack.c.bf16 %v2440_v33, %v2436_v31 }
 0x179   :  { %2225 = vmatprep.subr.bf16.mxu1 %v2224_v35 }
 0x17a   :  { %2227 = vmatpush3.bf16.msra.mxu1 %v2224_v35 }
 0x17b   :  { %v2442_v36 = vpop.eup %2441  ;;  %2229 = vmatprep.subr.bf16.mxu1 %v2228_v34 }
 0x17c   :  { %v2444_v20 = vpop.eup %2443 }
 0x17d   :  { %v2446_v37 = vpop.eup %2445 }
 0x17e   :  { %v2448_v39 = vpop.eup %2447  ;;  %2231 = vmatpush3.bf16.msra.mxu1 %v2228_v34  ;;  %v2236_v4 = vpack.c.bf16 %v2446_v37, %v2442_v36 }
 0x17f   :  { %v2232_v40 = vpack.c.bf16 %v2448_v39, %v2444_v20 }
 0x181   :  { %2233 = vmatprep.subr.bf16.mxu1 %v2232_v40 }
 0x182   :  { %2235 = vmatpush3.bf16.msra.mxu1 %v2232_v40 }
 0x183   :  { %2237 = vmatprep.subr.bf16.mxu1 %v2236_v4 }
 0x186   :  { %2239 = vmatpush3.bf16.msra.mxu1 %v2236_v4 }
 0x189   :  { %2222 = vmatmul.mubr.msk.f32.vlgmr.msra.gmra.mrb[48].mxu1 %vm1691_vm1, %v1678_v43 }
 0x25c   :  { %v2223_v45 = vpop.f32.mrb[48].mxu1 }
 0x25d   :  { %v1770_v46 = vadd.f32 %v2223_v45, %v1689_v44  ;;  %v1764_v47 = vpop.f32.mrb[49].mxu1 }
 0x25e   :  { %v1765_v49 = vadd.f32 %v1764_v47, %v1684_v27 }
 0x25f   :  { %1776 = vst.msk [vmem:[%s2994_s5 + $0x8] sm:$0x3] %vm1775_vm2, %v1770_v46 }
 0x260   :  { %1774 = vst.msk [vmem:[%s2994_s5] sm:$0xff] %vm1773_vm3, %v1765_v49 }

</bundles_post_ra>
